<compile_context>
chip_gen: v5e
topology: v5e:2x2
jax: 0.10.0
libtpu: 0.0.40
codegen_flags: <defaults>
</compile_context>

<pallas_src>
import functools

import jax
import jax.numpy as jnp
from jax.experimental import pallas as pl
from jax.experimental.pallas import tpu as pltpu


# Row-grid constants: each sample is an 11x11 grid of 8x8-pixel super-cells
# (padded 88x88 image), flattened to 121 rows and padded to 128 rows so every
# batch-tile block obeys the (8,128) BlockSpec divisibility rule.
_GRID_W = 11
_VALID_POS = _GRID_W * _GRID_W        # 121 grid positions per sample
_S = 128                              # padded rows per sample
_HEAD_K = 7 * 7 * 64                  # 3136
_HEAD_K_PAD = 3200                    # padded to a multiple of 128 for K-tiling
_HEAD_TK = 640                        # 5 reduction steps of 640
_HIDDEN = 512


# ----------------------------------------------------------------------------
# Kernel 1: fused conv1 + conv2 + conv3 (+ biases, ReLUs), in-kernel im2col.
# ----------------------------------------------------------------------------
def _conv_stack_kernel(x_ref, w1_ref, b1_ref, w2_ref, b2_ref, w3_ref, b3_ref,
                       o_ref, *, tb):
    """Row r = sample*128 + 11*grid_y + grid_x.  Every conv tap is a contiguous
    row shift of that grid plus a lane slice; junk border rows are computed and
    never read by later layers / the head gather."""
    m1 = tb * _S - 19      # rows carrying conv1 outputs (valid at grid_y/x <= 9)
    m2 = tb * _S - 31      # conv2 rows (valid at <= 8)
    m3 = tb * _S - 55      # conv3 rows (valid at <= 6)

    # ---- conv1: an 8x8/stride-4 conv == a 2x2/stride-1 conv over 8x8 super-cells.
    # One matmul per output-parity class (ph, pw) of (oh, ow) = (2a+ph, 2e+pw).
    w1 = w1_ref[...]
    b1 = b1_ref[...]
    class_outs = []
    for ph in (0, 1):
        for pw in (0, 1):
            taps = []
            for di in (0, 1):
                for dj in (0, 1):
                    row_sh, sub_h = divmod(ph + di, 2)
                    col_sh, sub_w = divmod(pw + dj, 2)
                    shift = row_sh * _GRID_W + col_sh
                    lane0 = (sub_h * 2 + sub_w) * 64
                    taps.append(x_ref[shift:shift + m1, lane0:lane0 + 64])
            patches = jnp.concatenate(taps, axis=1)                  # [m1, 256]
            acc = jnp.dot(patches, w1, preferred_element_type=jnp.float32)
            class_outs.append(jnp.maximum(acc + b1, 0.0).astype(jnp.bfloat16))
    # y1 lanes = (ph, pw, out_channel): 4 * 32 = 128
    y1 = jnp.concatenate(class_outs, axis=1)                         # [m1, 128]

    # ---- conv2 (4x4, stride 2): tap (di, dj) hits conv1 parity class (di&1, dj&1)
    taps = []
    for di in range(4):
        for dj in range(4):
            row_sh, par_h = divmod(di, 2)
            col_sh, par_w = divmod(dj, 2)
            shift = row_sh * _GRID_W + col_sh
            lane0 = (par_h * 2 + par_w) * 32
            taps.append(y1[shift:shift + m2, lane0:lane0 + 32])
    p2 = jnp.concatenate(taps, axis=1)                               # [m2, 512]
    y2 = jnp.dot(p2, w2_ref[...], preferred_element_type=jnp.float32)
    y2 = jnp.maximum(y2 + b2_ref[...], 0.0).astype(jnp.bfloat16)     # [m2, 64]

    # ---- conv3 (3x3, stride 1)
    taps = []
    for di in range(3):
        for dj in range(3):
            shift = di * _GRID_W + dj
            taps.append(y2[shift:shift + m3, :])
    p3 = jnp.concatenate(taps, axis=1)                               # [m3, 576]
    y3 = jnp.dot(p3, w3_ref[...], preferred_element_type=jnp.float32)
    y3 = jnp.maximum(y3 + b3_ref[...], 0.0)

    o_ref[0:m3, :] = y3.astype(o_ref.dtype)


def conv_stack(x_rows, params, tb):
    rows = x_rows.shape[0]
    blk = tb * _S
    kernel = functools.partial(_conv_stack_kernel, tb=tb)
    return pl.pallas_call(
        kernel,
        out_shape=jax.ShapeDtypeStruct((rows, 64), jnp.bfloat16),
        grid=(rows // blk,),
        in_specs=[
            pl.BlockSpec((blk, 256), lambda i: (i, 0)),
            pl.BlockSpec((256, 32), lambda i: (0, 0)),
            pl.BlockSpec((1, 32), lambda i: (0, 0)),
            pl.BlockSpec((512, 64), lambda i: (0, 0)),
            pl.BlockSpec((1, 64), lambda i: (0, 0)),
            pl.BlockSpec((576, 64), lambda i: (0, 0)),
            pl.BlockSpec((1, 64), lambda i: (0, 0)),
        ],
        out_specs=pl.BlockSpec((blk, 64), lambda i: (i, 0)),
        compiler_params=pltpu.CompilerParams(
            dimension_semantics=("parallel",)),
    )(x_rows, params["w1"], params["b1"], params["w2"], params["b2"],
      params["w3"], params["b3"])


# ----------------------------------------------------------------------------
# Kernel 2: fused Linear(3136,512)+ReLU -> Linear(512,4), K-tiled reduction so
# the fc1 weight streams through a small VMEM window overlapped with compute.
# ----------------------------------------------------------------------------
def _head_kernel(x_ref, w1_ref, b1_ref, w2_ref, b2_ref, o_ref, acc_ref):
    k = pl.program_id(0)

    @pl.when(k == 0)
    def _():
        acc_ref[...] = jnp.zeros_like(acc_ref)

    acc_ref[...] += jnp.dot(x_ref[...], w1_ref[...],
                            preferred_element_type=jnp.float32)

    @pl.when(k == pl.num_programs(0) - 1)
    def _():
        h = jnp.maximum(acc_ref[...] + b1_ref[...], 0.0).astype(jnp.bfloat16)
        o_ref[...] = (jnp.dot(h, w2_ref[...], preferred_element_type=jnp.float32)
                      + b2_ref[...])


def mlp_head(x, wf1, bf1, wf2, bf2):
    m = x.shape[0]
    n_out = wf2.shape[1]
    return pl.pallas_call(
        _head_kernel,
        out_shape=jax.ShapeDtypeStruct((m, n_out), jnp.float32),
        grid=(_HEAD_K_PAD // _HEAD_TK,),
        in_specs=[
            pl.BlockSpec((m, _HEAD_TK), lambda k: (0, k)),
            pl.BlockSpec((_HEAD_TK, _HIDDEN), lambda k: (k, 0)),
            pl.BlockSpec((1, _HIDDEN), lambda k: (0, 0)),
            pl.BlockSpec((_HIDDEN, n_out), lambda k: (0, 0)),
            pl.BlockSpec((1, n_out), lambda k: (0, 0)),
        ],
        out_specs=pl.BlockSpec((m, n_out), lambda k: (0, 0)),
        scratch_shapes=[pltpu.VMEM((m, _HIDDEN), jnp.float32)],
        compiler_params=pltpu.CompilerParams(
            dimension_semantics=("arbitrary",)),
    )(x, wf1, bf1, wf2, bf2)


# ----------------------------------------------------------------------------
# Parameter init (kaiming_normal fan_out / relu, zero biases) plus the one-time
# layout transforms so the forward pass never reshapes or transposes weights.
# ----------------------------------------------------------------------------
def init_params(key, num_classes=4):
    ks = jax.random.split(key, 5)

    def conv_w(k, oc, ic, kh, kw):
        std = (2.0 / (oc * kh * kw)) ** 0.5
        return std * jax.random.normal(k, (oc, ic, kh, kw), jnp.float32)

    def lin_w(k, out_f, in_f):
        std = (2.0 / out_f) ** 0.5
        return std * jax.random.normal(k, (out_f, in_f), jnp.float32)

    raw = {
        "w1": conv_w(ks[0], 32, 4, 8, 8),
        "w2": conv_w(ks[1], 64, 32, 4, 4),
        "w3": conv_w(ks[2], 64, 64, 3, 3),
        "wf1": lin_w(ks[3], 512, _HEAD_K),
        "wf2": lin_w(ks[4], num_classes, 512),
    }

    bf16 = jnp.bfloat16
    # conv1: fold x/255; rows ordered (di, dj, sub_h, sub_w, in_ch) to match the
    # in-kernel super-cell tap order.
    w1k = ((raw["w1"] * (1.0 / 255.0))
           .reshape(32, 4, 2, 4, 2, 4)        # (oc, ic, di, sub_h, dj, sub_w)
           .transpose(2, 4, 3, 5, 1, 0)       # (di, dj, sub_h, sub_w, ic, oc)
           .reshape(256, 32))
    w2k = raw["w2"].transpose(2, 3, 1, 0).reshape(512, 64)     # (kh, kw, ic, oc)
    w3k = raw["w3"].transpose(2, 3, 1, 0).reshape(576, 64)
    # fc1: permute input rows from torch (c,h,w) flatten to our (h,w,c) flatten,
    # then zero-pad K 3136 -> 3200 for the K-tiled head.
    wf1_hwc = (raw["wf1"].T.reshape(64, 7, 7, _HIDDEN)
               .transpose(1, 2, 0, 3)
               .reshape(_HEAD_K, _HIDDEN))
    wf1_pad = jnp.pad(wf1_hwc, ((0, _HEAD_K_PAD - _HEAD_K), (0, 0)))

    params = {
        "w1": w1k.astype(bf16), "b1": jnp.zeros((1, 32), jnp.float32),
        "w2": w2k.astype(bf16), "b2": jnp.zeros((1, 64), jnp.float32),
        "w3": w3k.astype(bf16), "b3": jnp.zeros((1, 64), jnp.float32),
        "wf1": wf1_pad.astype(bf16), "bf1": jnp.zeros((1, _HIDDEN), jnp.float32),
        "wf2": raw["wf2"].T.astype(bf16),
        "bf2": jnp.zeros((1, num_classes), jnp.float32),
    }
    return params, raw


# ----------------------------------------------------------------------------
# Forward pass (matches Net.forward semantics)
# ----------------------------------------------------------------------------
@jax.jit
def net_forward(params, x_nchw):
    n = x_nchw.shape[0]
    tb = 1 if n < 8 else 8          # tiny batches: 1 sample/step so both v7x TCs work
    n_pad = ((n + tb - 1) // tb) * tb

    # Input repack (thin XLA glue on uint8): NCHW -> 8x8 super-cell rows, bf16.
    x = x_nchw
    if n_pad != n:
        x = jnp.pad(x, ((0, n_pad - n), (0, 0), (0, 0), (0, 0)))
    x = jnp.pad(x, ((0, 0), (0, 0), (0, 4), (0, 4)))            # 84x84 -> 88x88
    x = x.reshape(n_pad, 4, _GRID_W, 2, 4, _GRID_W, 2, 4)       # (n,c,A,h2,hin,E,w2,win)
    x = x.transpose(0, 2, 5, 3, 6, 4, 7, 1)                     # (n,A,E,h2,w2,hin,win,c)
    x = x.reshape(n_pad, _VALID_POS, 256)
    x = jnp.pad(x, ((0, 0), (0, _S - _VALID_POS), (0, 0)))
    x = x.astype(jnp.bfloat16).reshape(n_pad * _S, 256)

    # Fused conv1+conv2+conv3 (single pallas_call, weights resident in VMEM).
    y3 = conv_stack(x, params, tb)                              # [n_pad*128, 64] bf16

    # Gather the valid 7x7 grid per sample, flatten (h,w,c), pad K for the head.
    h = y3.reshape(n_pad, _S, 64)[:, :_VALID_POS, :]
    h = h.reshape(n_pad, _GRID_W, _GRID_W, 64)[:, :7, :7, :]
    h = h.reshape(n_pad, _HEAD_K)
    h = jnp.pad(h, ((0, 0), (0, _HEAD_K_PAD - _HEAD_K)))

    # Fused FC1+ReLU+FC2 (K-tiled pallas_call).
    out = mlp_head(h, params["wf1"], params["bf1"],
                   params["wf2"], params["bf2"])
    return out[:n]


# ----------------------------------------------------------------------------
# Pure-XLA f32 reference for a loose numerical check.
# ----------------------------------------------------------------------------
@jax.jit
def reference_forward(raw, x_nchw):
    x = x_nchw.astype(jnp.float32) / 255.0

    def conv(v, w, stride):
        return jax.lax.conv_general_dilated(
            v, w, window_strides=(stride, stride), padding="VALID",
            dimension_numbers=("NCHW", "OIHW", "NCHW"),
            precision=jax.lax.Precision.HIGHEST)

    x = jax.nn.relu(conv(x, raw["w1"], 4))
    x = jax.nn.relu(conv(x, raw["w2"], 2))
    x = jax.nn.relu(conv(x, raw["w3"], 1))
    x = x.reshape(x.shape[0], -1)
    x = jax.nn.relu(jnp.dot(x, raw["wf1"].T, precision=jax.lax.Precision.HIGHEST))
    return jnp.dot(x, raw["wf2"].T, precision=jax.lax.Precision.HIGHEST)


if __name__ == "__main__":
    key = jax.random.PRNGKey(0)
    k_param, k_x = jax.random.split(key)

    params, raw = init_params(k_param, num_classes=4)

    # Spatial size must be 84x84 (the classifier hardcodes 7*7*64); small batch = 2.
    x = jax.random.randint(k_x, (2, 4, 84, 84), 0, 256,
                           dtype=jnp.int32).astype(jnp.uint8)

    out = jax.block_until_ready(net_forward(params, x))
    assert out.shape == (2, 4) and out.dtype == jnp.float32

    # Loose check vs the f32 XLA reference (bf16 weights/activations in the
    # kernels give ~1% relative deviation; a structural bug would be O(scale)).
    ref = jax.block_until_ready(reference_forward(raw, x))
    scale = float(jnp.max(jnp.abs(ref))) + 1e-6
    err = float(jnp.max(jnp.abs(out - ref)))
    assert err <= 0.08 * scale + 0.05, (err, scale)

    print("KERNEL_OK")
</pallas_src>

<mosaic_0001>
module attributes {stable_mosaic.version = 11 : i64} {
  func.func @_conv_stack_kernel(%arg0: i32, %arg1: memref<128x256xbf16, #tpu.memory_space<vmem>>, %arg2: memref<256x32xbf16, #tpu.memory_space<vmem>>, %arg3: memref<1x32xf32, #tpu.memory_space<vmem>>, %arg4: memref<512x64xbf16, #tpu.memory_space<vmem>>, %arg5: memref<1x64xf32, #tpu.memory_space<vmem>>, %arg6: memref<576x64xbf16, #tpu.memory_space<vmem>>, %arg7: memref<1x64xf32, #tpu.memory_space<vmem>>, %arg8: memref<128x64xbf16, #tpu.memory_space<vmem>>) attributes {dimension_semantics = [#tpu.dimension_semantics<parallel>], iteration_bounds = array<i64: 2>, scalar_prefetch = 0 : i64, scratch_operands = 0 : i64, tpu.core_type = #tpu.core_type<tc>, window_params = [{transform_indices = @transform_0, window_bounds = array<i64: 128, 256>}, {pipeline_mode = #tpu.pipeline_mode<synchronous>, transform_indices = @transform_1, window_bounds = array<i64: 256, 32>}, {pipeline_mode = #tpu.pipeline_mode<synchronous>, transform_indices = @transform_2, window_bounds = array<i64: 1, 32>}, {pipeline_mode = #tpu.pipeline_mode<synchronous>, transform_indices = @transform_3, window_bounds = array<i64: 512, 64>}, {pipeline_mode = #tpu.pipeline_mode<synchronous>, transform_indices = @transform_4, window_bounds = array<i64: 1, 64>}, {pipeline_mode = #tpu.pipeline_mode<synchronous>, transform_indices = @transform_5, window_bounds = array<i64: 576, 64>}, {pipeline_mode = #tpu.pipeline_mode<synchronous>, transform_indices = @transform_6, window_bounds = array<i64: 1, 64>}, {transform_indices = @transform_7, window_bounds = array<i64: 128, 64>}]} {
    %c0 = arith.constant 0 : index
    %c0_0 = arith.constant 0 : index
    %0 = vector.load %arg2[%c0, %c0_0] : memref<256x32xbf16, #tpu.memory_space<vmem>>, vector<256x32xbf16>
    %c0_1 = arith.constant 0 : index
    %c0_2 = arith.constant 0 : index
    %1 = vector.load %arg3[%c0_1, %c0_2] : memref<1x32xf32, #tpu.memory_space<vmem>>, vector<1x32xf32>
    %c0_3 = arith.constant 0 : index
    %c0_4 = arith.constant 0 : index
    %2 = vector.load %arg1[%c0_3, %c0_4] : memref<128x256xbf16, #tpu.memory_space<vmem>>, vector<109x64xbf16>
    %c0_5 = arith.constant 0 : index
    %c64 = arith.constant 64 : index
    %3 = vector.load %arg1[%c0_5, %c64] : memref<128x256xbf16, #tpu.memory_space<vmem>>, vector<109x64xbf16>
    %c0_6 = arith.constant 0 : index
    %c128 = arith.constant 128 : index
    %4 = vector.load %arg1[%c0_6, %c128] : memref<128x256xbf16, #tpu.memory_space<vmem>>, vector<109x64xbf16>
    %c0_7 = arith.constant 0 : index
    %c192 = arith.constant 192 : index
    %5 = vector.load %arg1[%c0_7, %c192] : memref<128x256xbf16, #tpu.memory_space<vmem>>, vector<109x64xbf16>
    %6 = tpu.concatenate %2, %3, %4, %5 in 1 : vector<109x64xbf16>, vector<109x64xbf16>, vector<109x64xbf16>, vector<109x64xbf16> -> vector<109x256xbf16>
    %cst = arith.constant dense<0.000000e+00> : vector<109x32xf32>
    %7 = tpu.matmul %6, %0, %cst {dimension_numbers = #tpu.dot_dimension_numbers<[1], [0], [0], [1], [0, 0, 1, 1], [], []>} : vector<109x256xbf16>, vector<256x32xbf16>, vector<109x32xf32> -> vector<109x32xf32>
    %8 = vector.broadcast %1 : vector<1x32xf32> to vector<109x32xf32>
    %9 = arith.addf %7, %8 : vector<109x32xf32>
    %cst_8 = arith.constant 0.000000e+00 : f32
    %10 = vector.broadcast %cst_8 : f32 to vector<109x32xf32>
    %11 = arith.maximumf %9, %10 : vector<109x32xf32>
    %12 = arith.truncf %11 : vector<109x32xf32> to vector<109x32xbf16>
    %c0_9 = arith.constant 0 : index
    %c64_10 = arith.constant 64 : index
    %13 = vector.load %arg1[%c0_9, %c64_10] : memref<128x256xbf16, #tpu.memory_space<vmem>>, vector<109x64xbf16>
    %c1 = arith.constant 1 : index
    %c0_11 = arith.constant 0 : index
    %14 = vector.load %arg1[%c1, %c0_11] : memref<128x256xbf16, #tpu.memory_space<vmem>>, vector<109x64xbf16>
    %c0_12 = arith.constant 0 : index
    %c192_13 = arith.constant 192 : index
    %15 = vector.load %arg1[%c0_12, %c192_13] : memref<128x256xbf16, #tpu.memory_space<vmem>>, vector<109x64xbf16>
    %c1_14 = arith.constant 1 : index
    %c128_15 = arith.constant 128 : index
    %16 = vector.load %arg1[%c1_14, %c128_15] : memref<128x256xbf16, #tpu.memory_space<vmem>>, vector<109x64xbf16>
    %17 = tpu.concatenate %13, %14, %15, %16 in 1 : vector<109x64xbf16>, vector<109x64xbf16>, vector<109x64xbf16>, vector<109x64xbf16> -> vector<109x256xbf16>
    %cst_16 = arith.constant dense<0.000000e+00> : vector<109x32xf32>
    %18 = tpu.matmul %17, %0, %cst_16 {dimension_numbers = #tpu.dot_dimension_numbers<[1], [0], [0], [1], [0, 0, 1, 1], [], []>} : vector<109x256xbf16>, vector<256x32xbf16>, vector<109x32xf32> -> vector<109x32xf32>
    %19 = vector.broadcast %1 : vector<1x32xf32> to vector<109x32xf32>
    %20 = arith.addf %18, %19 : vector<109x32xf32>
    %cst_17 = arith.constant 0.000000e+00 : f32
    %21 = vector.broadcast %cst_17 : f32 to vector<109x32xf32>
    %22 = arith.maximumf %20, %21 : vector<109x32xf32>
    %23 = arith.truncf %22 : vector<109x32xf32> to vector<109x32xbf16>
    %c0_18 = arith.constant 0 : index
    %c128_19 = arith.constant 128 : index
    %24 = vector.load %arg1[%c0_18, %c128_19] : memref<128x256xbf16, #tpu.memory_space<vmem>>, vector<109x64xbf16>
    %c0_20 = arith.constant 0 : index
    %c192_21 = arith.constant 192 : index
    %25 = vector.load %arg1[%c0_20, %c192_21] : memref<128x256xbf16, #tpu.memory_space<vmem>>, vector<109x64xbf16>
    %c11 = arith.constant 11 : index
    %c0_22 = arith.constant 0 : index
    %26 = vector.load %arg1[%c11, %c0_22] : memref<128x256xbf16, #tpu.memory_space<vmem>>, vector<109x64xbf16>
    %c11_23 = arith.constant 11 : index
    %c64_24 = arith.constant 64 : index
    %27 = vector.load %arg1[%c11_23, %c64_24] : memref<128x256xbf16, #tpu.memory_space<vmem>>, vector<109x64xbf16>
    %28 = tpu.concatenate %24, %25, %26, %27 in 1 : vector<109x64xbf16>, vector<109x64xbf16>, vector<109x64xbf16>, vector<109x64xbf16> -> vector<109x256xbf16>
    %cst_25 = arith.constant dense<0.000000e+00> : vector<109x32xf32>
    %29 = tpu.matmul %28, %0, %cst_25 {dimension_numbers = #tpu.dot_dimension_numbers<[1], [0], [0], [1], [0, 0, 1, 1], [], []>} : vector<109x256xbf16>, vector<256x32xbf16>, vector<109x32xf32> -> vector<109x32xf32>
    %30 = vector.broadcast %1 : vector<1x32xf32> to vector<109x32xf32>
    %31 = arith.addf %29, %30 : vector<109x32xf32>
    %cst_26 = arith.constant 0.000000e+00 : f32
    %32 = vector.broadcast %cst_26 : f32 to vector<109x32xf32>
    %33 = arith.maximumf %31, %32 : vector<109x32xf32>
    %34 = arith.truncf %33 : vector<109x32xf32> to vector<109x32xbf16>
    %c0_27 = arith.constant 0 : index
    %c192_28 = arith.constant 192 : index
    %35 = vector.load %arg1[%c0_27, %c192_28] : memref<128x256xbf16, #tpu.memory_space<vmem>>, vector<109x64xbf16>
    %c1_29 = arith.constant 1 : index
    %c128_30 = arith.constant 128 : index
    %36 = vector.load %arg1[%c1_29, %c128_30] : memref<128x256xbf16, #tpu.memory_space<vmem>>, vector<109x64xbf16>
    %c11_31 = arith.constant 11 : index
    %c64_32 = arith.constant 64 : index
    %37 = vector.load %arg1[%c11_31, %c64_32] : memref<128x256xbf16, #tpu.memory_space<vmem>>, vector<109x64xbf16>
    %c12 = arith.constant 12 : index
    %c0_33 = arith.constant 0 : index
    %38 = vector.load %arg1[%c12, %c0_33] : memref<128x256xbf16, #tpu.memory_space<vmem>>, vector<109x64xbf16>
    %39 = tpu.concatenate %35, %36, %37, %38 in 1 : vector<109x64xbf16>, vector<109x64xbf16>, vector<109x64xbf16>, vector<109x64xbf16> -> vector<109x256xbf16>
    %cst_34 = arith.constant dense<0.000000e+00> : vector<109x32xf32>
    %40 = tpu.matmul %39, %0, %cst_34 {dimension_numbers = #tpu.dot_dimension_numbers<[1], [0], [0], [1], [0, 0, 1, 1], [], []>} : vector<109x256xbf16>, vector<256x32xbf16>, vector<109x32xf32> -> vector<109x32xf32>
    %41 = vector.broadcast %1 : vector<1x32xf32> to vector<109x32xf32>
    %42 = arith.addf %40, %41 : vector<109x32xf32>
    %cst_35 = arith.constant 0.000000e+00 : f32
    %43 = vector.broadcast %cst_35 : f32 to vector<109x32xf32>
    %44 = arith.maximumf %42, %43 : vector<109x32xf32>
    %45 = arith.truncf %44 : vector<109x32xf32> to vector<109x32xbf16>
    %46 = tpu.concatenate %12, %23, %34, %45 in 1 : vector<109x32xbf16>, vector<109x32xbf16>, vector<109x32xbf16>, vector<109x32xbf16> -> vector<109x128xbf16>
    %47 = vector.extract_strided_slice %46 {offsets = [0, 0], sizes = [97, 32], strides = [1, 1]} : vector<109x128xbf16> to vector<97x32xbf16>
    %48 = vector.extract_strided_slice %46 {offsets = [0, 32], sizes = [97, 32], strides = [1, 1]} : vector<109x128xbf16> to vector<97x32xbf16>
    %49 = vector.extract_strided_slice %46 {offsets = [1, 0], sizes = [97, 32], strides = [1, 1]} : vector<109x128xbf16> to vector<97x32xbf16>
    %50 = vector.extract_strided_slice %46 {offsets = [1, 32], sizes = [97, 32], strides = [1, 1]} : vector<109x128xbf16> to vector<97x32xbf16>
    %51 = vector.extract_strided_slice %46 {offsets = [0, 64], sizes = [97, 32], strides = [1, 1]} : vector<109x128xbf16> to vector<97x32xbf16>
    %52 = vector.extract_strided_slice %46 {offsets = [0, 96], sizes = [97, 32], strides = [1, 1]} : vector<109x128xbf16> to vector<97x32xbf16>
    %53 = vector.extract_strided_slice %46 {offsets = [1, 64], sizes = [97, 32], strides = [1, 1]} : vector<109x128xbf16> to vector<97x32xbf16>
    %54 = vector.extract_strided_slice %46 {offsets = [1, 96], sizes = [97, 32], strides = [1, 1]} : vector<109x128xbf16> to vector<97x32xbf16>
    %55 = vector.extract_strided_slice %46 {offsets = [11, 0], sizes = [97, 32], strides = [1, 1]} : vector<109x128xbf16> to vector<97x32xbf16>
    %56 = vector.extract_strided_slice %46 {offsets = [11, 32], sizes = [97, 32], strides = [1, 1]} : vector<109x128xbf16> to vector<97x32xbf16>
    %57 = vector.extract_strided_slice %46 {offsets = [12, 0], sizes = [97, 32], strides = [1, 1]} : vector<109x128xbf16> to vector<97x32xbf16>
    %58 = vector.extract_strided_slice %46 {offsets = [12, 32], sizes = [97, 32], strides = [1, 1]} : vector<109x128xbf16> to vector<97x32xbf16>
    %59 = vector.extract_strided_slice %46 {offsets = [11, 64], sizes = [97, 32], strides = [1, 1]} : vector<109x128xbf16> to vector<97x32xbf16>
    %60 = vector.extract_strided_slice %46 {offsets = [11, 96], sizes = [97, 32], strides = [1, 1]} : vector<109x128xbf16> to vector<97x32xbf16>
    %61 = vector.extract_strided_slice %46 {offsets = [12, 64], sizes = [97, 32], strides = [1, 1]} : vector<109x128xbf16> to vector<97x32xbf16>
    %62 = vector.extract_strided_slice %46 {offsets = [12, 96], sizes = [97, 32], strides = [1, 1]} : vector<109x128xbf16> to vector<97x32xbf16>
    %63 = tpu.concatenate %47, %48, %49, %50, %51, %52, %53, %54, %55, %56, %57, %58, %59, %60, %61, %62 in 1 : vector<97x32xbf16>, vector<97x32xbf16>, vector<97x32xbf16>, vector<97x32xbf16>, vector<97x32xbf16>, vector<97x32xbf16>, vector<97x32xbf16>, vector<97x32xbf16>, vector<97x32xbf16>, vector<97x32xbf16>, vector<97x32xbf16>, vector<97x32xbf16>, vector<97x32xbf16>, vector<97x32xbf16>, vector<97x32xbf16>, vector<97x32xbf16> -> vector<97x512xbf16>
    %c0_36 = arith.constant 0 : index
    %c0_37 = arith.constant 0 : index
    %64 = vector.load %arg4[%c0_36, %c0_37] : memref<512x64xbf16, #tpu.memory_space<vmem>>, vector<512x64xbf16>
    %cst_38 = arith.constant dense<0.000000e+00> : vector<97x64xf32>
    %65 = tpu.matmul %63, %64, %cst_38 {dimension_numbers = #tpu.dot_dimension_numbers<[1], [0], [0], [1], [0, 0, 1, 1], [], []>} : vector<97x512xbf16>, vector<512x64xbf16>, vector<97x64xf32> -> vector<97x64xf32>
    %c0_39 = arith.constant 0 : index
    %c0_40 = arith.constant 0 : index
    %66 = vector.load %arg5[%c0_39, %c0_40] : memref<1x64xf32, #tpu.memory_space<vmem>>, vector<1x64xf32>
    %67 = vector.broadcast %66 : vector<1x64xf32> to vector<97x64xf32>
    %68 = arith.addf %65, %67 : vector<97x64xf32>
    %cst_41 = arith.constant 0.000000e+00 : f32
    %69 = vector.broadcast %cst_41 : f32 to vector<97x64xf32>
    %70 = arith.maximumf %68, %69 : vector<97x64xf32>
    %71 = arith.truncf %70 : vector<97x64xf32> to vector<97x64xbf16>
    %72 = vector.extract_strided_slice %71 {offsets = [0, 0], sizes = [73, 64], strides = [1, 1]} : vector<97x64xbf16> to vector<73x64xbf16>
    %73 = vector.extract_strided_slice %71 {offsets = [1, 0], sizes = [73, 64], strides = [1, 1]} : vector<97x64xbf16> to vector<73x64xbf16>
    %74 = vector.extract_strided_slice %71 {offsets = [2, 0], sizes = [73, 64], strides = [1, 1]} : vector<97x64xbf16> to vector<73x64xbf16>
    %75 = vector.extract_strided_slice %71 {offsets = [11, 0], sizes = [73, 64], strides = [1, 1]} : vector<97x64xbf16> to vector<73x64xbf16>
    %76 = vector.extract_strided_slice %71 {offsets = [12, 0], sizes = [73, 64], strides = [1, 1]} : vector<97x64xbf16> to vector<73x64xbf16>
    %77 = vector.extract_strided_slice %71 {offsets = [13, 0], sizes = [73, 64], strides = [1, 1]} : vector<97x64xbf16> to vector<73x64xbf16>
    %78 = vector.extract_strided_slice %71 {offsets = [22, 0], sizes = [73, 64], strides = [1, 1]} : vector<97x64xbf16> to vector<73x64xbf16>
    %79 = vector.extract_strided_slice %71 {offsets = [23, 0], sizes = [73, 64], strides = [1, 1]} : vector<97x64xbf16> to vector<73x64xbf16>
    %80 = vector.extract_strided_slice %71 {offsets = [24, 0], sizes = [73, 64], strides = [1, 1]} : vector<97x64xbf16> to vector<73x64xbf16>
    %81 = tpu.concatenate %72, %73, %74, %75, %76, %77, %78, %79, %80 in 1 : vector<73x64xbf16>, vector<73x64xbf16>, vector<73x64xbf16>, vector<73x64xbf16>, vector<73x64xbf16>, vector<73x64xbf16>, vector<73x64xbf16>, vector<73x64xbf16>, vector<73x64xbf16> -> vector<73x576xbf16>
    %c0_42 = arith.constant 0 : index
    %c0_43 = arith.constant 0 : index
    %82 = vector.load %arg6[%c0_42, %c0_43] : memref<576x64xbf16, #tpu.memory_space<vmem>>, vector<576x64xbf16>
    %cst_44 = arith.constant dense<0.000000e+00> : vector<73x64xf32>
    %83 = tpu.matmul %81, %82, %cst_44 {dimension_numbers = #tpu.dot_dimension_numbers<[1], [0], [0], [1], [0, 0, 1, 1], [], []>} : vector<73x576xbf16>, vector<576x64xbf16>, vector<73x64xf32> -> vector<73x64xf32>
    %c0_45 = arith.constant 0 : index
    %c0_46 = arith.constant 0 : index
    %84 = vector.load %arg7[%c0_45, %c0_46] : memref<1x64xf32, #tpu.memory_space<vmem>>, vector<1x64xf32>
    %85 = vector.broadcast %84 : vector<1x64xf32> to vector<73x64xf32>
    %86 = arith.addf %83, %85 : vector<73x64xf32>
    %cst_47 = arith.constant 0.000000e+00 : f32
    %87 = vector.broadcast %cst_47 : f32 to vector<73x64xf32>
    %88 = arith.maximumf %86, %87 : vector<73x64xf32>
    %89 = arith.truncf %88 : vector<73x64xf32> to vector<73x64xbf16>
    %c0_48 = arith.constant 0 : index
    %c0_49 = arith.constant 0 : index
    %90 = vector.load %arg8[%c0_48, %c0_49] : memref<128x64xbf16, #tpu.memory_space<vmem>>, vector<73x64xbf16>
    tpu.vector_store %arg8[%c0_48, %c0_49], %89 {strides = array<i32>} : memref<128x64xbf16, #tpu.memory_space<vmem>>, vector<73x64xbf16>,
    return
  }
  func.func @transform_0(%arg0: i32) -> (i32, i32) {
    %c0_i32 = arith.constant 0 : i32
    %c0_i32_0 = arith.constant 0 : i32
    return %arg0, %c0_i32 : i32, i32
  }
  func.func @transform_1(%arg0: i32) -> (i32, i32) {
    %c0_i32 = arith.constant 0 : i32
    %c0_i32_0 = arith.constant 0 : i32
    %c0_i32_1 = arith.constant 0 : i32
    return %c0_i32, %c0_i32_0 : i32, i32
  }
  func.func @transform_2(%arg0: i32) -> (i32, i32) {
    %c0_i32 = arith.constant 0 : i32
    %c0_i32_0 = arith.constant 0 : i32
    %c0_i32_1 = arith.constant 0 : i32
    return %c0_i32, %c0_i32_0 : i32, i32
  }
  func.func @transform_3(%arg0: i32) -> (i32, i32) {
    %c0_i32 = arith.constant 0 : i32
    %c0_i32_0 = arith.constant 0 : i32
    %c0_i32_1 = arith.constant 0 : i32
    return %c0_i32, %c0_i32_0 : i32, i32
  }
  func.func @transform_4(%arg0: i32) -> (i32, i32) {
    %c0_i32 = arith.constant 0 : i32
    %c0_i32_0 = arith.constant 0 : i32
    %c0_i32_1 = arith.constant 0 : i32
    return %c0_i32, %c0_i32_0 : i32, i32
  }
  func.func @transform_5(%arg0: i32) -> (i32, i32) {
    %c0_i32 = arith.constant 0 : i32
    %c0_i32_0 = arith.constant 0 : i32
    %c0_i32_1 = arith.constant 0 : i32
    return %c0_i32, %c0_i32_0 : i32, i32
  }
  func.func @transform_6(%arg0: i32) -> (i32, i32) {
    %c0_i32 = arith.constant 0 : i32
    %c0_i32_0 = arith.constant 0 : i32
    %c0_i32_1 = arith.constant 0 : i32
    return %c0_i32, %c0_i32_0 : i32, i32
  }
  func.func @transform_7(%arg0: i32) -> (i32, i32) {
    %c0_i32 = arith.constant 0 : i32
    %c0_i32_0 = arith.constant 0 : i32
    return %arg0, %c0_i32 : i32, i32
  }
}

module attributes {stable_mosaic.version = 11 : i64} {
  func.func @_head_kernel(%arg0: i32, %arg1: memref<2x640xbf16, #tpu.memory_space<vmem>>, %arg2: memref<640x512xbf16, #tpu.memory_space<vmem>>, %arg3: memref<1x512xf32, #tpu.memory_space<vmem>>, %arg4: memref<512x4xbf16, #tpu.memory_space<vmem>>, %arg5: memref<1x4xf32, #tpu.memory_space<vmem>>, %arg6: memref<2x4xf32, #tpu.memory_space<vmem>>, %arg7: memref<2x512xf32, #tpu.memory_space<vmem>>) attributes {dimension_semantics = [#tpu.dimension_semantics<arbitrary>], iteration_bounds = array<i64: 5>, scalar_prefetch = 0 : i64, scratch_operands = 1 : i64, tpu.core_type = #tpu.core_type<tc>, window_params = [{transform_indices = @transform_0, window_bounds = array<i64: 2, 640>}, {transform_indices = @transform_1, window_bounds = array<i64: 640, 512>}, {pipeline_mode = #tpu.pipeline_mode<synchronous>, transform_indices = @transform_2, window_bounds = array<i64: 1, 512>}, {pipeline_mode = #tpu.pipeline_mode<synchronous>, transform_indices = @transform_3, window_bounds = array<i64: 512, 4>}, {pipeline_mode = #tpu.pipeline_mode<synchronous>, transform_indices = @transform_4, window_bounds = array<i64: 1, 4>}, {pipeline_mode = #tpu.pipeline_mode<synchronous>, transform_indices = @transform_5, window_bounds = array<i64: 2, 4>}]} {
    %c0_i32 = arith.constant 0 : i32
    %0 = arith.cmpi eq, %arg0, %c0_i32 : i32
    %1 = arith.extui %0 : i1 to i32
    %c0_i32_0 = arith.constant 0 : i32
    %2 = arith.cmpi ne, %1, %c0_i32_0 : i32
    scf.if %2 {
      %cst_9 = arith.constant 0.000000e+00 : f32
      %12 = vector.broadcast %cst_9 : f32 to vector<2x512xf32>
      %c0_10 = arith.constant 0 : index
      %c0_11 = arith.constant 0 : index
      %13 = vector.load %arg7[%c0_10, %c0_11] : memref<2x512xf32, #tpu.memory_space<vmem>>, vector<2x512xf32>
      tpu.vector_store %arg7[%c0_10, %c0_11], %12 {strides = array<i32>} : memref<2x512xf32, #tpu.memory_space<vmem>>, vector<2x512xf32>,
    } else {
    }
    %c0 = arith.constant 0 : index
    %c0_1 = arith.constant 0 : index
    %3 = vector.load %arg7[%c0, %c0_1] : memref<2x512xf32, #tpu.memory_space<vmem>>, vector<2x512xf32>
    %c0_2 = arith.constant 0 : index
    %c0_3 = arith.constant 0 : index
    %4 = vector.load %arg1[%c0_2, %c0_3] : memref<2x640xbf16, #tpu.memory_space<vmem>>, vector<2x640xbf16>
    %c0_4 = arith.constant 0 : index
    %c0_5 = arith.constant 0 : index
    %5 = vector.load %arg2[%c0_4, %c0_5] : memref<640x512xbf16, #tpu.memory_space<vmem>>, vector<640x512xbf16>
    %cst = arith.constant dense<0.000000e+00> : vector<2x512xf32>
    %6 = tpu.matmul %4, %5, %cst {dimension_numbers = #tpu.dot_dimension_numbers<[1], [0], [0], [1], [0, 0, 1, 1], [], []>} : vector<2x640xbf16>, vector<640x512xbf16>, vector<2x512xf32> -> vector<2x512xf32>
    %7 = arith.addf %3, %6 : vector<2x512xf32>
    %c0_6 = arith.constant 0 : index
    %c0_7 = arith.constant 0 : index
    %8 = vector.load %arg7[%c0_6, %c0_7] : memref<2x512xf32, #tpu.memory_space<vmem>>, vector<2x512xf32>
    tpu.vector_store %arg7[%c0_6, %c0_7], %7 {strides = array<i32>} : memref<2x512xf32, #tpu.memory_space<vmem>>, vector<2x512xf32>,
    %c4_i32 = arith.constant 4 : i32
    %9 = arith.cmpi eq, %arg0, %c4_i32 : i32
    %10 = arith.extui %9 : i1 to i32
    %c0_i32_8 = arith.constant 0 : i32
    %11 = arith.cmpi ne, %10, %c0_i32_8 : i32
    scf.if %11 {
      %c0_9 = arith.constant 0 : index
      %c0_10 = arith.constant 0 : index
      %12 = vector.load %arg7[%c0_9, %c0_10] : memref<2x512xf32, #tpu.memory_space<vmem>>, vector<2x512xf32>
      %c0_11 = arith.constant 0 : index
      %c0_12 = arith.constant 0 : index
      %13 = vector.load %arg3[%c0_11, %c0_12] : memref<1x512xf32, #tpu.memory_space<vmem>>, vector<1x512xf32>
      %14 = vector.broadcast %13 : vector<1x512xf32> to vector<2x512xf32>
      %15 = arith.addf %12, %14 : vector<2x512xf32>
      %cst_13 = arith.constant 0.000000e+00 : f32
      %16 = vector.broadcast %cst_13 : f32 to vector<2x512xf32>
      %17 = arith.maximumf %15, %16 : vector<2x512xf32>
      %18 = arith.truncf %17 : vector<2x512xf32> to vector<2x512xbf16>
      %c0_14 = arith.constant 0 : index
      %c0_15 = arith.constant 0 : index
      %19 = vector.load %arg4[%c0_14, %c0_15] : memref<512x4xbf16, #tpu.memory_space<vmem>>, vector<512x4xbf16>
      %cst_16 = arith.constant dense<0.000000e+00> : vector<2x4xf32>
      %20 = tpu.matmul %18, %19, %cst_16 {dimension_numbers = #tpu.dot_dimension_numbers<[1], [0], [0], [1], [0, 0, 1, 1], [], []>} : vector<2x512xbf16>, vector<512x4xbf16>, vector<2x4xf32> -> vector<2x4xf32>
      %c0_17 = arith.constant 0 : index
      %c0_18 = arith.constant 0 : index
      %21 = vector.load %arg5[%c0_17, %c0_18] : memref<1x4xf32, #tpu.memory_space<vmem>>, vector<1x4xf32>
      %22 = vector.broadcast %21 : vector<1x4xf32> to vector<2x4xf32>
      %23 = arith.addf %20, %22 : vector<2x4xf32>
      %c0_19 = arith.constant 0 : index
      %c0_20 = arith.constant 0 : index
      %24 = vector.load %arg6[%c0_19, %c0_20] : memref<2x4xf32, #tpu.memory_space<vmem>>, vector<2x4xf32>
      tpu.vector_store %arg6[%c0_19, %c0_20], %23 {strides = array<i32>} : memref<2x4xf32, #tpu.memory_space<vmem>>, vector<2x4xf32>,
    } else {
    }
    return
  }
  func.func @transform_0(%arg0: i32) -> (i32, i32) {
    %c0_i32 = arith.constant 0 : i32
    %c0_i32_0 = arith.constant 0 : i32
    return %c0_i32, %arg0 : i32, i32
  }
  func.func @transform_1(%arg0: i32) -> (i32, i32) {
    %c0_i32 = arith.constant 0 : i32
    %c0_i32_0 = arith.constant 0 : i32
    return %arg0, %c0_i32 : i32, i32
  }
  func.func @transform_2(%arg0: i32) -> (i32, i32) {
    %c0_i32 = arith.constant 0 : i32
    %c0_i32_0 = arith.constant 0 : i32
    %c0_i32_1 = arith.constant 0 : i32
    return %c0_i32, %c0_i32_0 : i32, i32
  }
  func.func @transform_3(%arg0: i32) -> (i32, i32) {
    %c0_i32 = arith.constant 0 : i32
    %c0_i32_0 = arith.constant 0 : i32
    %c0_i32_1 = arith.constant 0 : i32
    return %c0_i32, %c0_i32_0 : i32, i32
  }
  func.func @transform_4(%arg0: i32) -> (i32, i32) {
    %c0_i32 = arith.constant 0 : i32
    %c0_i32_0 = arith.constant 0 : i32
    %c0_i32_1 = arith.constant 0 : i32
    return %c0_i32, %c0_i32_0 : i32, i32
  }
  func.func @transform_5(%arg0: i32) -> (i32, i32) {
    %c0_i32 = arith.constant 0 : i32
    %c0_i32_0 = arith.constant 0 : i32
    %c0_i32_1 = arith.constant 0 : i32
    return %c0_i32, %c0_i32_0 : i32, i32
  }
}

</mosaic_0001>

<bundles_post_ra>
// kernel: net_forward.2
= control target key start
LH: loop header
LB: loop body
LE: loop exit
PB: predicated region body
PF: predicated region fallthrough
CT: control target
= control target key end

     0   :  { %s3980_s24 = smov 0   ;;  %s5432_s0 = inlined_call_operand.vmem [shape: bf16[256,256], index: 0, kind: input, shape index: {}]   ;;  %s5433_s1 = inlined_call_operand.vmem [shape: bf16[256,32], index: 1, kind: input, shape index: {}]   ;;  %s5434_s2 = inlined_call_operand.vmem [shape: f32[1,32], index: 2, kind: input, shape index: {}]   ;;  %s5435_s3 = inlined_call_operand.vmem [shape: bf16[512,64], index: 3, kind: input, shape index: {}]   ;;  %s5436_s4 = inlined_call_operand.vmem [shape: f32[1,64], index: 4, kind: input, shape index: {}]   ;;  %s5437_s5 = inlined_call_operand.vmem [shape: bf16[576,64], index: 5, kind: input, shape index: {}]   ;;  %s5438_s6 = inlined_call_operand.vmem [shape: f32[1,64], index: 6, kind: input, shape index: {}]   ;;  %s5439_s7 = inlined_call_operand.vmem [shape: bf16[256,64], index: 7, kind: output, shape index: {}]  }
   0x1 LB: > { %s3320_s25 = sadd.s32 4294967295, %s3935_s24   ;;  %p3324_p0 = scmp.ge.s32.totalorder %s3935_s24, 1  ;;  %s3935_s24 = sphi %s3980_s24, %s17_s24  }
   0x2   : > { %p239_p1 = scmp.lt.s32.totalorder %s3935_s24, 3 }
   0x4   : > { %p240_p2 = pnand %p3324_p0, %p239_p1 }
   0x5   : > { %s3325_s28 = sshll.u32 (!%p240_p2), %s3320_s25, 4  ;;  %s3937_s18 = smov (!%p240_p2), 64  }
   0x6   : > { %243 = sbr.rel (%p240_p2) target bundleno = 1372 (0x55c), region = 48  ;;  %p273_p3 = scmp.lt.s32.totalorder (!%p240_p2), %s3325_s28, 31 }
   0x7   : > { %s3939_s25 = smov (!%p240_p2), 96  }
   0xb   : > { %v3991_v0 = vld [vmem:[%s5433_s1 + $0x38] sm:$0xff]  ;;  %v3997_v1 = vld [vmem:[%s5433_s1 + $0x30] sm:$0xff]  ;;  %s5441_s28 = smov (!%p273_p3, %s3325_s28), 31  ;;  %v4019_v3 = vld [vmem:[%s5433_s1 + $0x28] sm:$0xff]  ;;  %vm675_vm0 = vsmask.f32 7424 }
   0xc   : > { %3898 = vmatpush.bf16.msra.mxu1 %v3991_v0  ;;  %v4002_v2 = vld [vmem:[%s5433_s1 + $0x78] sm:$0xff]  ;;  %3899 = vmatpush.bf16.msra.mxu2 %v3991_v0  ;;  %s3785_s10 = sshll.u32 %s5441_s28, 3  ;;  %v4024_v4 = vld [vmem:[%s5433_s1 + $0x70] sm:$0xff]  ;;  %v4050_v17 = vld [vmem:[%s5433_s1 + $0x20] sm:$0xff]  ;;  %vm1035_vm1 = vsmask.f32 6400 }
   0xd   : > { %545 = vmatpush.bf16.msra.mxu0 %v3991_v0  ;;  %914 = vmatpush.bf16.msra.mxu3 %v4002_v2  ;;  %s4014_s13 = scalar_lea.vmem %s5432_s0, %s3785_s10  ;;  %v4067_v26 = vld [vmem:[%s5433_s1 + $0x68] sm:$0xff]  ;;  %v4081_v35 = vld [vmem:[%s5433_s1 + $0x18] sm:$0xff]  ;;  %v4091_v41 = vld [vmem:[%s5433_s1 + $0x60] sm:$0xff]  ;;  %vm1295_vm2 = vcmask 1045504   ;;  %vm417_vm3 = vcmask 523264   ;;  %vm1651_vm4 = vcmask 261120  }
   0xe   : > { %v3360_v5 = vld [vmem:[%s4014_s13 + $0x4] sm:$0xf]  ;;  %v3809_v6 = vld [vmem:[%s4014_s13 + $0x8] sm:$0xf0]  ;;  %v3332_v7 = vld [vmem:[%s4014_s13] sm:$0xf] }
   0xf   : > { %v4031_v8 = vor.u32 %v3809_v6, %v3360_v5  ;;  %v3802_v9 = vld [vmem:[%s4014_s13 + $0x4] sm:$0xf0]  ;;  %v3364_v10 = vld [vmem:[%s4014_s13 + $0x14] sm:$0xf]  ;;  %v3810_v11 = vld [vmem:[%s4014_s13 + $0x18] sm:$0xf0] }
  0x10   : > { %3900 = vmatpush.bf16.msra.mxu1 %v3997_v1  ;;  %3901 = vmatpush.bf16.msra.mxu2 %v3997_v1  ;;  %v4037_v12 = vor.u32 %v3802_v9, %v3332_v7  ;;  %v4039_v13 = vor.u32 %v3810_v11, %v3364_v10  ;;  %v3336_v14 = vld [vmem:[%s4014_s13 + $0x10] sm:$0xf]  ;;  %v3803_v15 = vld [vmem:[%s4014_s13 + $0x14] sm:$0xf0]  ;;  %v3368_v16 = vld [vmem:[%s4014_s13 + $0x24] sm:$0xf] }
  0x11   : > { %546 = vmatpush.bf16.msra.mxu0 %v3997_v1  ;;  %915 = vmatpush.bf16.msra.mxu3 %v4024_v4  ;;  %v752_v18 = vshrl.u32 %v4031_v8, 16  ;;  %v754_v19 = vshll.u32 %v4031_v8, 16  ;;  %v4054_v20 = vor.u32 %v3803_v15, %v3336_v14  ;;  %v3811_v21 = vld [vmem:[%s4014_s13 + $0x28] sm:$0xf0]  ;;  %v3340_v29 = vld [vmem:[%s4014_s13 + $0x20] sm:$0xf] }
  0x12   : > { %738 = vrot.lane.b32.xlu1 %v4031_v8, %s3937_s18  ;;  %661 = vrot.lane.b32.xlu0 %v4037_v12, %s3937_s18  ;;  %v758_v22 = vshll.u32 %v4039_v13, 16  ;;  %v676_v23 = vshrl.u32 %v4037_v12, 16  ;;  %v678_v24 = vshll.u32 %v4037_v12, 16  ;;  %v4062_v25 = vor.u32 %v3811_v21, %v3368_v16  ;;  %v3804_v32 = vld [vmem:[%s4014_s13 + $0x24] sm:$0xf0]  ;;  %v4106_v48 = vld [vmem:[%s5433_s1 + $0x10] sm:$0xff] }
  0x13   : > { %v756_v27 = vrot.slane %v754_v19, 1  ;;  %v682_v28 = vshll.u32 %v4054_v20, 16  ;;  %663 = vrot.lane.b32.xlu2 %v4054_v20, %s3937_s18  ;;  %v4083_v36 = vor.u32 %v3804_v32, %v3340_v29  ;;  %v686_v37 = vshrl.u32 %v4054_v20, 16  ;;  %v3344_v45 = vld [vmem:[%s4014_s13 + $0x30] sm:$0xf]  ;;  %v4112_v52 = vld [vmem:[%s5433_s1 + $0x58] sm:$0xff] }
  0x14   : > { %3902 = vmatpush.bf16.msra.mxu1 %v4019_v3  ;;  %3903 = vmatpush.bf16.msra.mxu2 %v4019_v3  ;;  %v760_v30 = vrot.slane %v758_v22, 1  ;;  %v680_v31 = vrot.slane %v678_v24, 1  ;;  %v762_v39 = vshrl.u32 %v4039_v13, 16  ;;  %v765_v40 = vshll.u32 %v4062_v25, 16  ;;  %v3805_v46 = vld [vmem:[%s4014_s13 + $0x34] sm:$0xf0] }
  0x15   : > { %547 = vmatpush.bf16.msra.mxu0 %v4019_v3  ;;  %916 = vmatpush.bf16.msra.mxu3 %v4067_v26  ;;  %v757_v33 = vor.u32 %v756_v27, %v752_v18  ;;  %v684_v34 = vrot.slane %v682_v28, 1  ;;  %v689_v43 = vshll.u32 %v4083_v36, 16  ;;  %v4115_v53 = vor.u32 %v3805_v46, %v3344_v45  ;;  %v4125_v55 = vld [vmem:[%s5433_s1 + $0x8] sm:$0xff]  ;;  %v4131_v57 = vld [vmem:[%s5433_s1 + $0x50] sm:$0xff]  ;;  %v3812_v61 = vld [vmem:[%s4014_s13 + $0x38] sm:$0xf0] }
  0x16   : > { %v681_v38 = vor.u32 %v680_v31, %v676_v23  ;;  %v764_v50 = vor.u32 %v762_v39, %v760_v30  ;;  %v767_v51 = vrot.slane %v765_v40, 1  ;;  %v693_v58 = vshrl.u32 %v4083_v36, 16  ;;  %v3372_v60 = vld [vmem:[%s4014_s13 + $0x34] sm:$0xf]  ;;  %v4144_v62 = vld [vmem:[%s5433_s1] sm:$0xff]  ;;  %v4154_v6 = vld [vmem:[%s5433_s1 + $0x48] sm:$0xff] }
  0x17   : > { %v761_v42 = vsel %vm675_vm0, %v757_v33, %v760_v30  ;;  %v688_v47 = vor.u32 %v686_v37, %v684_v34  ;;  %v691_v49 = vrot.slane %v689_v43, 1  ;;  %v696_v59 = vshll.u32 %v4115_v53, 16  ;;  %v3348_v63 = vld [vmem:[%s4014_s13 + $0x40] sm:$0xf]  ;;  %v3806_v5 = vld [vmem:[%s4014_s13 + $0x44] sm:$0xf0] }
  0x18   : > { %3904 = vmatpush.bf16.msra.mxu1 %v4050_v17  ;;  %3905 = vmatpush.bf16.msra.mxu2 %v4050_v17  ;;  %v685_v44 = vsel %vm675_vm0, %v681_v38, %v684_v34  ;;  %v768_v56 = vsel %vm675_vm0, %v764_v50, %v767_v51  ;;  %v4156_v7 = vor.u32 %v3812_v61, %v3372_v60  ;;  %v700_v14 = vshrl.u32 %v4115_v53, 16  ;;  %v4172_v16 = vld [vmem:[%s5433_s1 + $0x40] sm:$0xff]  ;;  %v3813_v22 = vld [vmem:[%s4014_s13 + $0x48] sm:$0xf0]  ;;  %v3807_v37 = vld [vmem:[%s4014_s13 + $0x54] sm:$0xf0] }
  0x19   : > { %548 = vmatpush.bf16.msra.mxu0 %v4050_v17  ;;  %917 = vmatpush.bf16.msra.mxu3 %v4091_v41  ;;  %v692_v54 = vsel %vm675_vm0, %v688_v47, %v691_v49  ;;  %v695_v9 = vor.u32 %v693_v58, %v691_v49  ;;  %v698_v10 = vrot.slane %v696_v59, 1  ;;  %v4160_v11 = vor.u32 %v3806_v5, %v3348_v63  ;;  %v3376_v21 = vld [vmem:[%s4014_s13 + $0x44] sm:$0xf]  ;;  %v3380_v38 = vld [vmem:[%s4014_s13 + $0x54] sm:$0xf]  ;;  %s3329_s11 = sshll.u32 %s5441_s28, 2 }
  0x1a   : > { %800 = vrot.lane.b32.xlu1 %v761_v42, %s3937_s18  ;;  %724 = vrot.lane.b32.xlu0 %v685_v44, %s3937_s18  ;;  %v772_v18 = vshll.u32 %v4156_v7, 16  ;;  %v769_v23 = vshrl.u32 %v4062_v25, 16  ;;  %v4191_v30 = vor.u32 %v3813_v22, %v3376_v21  ;;  %v776_v33 = vshrl.u32 %v4156_v7, 16  ;;  %v3814_v39 = vld [vmem:[%s4014_s13 + $0x58] sm:$0xf0]  ;;  %s5392_s15 = scalar_lea.vmem %s5439_s7, %s3329_s11 }
  0x1b   : > { %726 = vrot.lane.b32.xlu2 %v692_v54, %s3937_s18  ;;  %v703_v15 = vshll.u32 %v4160_v11, 16  ;;  %v699_v19 = vsel %vm675_vm0, %v695_v9, %v698_v10  ;;  %v702_v24 = vor.u32 %v700_v14, %v698_v10  ;;  %v4215_v43 = vor.u32 %v3814_v39, %v3380_v38  ;;  %v3356_v49 = vld [vmem:[%s4014_s13 + $0x60] sm:$0xf]  ;;  %v3808_v50 = vld [vmem:[%s4014_s13 + $0x64] sm:$0x70] }
  0x1c   : > { %3906 = vmatpush.bf16.msra.mxu1 %v4081_v35  ;;  %3907 = vmatpush.bf16.msra.mxu2 %v4081_v35  ;;  %v774_v28 = vrot.slane %v772_v18, 1  ;;  %v771_v29 = vor.u32 %v769_v23, %v767_v51  ;;  %v779_v34 = vshll.u32 %v4191_v30, 16  ;;  %v783_v45 = vshrl.u32 %v4191_v30, 16  ;;  %v3384_v14 = vld [vmem:[%s4014_s13 + $0x64] sm:$0xf] }
  0x1d   : > { %549 = vmatpush.bf16.msra.mxu0 %v4081_v35  ;;  %918 = vmatpush.bf16.msra.mxu3 %v4112_v52  ;;  %v4189_v27 = vrot.slane %v703_v15, 1  ;;  %v786_v46 = vshll.u32 %v4215_v43, 16  ;;  %v3357_v51 = vor.u32 %v3808_v50, %v3356_v49  ;;  %v707_v10 = vshrl.u32 %v4160_v11, 16  ;;  %v3815_v15 = vld [vmem:[%s4014_s13 + $0x68] sm:$0x70] }
  0x1e   : > { %v775_v31 = vsel %vm675_vm0, %v771_v29, %v774_v28  ;;  %v778_v40 = vor.u32 %v776_v33, %v774_v28  ;;  %v781_v42 = vrot.slane %v779_v34, 1  ;;  %v3816_v18 = vld [vmem:[%s4014_s13 + $0xc] sm:$0xf0]  ;;  %v3817_v21 = vld [vmem:[%s4014_s13 + $0x1c] sm:$0xf0]  ;;  %vm1687_vm5 = vcmask 785408  }
  0x1f   : > { %v706_v32 = vsel %vm675_vm0, %v702_v24, %v4189_v27  ;;  %v717_v63 = vshll.u32 %v3357_v51, 16  ;;  %v3818_v33 = vld [vmem:[%s4014_s13 + $0x2c] sm:$0xf0]  ;;  %v3484_v38 = vld [vmem:[%s4014_s13 + $0x18] sm:$0xf]  ;;  %vm1812_vm6 = vcmask 1041408  }
  0x20   : > { %3908 = vmatpush.bf16.msra.mxu1 %v4106_v48  ;;  %3909 = vmatpush.bf16.msra.mxu2 %v4106_v48  ;;  %v782_v47 = vsel %vm675_vm0, %v778_v40, %v781_v42  ;;  %v785_v54 = vor.u32 %v783_v45, %v781_v42  ;;  %v3824_v39 = vld [vmem:[%s4014_s13 + $0x1c] sm:$0xf0]  ;;  %v3488_v40 = vld [vmem:[%s4014_s13 + $0x28] sm:$0xf]  ;;  %v3825_v42 = vld [vmem:[%s4014_s13 + $0x2c] sm:$0xf0] }
  0x21   : > { %550 = vmatpush.bf16.msra.mxu0 %v4106_v48  ;;  %919 = vmatpush.bf16.msra.mxu3 %v4131_v57  ;;  %v719_v5 = vrot.slane %v717_v63, 1  ;;  %vm1784_vm7 = vsmask.f32 2304  ;;  %vm2642_vm8 = vsmask.f32 4352  ;;  %vm2519_vm10 = vcmask 1046528  }
  0x22   : > { %802 = vrot.lane.b32.xlu1 %v768_v56, %s3937_s18  ;;  %740 = vrot.lane.b32.xlu0 %v4039_v13, %s3937_s18  ;;  %v788_v56 = vrot.slane %v786_v46, 1  ;;  %vm2599_vm9 = vsmask.f32 5376  ;;  %vm2632_vm11 = vcmask 1044480   ;;  %vm3248_vm12 = vcmask 519168  }
  0x23   : > { %665 = vrot.lane.b32.xlu2 %v4083_v36, %s3937_s18  ;;  %vm3258_vm13 = vcmask 516096   ;;  %vm3259_vm14 = vsmask.f32 256 }
  0x24   : > { %3910 = vmatpush.bf16.msra.mxu1 %v4125_v55  ;;  %3911 = vmatpush.bf16.msra.mxu2 %v4125_v55  ;;  %v789_v59 = vsel %vm675_vm0, %v785_v54, %v788_v56  ;;  %vm3260_vm15 = vmand %vm3258_vm13, %vm3259_vm14 }
  0x25   : > { %551 = vmatpush.bf16.msra.mxu0 %v4125_v55  ;;  %920 = vmatpush.bf16.msra.mxu3 %v4154_v6 }
  0x28   : > { %3912 = vmatpush.bf16.msra.mxu1 %v4144_v62  ;;  %3913 = vmatpush.bf16.msra.mxu2 %v4144_v62 }
  0x29   : > { %552 = vmatpush.bf16.msra.mxu0 %v4144_v62  ;;  %921 = vmatpush.bf16.msra.mxu3 %v4172_v16 }
  0x2a   : > { %742 = vrot.lane.b32.xlu1 %v4062_v25, %s3937_s18  ;;  %728 = vrot.lane.b32.xlu0 %v699_v19, %s3937_s18  ;;  %v3456_v19 = vld [vmem:[%s4014_s13 + $0x18] sm:$0xf] }
  0x2b   : > { %573 = vmatmul.bf16.vlgmr.msra.gmra.mxu1 %v4160_v11  ;;  %804 = vrot.lane.b32.xlu2 %v775_v31, %s3937_s18  ;;  %v3457_v22 = vor.u32 %v3817_v21, %v3456_v19 }
  0x2c   : > { %589 = vmatpush.bf16.msrb.mxu1 %v4002_v2  ;;  %870 = vmatpush.bf16.msrb.mxu2 %v3991_v0 }
  0x2d   : > { %1397 = vmatpush.bf16.msrb.mxu3 %v4002_v2  ;;  %553 = vmatmul.bf16.vlgmr.msra.gmra.mxu0 %v4037_v12  ;;  %v3352_v12 = vld [vmem:[%s4014_s13 + $0x50] sm:$0xf]  ;;  %v1048_v24 = vshll.u32 %v3457_v22, 16 }
  0x2e   : > { %1112 = vmatpush.bf16.msrb.mxu0 %v3991_v0  ;;  %v4218_v44 = vor.u32 %v3807_v37, %v3352_v12  ;;  %583 = vmatmul.bf16.vlgmr.msra.gmra.mxu2 %v3357_v51 }
  0x30   : > { %590 = vmatpush.bf16.msrb.mxu1 %v4024_v4  ;;  %871 = vmatpush.bf16.msrb.mxu2 %v3997_v1  ;;  %v710_v58 = vshll.u32 %v4218_v44, 16  ;;  %v714_v61 = vshrl.u32 %v4218_v44, 16 }
  0x31   : > { %1398 = vmatpush.bf16.msrb.mxu3 %v4024_v4 }
  0x32   : > { %1113 = vmatpush.bf16.msrb.mxu0 %v3997_v1  ;;  %730 = vrot.lane.b32.xlu1 %v706_v32, %s3937_s18  ;;  %v712_v60 = vrot.slane %v710_v58, 1  ;;  %v3460_v32 = vld [vmem:[%s4014_s13 + $0x28] sm:$0xf]  ;;  %v3823_v58 = vld [vmem:[%s4014_s13 + $0xc] sm:$0xf0] }
  0x33   : > { %667 = vrot.lane.b32.xlu0 %v4115_v53, %s3937_s18  ;;  %744 = vrot.lane.b32.xlu2 %v4156_v7, %s3937_s18  ;;  %v3461_v34 = vor.u32 %v3818_v33, %v3460_v32  ;;  %v3821_v32 = vld [vmem:[%s4014_s13 + $0x5c] sm:$0xf0] }
  0x34   : > { %591 = vmatpush.bf16.msrb.mxu1 %v4067_v26  ;;  %872 = vmatpush.bf16.msrb.mxu2 %v4019_v3 }
  0x35   : > { %1399 = vmatpush.bf16.msrb.mxu3 %v4067_v26  ;;  %v1054_v12 = vshrl.u32 %v3461_v34, 16  ;;  %v1057_v37 = vshll.u32 %v3461_v34, 16 }
  0x36   : > { %1114 = vmatpush.bf16.msrb.mxu0 %v4019_v3 }
  0x37   : > { %v1056_v45 = vrot.slane %v1054_v12, 1  ;;  %v1059_v46 = vrot.slane %v1057_v37, 2 }
  0x38   : > { %592 = vmatpush.bf16.msrb.mxu1 %v4091_v41  ;;  %873 = vmatpush.bf16.msrb.mxu2 %v4050_v17 }
  0x39   : > { %1400 = vmatpush.bf16.msrb.mxu3 %v4091_v41 }
  0x3a   : > { %1115 = vmatpush.bf16.msrb.mxu0 %v4050_v17  ;;  %669 = vrot.lane.b32.xlu1 %v4160_v11, %s3937_s18 }
  0x3b   : > { %578 = vmatmul.bf16.gmra.mxu1 %v4218_v44  ;;  %806 = vrot.lane.b32.xlu0 %v782_v47, %s3937_s18  ;;  %v3489_v47 = vor.u32 %v3825_v42, %v3488_v40  ;;  %v3827_v40 = vld [vmem:[%s4014_s13 + $0x4c] sm:$0xf0]  ;;  %v3500_v42 = vld [vmem:[%s4014_s13 + $0x58] sm:$0xf] }
  0x3c   : > { %593 = vmatpush.bf16.msrb.mxu1 %v4112_v52  ;;  %874 = vmatpush.bf16.msrb.mxu2 %v4081_v35 }
  0x3d   : > { %1401 = vmatpush.bf16.msrb.mxu3 %v4112_v52  ;;  %558 = vmatmul.bf16.gmra.mxu0 %v4054_v20  ;;  %v716_v20 = vor.u32 %v714_v61, %v712_v60  ;;  %v1299_v50 = vrot.slane %v3489_v47, 2 }
  0x3e   : > { %1116 = vmatpush.bf16.msrb.mxu0 %v4081_v35 }
  0x3f   : > { %v720_v9 = vsel %vm675_vm0, %v716_v20, %v719_v5 }
  0x40   : > { %594 = vmatpush.bf16.msrb.mxu1 %v4131_v57  ;;  %875 = vmatpush.bf16.msrb.mxu2 %v4106_v48 }
  0x41   : > { %1402 = vmatpush.bf16.msrb.mxu3 %v4131_v57 }
  0x42   : > { %1117 = vmatpush.bf16.msrb.mxu0 %v4106_v48  ;;  %808 = vrot.lane.b32.xlu1 %v789_v59, %s3937_s18 }
  0x43   : > { %746 = vrot.lane.b32.xlu0 %v4191_v30, %s3937_s18 }
  0x44   : > { %595 = vmatpush.bf16.msrb.mxu1 %v4154_v6  ;;  %876 = vmatpush.bf16.msrb.mxu2 %v4125_v55 }
  0x45   : > { %1403 = vmatpush.bf16.msrb.mxu3 %v4154_v6 }
  0x46   : > { %1118 = vmatpush.bf16.msrb.mxu0 %v4125_v55 }
  0x48   : > { %596 = vmatpush.bf16.msrb.mxu1 %v4172_v16  ;;  %877 = vmatpush.bf16.msrb.mxu2 %v4144_v62 }
  0x49   : > { %1404 = vmatpush.bf16.msrb.mxu3 %v4172_v16 }
  0x4a   : > { %1119 = vmatpush.bf16.msrb.mxu0 %v4144_v62  ;;  %748 = vrot.lane.b32.xlu1 %v4215_v43, %s3937_s18 }
  0x4b   : > { %597 = vmatmul.bf16.vlgmr.msrb.gmra.mxu1 %v4031_v8  ;;  %734 = vrot.lane.b32.xlu0 %v720_v9, %s3937_s18 }
  0x4c   : > { %1156 = vmatpush.bf16.msra.mxu1 %v4002_v2  ;;  %1353 = vmatpush.bf16.msra.mxu2 %v3991_v0  ;;  %v709_v2 = vor.u32 %v707_v10, %v4189_v27  ;;  %v721_v0 = vshrl.u32 %v3357_v51, 16 }
  0x4d   : > { %563 = vmatmul.bf16.gmra.mxu0 %v4083_v36 }
  0x4e   : > { %v713_v11 = vsel %vm675_vm0, %v709_v2, %v712_v60 }
  0x4f   : > { %732 = vrot.lane.b32.xlu2 %v713_v11, %s3937_s18 }
  0x50   : > { %1157 = vmatpush.bf16.msra.mxu1 %v4024_v4  ;;  %1354 = vmatpush.bf16.msra.mxu2 %v3997_v1  ;;  %v723_v4 = vor.u32 %v721_v0, %v719_v5  ;;  %v4279_v1 = vor.u32 %v3815_v15, %v3384_v14  ;;  %v3492_v5 = vld [vmem:[%s4014_s13 + $0x38] sm:$0xf] }
  0x52   : > { %736 = vrot.lane.b32.xlu1 %v723_v4, %s3937_s18  ;;  %v797_v36 = vshrl.u32 %v4279_v1, 16 }
  0x53   : > { %673 = vrot.lane.b32.xlu0 %v3357_v51, %s3937_s18 }
  0x54   : > { %1158 = vmatpush.bf16.msra.mxu1 %v4067_v26  ;;  %1355 = vmatpush.bf16.msra.mxu2 %v4019_v3  ;;  %v793_v26 = vshll.u32 %v4279_v1, 16 }
  0x56   : > { %v795_v3 = vrot.slane %v793_v26, 1  ;;  %v3464_v26 = vld [vmem:[%s4014_s13 + $0x38] sm:$0xf] }
  0x57   : > { %671 = vrot.lane.b32.xlu2 %v4218_v44, %s3937_s18  ;;  %v3485_v44 = vor.u32 %v3824_v39, %v3484_v38  ;;  %v3496_v39 = vld [vmem:[%s4014_s13 + $0x48] sm:$0xf] }
  0x58   : > { %1159 = vmatpush.bf16.msra.mxu1 %v4091_v41  ;;  %1356 = vmatpush.bf16.msra.mxu2 %v4050_v17  ;;  %v799_v17 = vor.u32 %v797_v36, %v795_v3  ;;  %v790_v41 = vshrl.u32 %v4215_v43, 16  ;;  %v3468_v36 = vld [vmem:[%s4014_s13 + $0x48] sm:$0xf]  ;;  %v3497_v47 = vor.u32 %v3827_v40, %v3496_v39 }
  0x59   : > { %v1297_v49 = vrot.slane %v3485_v44, 2 }
  0x5b   : > { %602 = vmatmul.bf16.gmra.mxu1 %v4039_v13  ;;  %812 = vrot.lane.b32.xlu0 %v799_v17, %s3937_s18  ;;  %v1300_v54 = vsel %vm1295_vm2, %v1297_v49, %v1299_v50  ;;  %v3820_v17 = vld [vmem:[%s4014_s13 + $0x4c] sm:$0xf0] }
  0x5c   : > { %1160 = vmatpush.bf16.msra.mxu1 %v4112_v52  ;;  %1357 = vmatpush.bf16.msra.mxu2 %v4081_v35  ;;  %v792_v52 = vor.u32 %v790_v41, %v788_v56  ;;  %v3480_v56 = vld [vmem:[%s4014_s13 + $0x8] sm:$0xc] }
  0x5d   : > { %568 = vmatmul.bf16.gmra.mxu0 %v4115_v53  ;;  %v3481_v59 = vor.u32 %v3823_v58, %v3480_v56 }
  0x5e   : > { %v796_v35 = vsel %vm675_vm0, %v792_v52, %v795_v3  ;;  %v3819_v3 = vld [vmem:[%s4014_s13 + $0x3c] sm:$0xf0]  ;;  %v3469_v52 = vor.u32 %v3820_v17, %v3468_v36 }
  0x5f   : > { %810 = vrot.lane.b32.xlu2 %v796_v35, %s3937_s18  ;;  %v1296_v60 = vrot.slane %v3481_v59, 2  ;;  %v3465_v41 = vor.u32 %v3819_v3, %v3464_v26 }
  0x60   : > { %1161 = vmatpush.bf16.msra.mxu1 %v4131_v57  ;;  %1358 = vmatpush.bf16.msra.mxu2 %v4106_v48  ;;  %v3452_v57 = vld [vmem:[%s4014_s13 + $0x8] sm:$0xe]  ;;  %v1075_v19 = vshll.u32 %v3469_v52, 16 }
  0x61   : > { %v3453_v48 = vor.u32 %v3816_v18, %v3452_v57  ;;  %v1298_v61 = vsel %vm1295_vm2, %v1296_v60, %v1297_v49  ;;  %v1063_v57 = vshrl.u32 %v3465_v41, 16  ;;  %v1072_v18 = vshrl.u32 %v3469_v52, 16  ;;  %v3822_v52 = vld [vmem:[%s4014_s13 + $0x6c] sm:$0xf0] }
  0x63   : > { %v1037_v23 = vshrl.u32 %v3453_v48, 16  ;;  %v1040_v53 = vshll.u32 %v3453_v48, 16 }
  0x64   : > { %1162 = vmatpush.bf16.msra.mxu1 %v4154_v6  ;;  %1359 = vmatpush.bf16.msra.mxu2 %v4125_v55  ;;  %v1045_v6 = vshrl.u32 %v3457_v22, 16  ;;  %v1065_v22 = vrot.slane %v1063_v57, 1 }
  0x65   : > { %v1039_v27 = vrot.slane %v1037_v23, 1  ;;  %v1042_v28 = vrot.slane %v1040_v53, 2  ;;  %v1074_v53 = vrot.slane %v1072_v18, 1 }
  0x66   : > { %v1047_v55 = vrot.slane %v1045_v6, 1  ;;  %v1077_v6 = vrot.slane %v1075_v19, 2 }
  0x67   : > { %750 = vrot.lane.b32.xlu2 %v4279_v1, %s3937_s18  ;;  %v1043_v29 = vor.u32 %v1042_v28, %v1039_v27 }
  0x68   : > { %1163 = vmatpush.bf16.msra.mxu1 %v4172_v16  ;;  %1360 = vmatpush.bf16.msra.mxu2 %v4144_v62  ;;  %v1050_v16 = vrot.slane %v1048_v24, 2  ;;  %v1078_v28 = vor.u32 %v1077_v6, %v1074_v53  ;;  %v4425_v6 = vld [vmem:[%s5434_s2] ss:$0 sm:$0xff] }
  0x6a   : > { %v1051_v62 = vor.u32 %v1050_v16, %v1047_v55 }
  0x6b   : > { %607 = vmatmul.bf16.gmra.mxu1 %v4062_v25 }
  0x6c   : > { %v4307_v31 = vsel %vm1035_vm1, %v1043_v29, %v1051_v62 }
  0x6d   : > { %1243 = vrot.lane.b32.xlu1 %v4307_v31, %s3937_s18  ;;  %1120 = vmatmul.bf16.vlgmr.msrb.gmra.mxu0 %v4031_v8  ;;  %v1060_v8 = vor.u32 %v1059_v46, %v1056_v45  ;;  %v664_v0 = vpop.permute.xlu2 %663  ;;  %v3828_v46 = vld [vmem:[%s4014_s13 + $0x5c] sm:$0xf0] }
  0x6f   : > { %v4320_v51 = vsel %vm1035_vm1, %v1051_v62, %v1060_v8  ;;  %1311 = vrot.lane.b32.xlu2 %v1298_v61, %s3937_s18 }
  0x70   : > { %1245 = vrot.lane.b32.xlu0 %v4320_v51, %s3937_s18 }
  0x75   : > { %1313 = vrot.lane.b32.xlu1 %v1300_v54, %s3937_s18  ;;  %v727_v35 = vpop.permute.xlu2 %726  ;;  %v1303_v54 = vrot.slane %v3497_v47, 2 }
  0x76   : > { %v820_v16 = vsel %vm417_vm3, %v664_v0, %v727_v35  ;;  %v3829_v0 = vld [vmem:[%s4014_s13 + $0x6c] sm:$0xf0] }
  0x7b   : > { %612 = vmatmul.bf16.gmra.mxu1 %v4156_v7 }
  0x7d   : > { %1125 = vmatmul.bf16.gmra.mxu0 %v4039_v13  ;;  %v3826_v13 = vld [vmem:[%s4014_s13 + $0x3c] sm:$0xf0]  ;;  %v666_v29 = vpop.permute.xlu2 %665 }
  0x7e   : > { %v3493_v9 = vor.u32 %v3826_v13, %v3492_v5 }
  0x80   : > { %v4334_v10 = vrot.slane %v3493_v9, 2 }
  0x82   : > { %v1302_v11 = vsel %vm1295_vm2, %v1299_v50, %v4334_v10  ;;  %v3501_v50 = vor.u32 %v3828_v46, %v3500_v42  ;;  %v1304_v13 = vsel %vm1295_vm2, %v4334_v10, %v1303_v54 }
  0x83   : > { %1315 = vrot.lane.b32.xlu0 %v1302_v11, %s3937_s18 }
  0x84   : > { %v739_v63 = vpop.permute.xlu1 %738  ;;  %v662_v20 = vpop.permute.xlu0 %661  ;;  %v1305_v59 = vrot.slane %v3501_v50, 2 }
  0x85   : > { %v805_v45 = vpop.permute.xlu2 %804 }
  0x86   : > { %v1306_v61 = vsel %vm1295_vm2, %v1303_v54, %v1305_v59 }
  0x8b   : > { %617 = vmatmul.bf16.gmra.mxu1 %v4191_v30 }
  0x8c   : > { %v801_v2 = vpop.permute.xlu1 %800  ;;  %v725_v4 = vpop.permute.xlu0 %724 }
  0x8d   : > { %1130 = vmatmul.bf16.gmra.mxu0 %v4062_v25  ;;  %v4340_v14 = vsel %vm417_vm3, %v739_v63, %v801_v2  ;;  %v816_v15 = vsel %vm417_vm3, %v662_v20, %v725_v4  ;;  %v1066_v25 = vshll.u32 %v3465_v41, 16  ;;  %v3504_v2 = vld [vmem:[%s4014_s13 + $0x68] sm:$0xf]  ;;  %v745_v4 = vpop.permute.xlu2 %744 }
  0x8e   : > { %922 = vmatmul.bf16.vlgmr.msra.gmra.mxu3 %v4340_v14  ;;  %878 = vmatmul.bf16.vlgmr.msrb.gmra.mxu2 %v816_v15  ;;  %v3505_v11 = vor.u32 %v3829_v0, %v3504_v2 }
  0x8f   : > { %v1068_v23 = vrot.slane %v1066_v25, 2 }
  0x90   : > { %v4398_v26 = vrot.slane %v3505_v11, 2 }
  0x91   : > { %v1069_v24 = vor.u32 %v1068_v23, %v1065_v22 }
  0x92   : > { %v1308_v10 = vsel %vm1295_vm2, %v1305_v59, %v4398_v26 }
  0x93   : > { %v4355_v55 = vsel %vm1035_vm1, %v1069_v24, %v1078_v28  ;;  %v4362_v62 = vsel %vm1035_vm1, %v1060_v8, %v1069_v24 }
  0x94   : > { %v803_v21 = vpop.permute.xlu1 %802  ;;  %v741_v48 = vpop.permute.xlu0 %740  ;;  %1249 = vrot.lane.b32.xlu1 %v4355_v55, %s3937_s18  ;;  %1247 = vrot.lane.b32.xlu2 %v4362_v62, %s3937_s18 }
  0x95   : > { %v4351_v27 = vsel %vm417_vm3, %v741_v48, %v803_v21 }
  0x9b   : > { %622 = vmatmul.bf16.gmra.mxu1 %v4215_v43 }
  0x9c   : > { %v729_v34 = vpop.permute.xlu0 %728  ;;  %v743_v44 = vpop.permute.xlu1 %742  ;;  %1319 = vrot.lane.b32.xlu1 %v1306_v61, %s3937_s18  ;;  %1317 = vrot.lane.b32.xlu2 %v1304_v13, %s3937_s18 }
  0x9d   : > { %1135 = vmatmul.bf16.gmra.mxu0 %v4156_v7  ;;  %v3472_v7 = vld [vmem:[%s4014_s13 + $0x58] sm:$0xf]  ;;  %v4376_v58 = vsel %vm417_vm3, %v743_v44, %v805_v45  ;;  %v824_v63 = vsel %vm417_vm3, %v666_v29, %v729_v34 }
  0x9e   : > { %927 = vmatmul.bf16.gmra.mxu3 %v4351_v27  ;;  %883 = vmatmul.bf16.gmra.mxu2 %v820_v16  ;;  %v3473_v33 = vor.u32 %v3821_v32, %v3472_v7  ;;  %v1242_v44 = vld [vmem:[%s4014_s13 + $0x78] sm:$0x1] }
  0xa0   : > { %v1081_v37 = vshrl.u32 %v3473_v33, 16  ;;  %v1084_v38 = vshll.u32 %v3473_v33, 16 }
  0xa2   : > { %v1083_v49 = vrot.slane %v1081_v37, 1  ;;  %v1086_v8 = vrot.slane %v1084_v38, 2 }
  0xa4   : > { %v1087_v56 = vor.u32 %v1086_v8, %v1083_v49  ;;  %v1286_v49 = vunpack.c.l.b16 %v1242_v44 }
  0xa5   : > { %v668_v5 = vpop.permute.xlu0 %667 }
  0xa6   : > { %v4379_v60 = vsel %vm1035_vm1, %v1078_v28, %v1087_v56 }
  0xa7   : > { %1251 = vrot.lane.b32.xlu0 %v4379_v60, %s3937_s18 }
  0xa8   : > { %v4368_v12 = vpop.f32.mrf.mxu1 }
  0xa9   : > { %v733_v57 = vpop.permute.xlu2 %732 }
  0xab   : > { %627 = vmatmul.bf16.gmra.mxu1 %v4279_v1 }
  0xad   : > { %1140 = vmatmul.bf16.gmra.mxu0 %v4191_v30  ;;  %v731_v30 = vpop.permute.xlu1 %730  ;;  %v807_v15 = vpop.permute.xlu0 %806 }
  0xae   : > { %932 = vmatmul.bf16.gmra.mxu3 %v4376_v58  ;;  %888 = vmatmul.bf16.gmra.mxu2 %v824_v63  ;;  %v4401_v3 = vsel %vm417_vm3, %v745_v4, %v807_v15  ;;  %v828_v36 = vsel %vm417_vm3, %v668_v5, %v731_v30 }
  0xaf   : > { %1321 = vrot.lane.b32.xlu0 %v1308_v10, %s3937_s18 }
  0xb0   : > { %v4387_v20 = vpop.f32.mrf.mxu1 }
  0xb1   : > { %v672_v28 = vpop.permute.xlu2 %671 }
  0xb5   : > { %v670_v41 = vpop.permute.xlu1 %669  ;;  %v747_v48 = vpop.permute.xlu0 %746 }
  0xb6   : > { %v832_v24 = vsel %vm417_vm3, %v670_v41, %v733_v57 }
  0xb8   : > { %v4393_v9 = vpop.f32.mrf.mxu1 }
  0xb9   : > { %v811_v38 = vpop.permute.xlu2 %810 }
  0xbb   : > { %1164 = vmatmul.bf16.vlgmr.msra.gmra.mxu1 %v4307_v31  ;;  %v3476_v31 = vld [vmem:[%s4014_s13 + $0x68] sm:$0xf]  ;;  %s3938_s13 = smov 32  }
  0xbc   : > { %v3477_v35 = vor.u32 %v3822_v52, %v3476_v31 }
  0xbd   : > { %1145 = vmatmul.bf16.gmra.mxu0 %v4215_v43  ;;  %v809_v21 = vpop.permute.xlu1 %808  ;;  %v735_v32 = vpop.permute.xlu0 %734 }
  0xbe   : > { %937 = vmatmul.bf16.gmra.mxu3 %v4401_v3  ;;  %893 = vmatmul.bf16.gmra.mxu2 %v828_v36  ;;  %v1090_v18 = vshrl.u32 %v3477_v35, 16  ;;  %v1093_v19 = vshll.u32 %v3477_v35, 16  ;;  %v4415_v23 = vsel %vm417_vm3, %v747_v48, %v809_v21  ;;  %v836_v45 = vsel %vm417_vm3, %v672_v28, %v735_v32  ;;  %v584_v32 = vpop.f32.mrf.mxu2 }
  0xc0   : > { %v4409_v17 = vpop.f32.mrf.mxu1  ;;  %v1092_v43 = vrot.slane %v1090_v18, 1  ;;  %v1095_v22 = vrot.slane %v1093_v19, 2 }
  0xc1   : > { %v751_v2 = vpop.permute.xlu2 %750 }
  0xc2   : > { %v4417_v53 = vor.u32 %v1095_v22, %v1092_v43 }
  0xc4   : > { %1255 = vrot.lane.b32.xlu1 %v4417_v53, %s3937_s18  ;;  %v4431_v16 = vsel %vm1035_vm1, %v1087_v56, %v4417_v53  ;;  %v1294_v56 = vpack.c.b16 %v1286_v49, %v1286_v49 }
  0xc5   : > { %1253 = vrot.lane.b32.xlu2 %v4431_v16, %s3937_s18  ;;  %v749_v37 = vpop.permute.xlu1 %748  ;;  %v674_v47 = vpop.permute.xlu0 %673 }
  0xc6   : > { %v4439_v40 = vsel %vm417_vm3, %v749_v37, %v811_v38 }
  0xc8   : > { %v598_v25 = vpop.f32.mrf.mxu1 }
  0xc9   : > { %v1312_v43 = vpop.permute.xlu2 %1311 }
  0xcb   : > { %1169 = vmatmul.bf16.gmra.mxu1 %v4320_v51 }
  0xcd   : > { %1150 = vmatmul.bf16.gmra.mxu0 %v4279_v1  ;;  %v554_v1 = vpop.f32.mrf.mxu0  ;;  %v813_v0 = vpop.permute.xlu0 %812 }
  0xce   : > { %942 = vmatmul.bf16.gmra.mxu3 %v4415_v23  ;;  %898 = vmatmul.bf16.gmra.mxu2 %v832_v24  ;;  %v555_v29 = vadd.f32 %v4425_v6, %v554_v1  ;;  %v737_v15 = vpop.permute.xlu1 %736  ;;  %v4450_v10 = vsel %vm417_vm3, %v751_v2, %v813_v0 }
  0xcf   : > { %v840_v31 = vsel %vm417_vm3, %v674_v47, %v737_v15 }
  0xd0   : > { %v600_v51 = vpop.f32.mrf.mxu1  ;;  %v599_v7 = vadd.f32 %v598_v25, %v555_v29 }
  0xd2   : > { %v633_v50 = vmax.f32 %v599_v7, 0.0 }
  0xd4   : > { %v647_v63 = vpack.c.bf16 %v633_v50, %v633_v50 }
  0xd5   : > { %v556_v34 = vpop.f32.mrf.mxu0 }
  0xd6   : > { %v557_v39 = vadd.f32 %v4425_v6, %v556_v34  ;;  %v1483_v11 = vunpack.c.l.b16 %v647_v63  ;;  %v575_v34 = vadd.f32 %v4425_v6, %v4368_v12 }
  0xd8   : > { %v603_v33 = vpop.f32.mrf.mxu1  ;;  %v601_v42 = vadd.f32 %v600_v51, %v557_v39 }
  0xda   : > { %v634_v54 = vmax.f32 %v601_v42, 0.0  ;;  %v4474_v42 = vpop.f32.mrf.mxu2 }
  0xdb   : > { %1174 = vmatmul.bf16.gmra.mxu1 %v4362_v62  ;;  %v1309_v62 = vrot.slane %v1294_v56, 2 }
  0xdc   : > { %v648_v5 = vpack.c.bf16 %v634_v54, %v634_v54 }
  0xdd   : > { %v559_v8 = vpop.f32.mrf.mxu0  ;;  %v1310_v13 = vsel %vm1295_vm2, %v4398_v26, %v1309_v62 }
  0xde   : > { %947 = vmatmul.bf16.gmra.mxu3 %v4439_v40  ;;  %903 = vmatmul.bf16.gmra.mxu2 %v836_v45  ;;  %v560_v59 = vadd.f32 %v4425_v6, %v559_v8  ;;  %v1484_v4 = vunpack.c.l.b16 %v648_v5 }
  0xdf   : > { %1323 = vrot.lane.b32.xlu2 %v1310_v13, %s3937_s18  ;;  %v1244_v48 = vpop.permute.xlu1 %1243 }
  0xe0   : > { %v605_v46 = vpop.f32.mrf.mxu1  ;;  %v604_v61 = vadd.f32 %v603_v33, %v560_v59  ;;  %v4452_v36 = vpack.c.b16 %v1484_v4, %v1483_v11  ;;  %v1327_v51 = vsel %vm417_vm3, %v1244_v48, %v1312_v43 }
  0xe2   : > { %v635_v35 = vmax.f32 %v604_v61, 0.0  ;;  %v1246_v39 = vpop.permute.xlu0 %1245  ;;  %v580_v61 = vadd.f32 %v4425_v6, %v4393_v9  ;;  %v582_v9 = vadd.f32 %v4425_v6, %v4409_v17 }
  0xe5   : > { %v561_v41 = vpop.f32.mrf.mxu0 }
  0xe6   : > { %v562_v52 = vadd.f32 %v4425_v6, %v561_v41 }
  0xe7   : > { %v1314_v38 = vpop.permute.xlu1 %1313 }
  0xe8   : > { %v608_v30 = vpop.f32.mrf.mxu1  ;;  %v606_v57 = vadd.f32 %v605_v46, %v562_v52  ;;  %v1331_v45 = vsel %vm417_vm3, %v1246_v39, %v1314_v38 }
  0xea   : > { %v636_v25 = vmax.f32 %v606_v57, 0.0 }
  0xeb   : > { %1179 = vmatmul.bf16.gmra.mxu1 %v4355_v55  ;;  %v649_v55 = vpack.c.bf16 %v635_v35, %v635_v35 }
  0xec   : > { %v650_v18 = vpack.c.bf16 %v636_v25, %v636_v25 }
  0xed   : > { %v564_v21 = vpop.f32.mrf.mxu0  ;;  %v1485_v22 = vunpack.c.l.b16 %v649_v55 }
  0xee   : > { %952 = vmatmul.bf16.gmra.mxu3 %v4450_v10  ;;  %908 = vmatmul.bf16.gmra.mxu2 %v840_v31  ;;  %v1486_v24 = vunpack.c.l.b16 %v650_v18  ;;  %v565_v28 = vadd.f32 %v4425_v6, %v564_v21  ;;  %v1248_v0 = vpop.permute.xlu2 %1247 }
  0xf0   : > { %v4456_v26 = vpop.f32.mrf.mxu1  ;;  %v4462_v1 = vpack.c.b16 %v1486_v24, %v1485_v22  ;;  %v4464_v29 = vadd.f32 %v608_v30, %v565_v28 }
  0xf5   : > { %v4469_v33 = vpop.f32.mrf.mxu0 }
  0xf8   : > { %v613_v19 = vpop.f32.mrf.mxu1 }
  0xfb   : > { %1184 = vmatmul.bf16.gmra.mxu1 %v4379_v60 }
  0xfd   : > { %v569_v44 = vpop.f32.mrf.mxu0 }
  0xfe   : > { %1405 = vmatmul.bf16.vlgmr.msrb.gmra.mxu3 %v1327_v51  ;;  %1361 = vmatmul.bf16.vlgmr.msra.gmra.mxu2 %v4340_v14  ;;  %v570_v46 = vadd.f32 %v4425_v6, %v569_v44  ;;  %v577_v14 = vadd.f32 %v4425_v6, %v4387_v20 }
 0x100   : > { %v4466_v7 = vpop.f32.mrf.mxu1  ;;  %v4480_v49 = vadd.f32 %v613_v19, %v570_v46 }
 0x105   : > { %v4494_v19 = vpop.f32.mrf.mxu0 }
 0x106   : > { %v1250_v46 = vpop.permute.xlu1 %1249 }
 0x108   : > { %v618_v60 = vpop.f32.mrf.mxu1 }
 0x109   : > { %v619_v37 = vadd.f32 %v618_v60, %v575_v34  ;;  %v585_v34 = vadd.f32 %v4425_v6, %v584_v32 }
 0x10b   : > { %1189 = vmatmul.bf16.gmra.mxu1 %v4431_v16  ;;  %v641_v47 = vmax.f32 %v619_v37, 0.0 }
 0x10d   : > { %v655_v50 = vpack.c.bf16 %v641_v47, %v641_v47 }
 0x10e   : > { %1410 = vmatmul.bf16.gmra.mxu3 %v1331_v45  ;;  %1366 = vmatmul.bf16.gmra.mxu2 %v4351_v27  ;;  %v1316_v27 = vpop.permute.xlu0 %1315 }
 0x10f   : > { %v1491_v63 = vunpack.c.l.b16 %v655_v50  ;;  %v1335_v31 = vsel %vm417_vm3, %v1248_v0, %v1316_v27 }
 0x110   : > { %v620_v12 = vpop.f32.mrf.mxu1 }
 0x111   : > { %v621_v8 = vadd.f32 %v620_v12, %v577_v14  ;;  %v923_v54 = vpop.f32.mrf.mxu3  ;;  %v879_v56 = vpop.f32.mrf.mxu2 }
 0x112   : > { %v880_v62 = vadd.f32 %v4425_v6, %v879_v56  ;;  %v1318_v14 = vpop.permute.xlu2 %1317  ;;  %v1121_v12 = vpop.f32.mrf.mxu0 }
 0x113   : > { %v642_v16 = vmax.f32 %v621_v8, 0.0 }
 0x114   : > { %v924_v30 = vadd.f32 %v923_v54, %v880_v62 }
 0x115   : > { %v656_v59 = vpack.c.bf16 %v642_v16, %v642_v16  ;;  %v1339_v16 = vsel %vm417_vm3, %v1250_v46, %v1318_v14 }
 0x116   : > { %v958_v15 = vmax.f32 %v924_v30, 0.0 }
 0x117   : > { %v1492_v20 = vunpack.c.l.b16 %v656_v59 }
 0x118   : > { %v623_v5 = vpop.f32.mrf.mxu1  ;;  %v972_v25 = vpack.c.bf16 %v958_v15, %v958_v15  ;;  %v1320_v15 = vpop.permute.xlu1 %1319 }
 0x119   : > { %v4486_v13 = vpack.c.b16 %v1492_v20, %v1491_v63  ;;  %v624_v2 = vadd.f32 %v623_v5, %v580_v61  ;;  %v925_v11 = vpop.f32.mrf.mxu3  ;;  %v881_v4 = vpop.f32.mrf.mxu2 }
 0x11a   : > { %v882_v41 = vadd.f32 %v4425_v6, %v881_v4  ;;  %v1518_v24 = vunpack.c.l.b16 %v972_v25  ;;  %v1123_v0 = vpop.f32.mrf.mxu0 }
 0x11b   : > { %1194 = vmatmul.bf16.gmra.mxu1 %v4417_v53  ;;  %v643_v52 = vmax.f32 %v624_v2, 0.0  ;;  %v1122_v2 = vadd.f32 %v4425_v6, %v1121_v12 }
 0x11c   : > { %v926_v35 = vadd.f32 %v925_v11, %v882_v41  ;;  %v1252_v41 = vpop.permute.xlu0 %1251 }
 0x11d   : > { %v657_v53 = vpack.c.bf16 %v643_v52, %v643_v52 }
 0x11e   : > { %1415 = vmatmul.bf16.gmra.mxu3 %v1335_v31  ;;  %v959_v55 = vmax.f32 %v926_v35, 0.0  ;;  %1371 = vmatmul.bf16.gmra.mxu2 %v4376_v58  ;;  %v1343_v35 = vsel %vm417_vm3, %v1252_v41, %v1320_v15 }
 0x11f   : > { %v1493_v60 = vunpack.c.l.b16 %v657_v53 }
 0x120   : > { %v625_v57 = vpop.f32.mrf.mxu1  ;;  %v973_v21 = vpack.c.bf16 %v959_v55, %v959_v55 }
 0x121   : > { %v626_v18 = vadd.f32 %v625_v57, %v582_v9  ;;  %v928_v43 = vpop.f32.mrf.mxu3  ;;  %v884_v22 = vpop.f32.mrf.mxu2 }
 0x122   : > { %v1519_v51 = vunpack.c.l.b16 %v973_v21  ;;  %v885_v17 = vadd.f32 %v4425_v6, %v884_v22  ;;  %v1126_v57 = vpop.f32.mrf.mxu0 }
 0x123   : > { %v644_v48 = vmax.f32 %v626_v18, 0.0 }
 0x124   : > { %v1532_v38 = vpack.c.b16 %v1519_v51, %v1518_v24  ;;  %v929_v44 = vadd.f32 %v928_v43, %v885_v17  ;;  %v1127_v24 = vadd.f32 %v4425_v6, %v1126_v57 }
 0x125   : > { %v658_v28 = vpack.c.bf16 %v644_v48, %v644_v48 }
 0x126   : > { %1539 = vrot.lane.b32.xlu0 %v1532_v38, %s3938_s13  ;;  %v960_v50 = vmax.f32 %v929_v44, 0.0  ;;  %v1322_v38 = vpop.permute.xlu0 %1321 }
 0x127   : > { %v1494_v37 = vunpack.c.l.b16 %v658_v28 }
 0x128   : > { %v628_v39 = vpop.f32.mrf.mxu1  ;;  %v974_v59 = vpack.c.bf16 %v960_v50, %v960_v50 }
 0x129   : > { %v4498_v58 = vpack.c.b16 %v1494_v37, %v1493_v60  ;;  %v4501_v45 = vadd.f32 %v628_v39, %v585_v34  ;;  %v930_v47 = vpop.f32.mrf.mxu3  ;;  %v886_v8 = vpop.f32.mrf.mxu2 }
 0x12a   : > { %v887_v32 = vadd.f32 %v4425_v6, %v886_v8  ;;  %v1520_v5 = vunpack.c.l.b16 %v974_v59  ;;  %v1128_v60 = vpop.f32.mrf.mxu0  ;;  %v1254_v37 = vpop.permute.xlu2 %1253 }
 0x12b   : > { %v1129_v14 = vadd.f32 %v4425_v6, %v1128_v60 }
 0x12c   : > { %v931_v54 = vadd.f32 %v930_v47, %v887_v32  ;;  %v1347_v47 = vsel %vm417_vm3, %v1254_v37, %v1322_v38 }
 0x12e   : > { %1420 = vmatmul.bf16.gmra.mxu3 %v1339_v16  ;;  %v961_v62 = vmax.f32 %v931_v54, 0.0  ;;  %1376 = vmatmul.bf16.gmra.mxu2 %v4401_v3  ;;  %v1124_v3 = vadd.f32 %v4425_v6, %v1123_v0 }
 0x130   : > { %v4505_v56 = vpop.f32.mrf.mxu1  ;;  %v975_v61 = vpack.c.bf16 %v961_v62, %v961_v62 }
 0x131   : > { %v933_v63 = vpop.f32.mrf.mxu3  ;;  %v889_v20 = vpop.f32.mrf.mxu2 }
 0x132   : > { %v1521_v30 = vunpack.c.l.b16 %v975_v61  ;;  %v890_v12 = vadd.f32 %v4425_v6, %v889_v20 }
 0x134   : > { %v1533_v27 = vpack.c.b16 %v1521_v30, %v1520_v5  ;;  %v934_v54 = vadd.f32 %v933_v63, %v890_v12 }
 0x136   : > { %1541 = vrot.lane.b32.xlu1 %v1533_v27, %s3938_s13  ;;  %v1256_v63 = vpop.permute.xlu1 %1255 }
 0x138   : > { %v1165_v11 = vpop.f32.mrf.mxu1 }
 0x139   : > { %v1166_v4 = vadd.f32 %v1165_v11, %v1122_v2  ;;  %v935_v31 = vpop.f32.mrf.mxu3  ;;  %v891_v9 = vpop.f32.mrf.mxu2  ;;  %v962_v11 = vmax.f32 %v934_v54, 0.0 }
 0x13b   : > { %v1200_v52 = vmax.f32 %v1166_v4, 0.0 }
 0x13d   : > { %v1214_v55 = vpack.c.bf16 %v1200_v52, %v1200_v52  ;;  %v976_v52 = vpack.c.bf16 %v962_v11, %v962_v11 }
 0x13e   : > { %1425 = vmatmul.bf16.gmra.mxu3 %v1343_v35  ;;  %1381 = vmatmul.bf16.gmra.mxu2 %v4415_v23  ;;  %v892_v23 = vadd.f32 %v4425_v6, %v891_v9  ;;  %v1324_v9 = vpop.permute.xlu2 %1323 }
 0x13f   : > { %v1567_v43 = vunpack.c.l.b16 %v1214_v55 }
 0x140   : > { %v1167_v25 = vpop.f32.mrf.mxu1  ;;  %v936_v8 = vadd.f32 %v935_v31, %v892_v23 }
 0x141   : > { %v1168_v18 = vadd.f32 %v1167_v25, %v1124_v3  ;;  %v938_v21 = vpop.f32.mrf.mxu3  ;;  %v894_v48 = vpop.f32.mrf.mxu2 }
 0x142   : > { %v963_v61 = vmax.f32 %v936_v8, 0.0  ;;  %v895_v20 = vadd.f32 %v4425_v6, %v894_v48 }
 0x143   : > { %v1201_v53 = vmax.f32 %v1168_v18, 0.0  ;;  %v1351_v18 = vsel %vm417_vm3, %v1256_v63, %v1324_v9 }
 0x144   : > { %v977_v41 = vpack.c.bf16 %v963_v61, %v963_v61  ;;  %v939_v3 = vadd.f32 %v938_v21, %v895_v20 }
 0x145   : > { %v1215_v22 = vpack.c.bf16 %v1201_v53, %v1201_v53  ;;  %v1522_v53 = vunpack.c.l.b16 %v976_v52 }
 0x146   : > { %v1523_v25 = vunpack.c.l.b16 %v977_v41  ;;  %v964_v48 = vmax.f32 %v939_v3, 0.0 }
 0x147   : > { %v1568_v51 = vunpack.c.l.b16 %v1215_v22 }
 0x148   : > { %v1170_v28 = vpop.f32.mrf.mxu1  ;;  %v1534_v22 = vpack.c.b16 %v1523_v25, %v1522_v53 }
 0x149   : > { %v1171_v17 = vadd.f32 %v1170_v28, %v1127_v24  ;;  %v1581_v34 = vpack.c.b16 %v1568_v51, %v1567_v43  ;;  %v940_v39 = vpop.f32.mrf.mxu3  ;;  %v896_v44 = vpop.f32.mrf.mxu2  ;;  %v978_v24 = vpack.c.bf16 %v964_v48, %v964_v48 }
 0x14a   : > { %v897_v2 = vadd.f32 %v4425_v6, %v896_v44 }
 0x14b   : > { %1588 = vrot.lane.b32.xlu2 %v1581_v34, %s3937_s18  ;;  %v1202_v46 = vmax.f32 %v1171_v17, 0.0  ;;  %v1524_v34 = vunpack.c.l.b16 %v978_v24 }
 0x14d   : > { %v1216_v32 = vpack.c.bf16 %v1202_v46, %v1202_v46 }
 0x14e   : > { %1430 = vmatmul.bf16.gmra.mxu3 %v1347_v47  ;;  %1386 = vmatmul.bf16.gmra.mxu2 %v4439_v40  ;;  %v941_v40 = vadd.f32 %v940_v39, %v897_v2 }
 0x14f   : > { %v1569_v30 = vunpack.c.l.b16 %v1216_v32 }
 0x150   : > { %v1172_v50 = vpop.f32.mrf.mxu1  ;;  %v965_v55 = vmax.f32 %v941_v40, 0.0 }
 0x151   : > { %v1173_v16 = vadd.f32 %v1172_v50, %v1129_v14  ;;  %v943_v62 = vpop.f32.mrf.mxu3  ;;  %v899_v5 = vpop.f32.mrf.mxu2 }
 0x152   : > { %v900_v27 = vadd.f32 %v4425_v6, %v899_v5  ;;  %v979_v43 = vpack.c.bf16 %v965_v55, %v965_v55 }
 0x153   : > { %v1203_v59 = vmax.f32 %v1173_v16, 0.0 }
 0x154   : > { %v4523_v15 = vadd.f32 %v943_v62, %v900_v27  ;;  %v1525_v28 = vunpack.c.l.b16 %v979_v43 }
 0x155   : > { %v1217_v0 = vpack.c.bf16 %v1203_v59, %v1203_v59 }
 0x156   : > { %v1535_v37 = vpack.c.b16 %v1525_v28, %v1524_v34 }
 0x157   : > { %v1570_v4 = vunpack.c.l.b16 %v1217_v0 }
 0x158   : > { %v1175_v46 = vpop.f32.mrf.mxu1 }
 0x159   : > { %v1582_v31 = vpack.c.b16 %v1570_v4, %v1569_v30  ;;  %v4525_v35 = vpop.f32.mrf.mxu3  ;;  %v4528_v57 = vpop.f32.mrf.mxu2 }
 0x15b   : > { %1590 = vrot.lane.b32.xlu0 %v1582_v31, %s3937_s18 }
 0x15e   : > { %1435 = vmatmul.bf16.gmra.mxu3 %v1351_v18  ;;  %1391 = vmatmul.bf16.gmra.mxu2 %v4450_v10  ;;  %v1131_v10 = vpop.f32.mrf.mxu0 }
 0x15f   : > { %v1132_v61 = vadd.f32 %v4425_v6, %v1131_v10 }
 0x160   : > { %v1177_v32 = vpop.f32.mrf.mxu1 }
 0x161   : > { %v948_v51 = vpop.f32.mrf.mxu3  ;;  %v904_v21 = vpop.f32.mrf.mxu2  ;;  %v1176_v27 = vadd.f32 %v1175_v46, %v1132_v61 }
 0x162   : > { %v905_v17 = vadd.f32 %v4425_v6, %v904_v21 }
 0x163   : > { %1543 = vrot.lane.b32.xlu0 %v1534_v22, %s3938_s13  ;;  %v1204_v63 = vmax.f32 %v1176_v27, 0.0 }
 0x164   : > { %v4534_v60 = vadd.f32 %v948_v51, %v905_v17 }
 0x165   : > { %v1218_v43 = vpack.c.bf16 %v1204_v63, %v1204_v63 }
 0x166   : > { %v1133_v12 = vpop.f32.mrf.mxu0 }
 0x167   : > { %v1134_v5 = vadd.f32 %v4425_v6, %v1133_v12  ;;  %v902_v12 = vadd.f32 %v4425_v6, %v4528_v57 }
 0x168   : > { %v1180_v30 = vpop.f32.mrf.mxu1 }
 0x169   : > { %v4536_v38 = vpop.f32.mrf.mxu3  ;;  %v4539_v39 = vpop.f32.mrf.mxu2  ;;  %v1178_v20 = vadd.f32 %v1177_v32, %v1134_v5 }
 0x16b   : > { %1545 = vrot.lane.b32.xlu0 %v1535_v37, %s3938_s13  ;;  %v1205_v9 = vmax.f32 %v1178_v20, 0.0 }
 0x16d   : > { %v1219_v22 = vpack.c.bf16 %v1205_v9, %v1205_v9 }
 0x16e   : > { %v1136_v59 = vpop.f32.mrf.mxu0 }
 0x16f   : > { %v1137_v52 = vadd.f32 %v4425_v6, %v1136_v59 }
 0x170   : > { %v1182_v18 = vpop.f32.mrf.mxu1 }
 0x171   : > { %v953_v23 = vpop.f32.mrf.mxu3  ;;  %v909_v44 = vpop.f32.mrf.mxu2  ;;  %v1181_v51 = vadd.f32 %v1180_v30, %v1137_v52  ;;  %v946_v30 = vadd.f32 %v4525_v35, %v902_v12 }
 0x172   : > { %v910_v14 = vadd.f32 %v4425_v6, %v909_v44  ;;  %v1572_v44 = vunpack.c.l.b16 %v1219_v22 }
 0x173   : > { %v1206_v10 = vmax.f32 %v1181_v51, 0.0 }
 0x174   : > { %v4542_v47 = vadd.f32 %v953_v23, %v910_v14  ;;  %v1571_v23 = vunpack.c.l.b16 %v1218_v43 }
 0x176   : > { %v1138_v40 = vpop.f32.mrf.mxu0  ;;  %v1583_v5 = vpack.c.b16 %v1572_v44, %v1571_v23 }
 0x177   : > { %v1139_v55 = vadd.f32 %v4425_v6, %v1138_v40  ;;  %v966_v40 = vmax.f32 %v4523_v15, 0.0 }
 0x179   : > { %v4544_v8 = vpop.f32.mrf.mxu3  ;;  %v4546_v50 = vpop.f32.mrf.mxu2  ;;  %v1183_v34 = vadd.f32 %v1182_v18, %v1139_v55  ;;  %v980_v55 = vpack.c.bf16 %v966_v40, %v966_v40 }
 0x17b   : > { %v1207_v14 = vmax.f32 %v1183_v34, 0.0 }
 0x17d   : > { %v1221_v61 = vpack.c.bf16 %v1207_v14, %v1207_v14 }
 0x17e   : > { %v1141_v22 = vpop.f32.mrf.mxu0 }
 0x181   : > { %v1406_v16 = vpop.f32.mrf.mxu3  ;;  %v1362_v54 = vpop.f32.mrf.mxu2 }
 0x182   : > { %v1363_v62 = vadd.f32 %v4425_v6, %v1362_v54 }
 0x184   : > { %v1407_v2 = vadd.f32 %v1406_v16, %v1363_v62  ;;  %v1220_v16 = vpack.c.bf16 %v1206_v10, %v1206_v10 }
 0x186   : > { %v1441_v4 = vmax.f32 %v1407_v2, 0.0 }
 0x188   : > { %v1455_v3 = vpack.c.bf16 %v1441_v4, %v1441_v4  ;;  %v967_v4 = vmax.f32 %v946_v30, 0.0 }
 0x189   : > { %v1408_v0 = vpop.f32.mrf.mxu3  ;;  %v1364_v11 = vpop.f32.mrf.mxu2 }
 0x18a   : > { %v1365_v41 = vadd.f32 %v4425_v6, %v1364_v11  ;;  %v1616_v21 = vunpack.c.l.b16 %v1455_v3  ;;  %v1574_v11 = vunpack.c.l.b16 %v1221_v61 }
 0x18c   : > { %v1409_v31 = vadd.f32 %v1408_v0, %v1365_v41  ;;  %v1573_v0 = vunpack.c.l.b16 %v1220_v16 }
 0x18e   : > { %v1442_v25 = vmax.f32 %v1409_v31, 0.0  ;;  %v1584_v3 = vpack.c.b16 %v1574_v11, %v1573_v0 }
 0x190   : > { %v1456_v53 = vpack.c.bf16 %v1442_v25, %v1442_v25  ;;  %v981_v25 = vpack.c.bf16 %v967_v4, %v967_v4 }
 0x191   : > { %v1411_v48 = vpop.f32.mrf.mxu3  ;;  %v1367_v24 = vpop.f32.mrf.mxu2 }
 0x192   : > { %v1617_v28 = vunpack.c.l.b16 %v1456_v53  ;;  %v1368_v17 = vadd.f32 %v4425_v6, %v1367_v24  ;;  %v1527_v53 = vunpack.c.l.b16 %v981_v25  ;;  %v1526_v24 = vunpack.c.l.b16 %v980_v55 }
 0x194   : > { %v1630_v37 = vpack.c.b16 %v1617_v28, %v1616_v21  ;;  %v1412_v46 = vadd.f32 %v1411_v48, %v1368_v17  ;;  %v1536_v28 = vpack.c.b16 %v1527_v53, %v1526_v24  ;;  %v1185_v17 = vpop.f32.mrf.mxu1 }
 0x196   : > { %1637 = vrot.lane.b32.xlu1 %v1630_v37, %s3939_s25  ;;  %v1443_v59 = vmax.f32 %v1412_v46, 0.0 }
 0x198   : > { %v1457_v27 = vpack.c.bf16 %v1443_v59, %v1443_v59 }
 0x199   : > { %v1413_v32 = vpop.f32.mrf.mxu3  ;;  %v1369_v54 = vpop.f32.mrf.mxu2 }
 0x19a   : > { %v1370_v62 = vadd.f32 %v4425_v6, %v1369_v54  ;;  %v1618_v63 = vunpack.c.l.b16 %v1457_v27  ;;  %v1142_v54 = vadd.f32 %v4425_v6, %v1141_v22  ;;  %v907_v22 = vadd.f32 %v4425_v6, %v4539_v39 }
 0x19c   : > { %v1414_v2 = vadd.f32 %v1413_v32, %v1370_v62  ;;  %v1143_v32 = vpop.f32.mrf.mxu0  ;;  %v1187_v61 = vpop.f32.mrf.mxu1 }
 0x19d   : > { %v1144_v62 = vadd.f32 %v4425_v6, %v1143_v32 }
 0x19e   : > { %v1444_v20 = vmax.f32 %v1414_v2, 0.0  ;;  %1592 = vrot.lane.b32.xlu1 %v1583_v5, %s3937_s18  ;;  %v1186_v2 = vadd.f32 %v1185_v17, %v1142_v54  ;;  %v951_v17 = vadd.f32 %v4536_v38, %v907_v22  ;;  %v1540_v38 = vpop.permute.xlu0 %1539 }
 0x19f   : > { %v1188_v11 = vadd.f32 %v1187_v61, %v1144_v62  ;;  %v567_v61 = vadd.f32 %v4425_v6, %v4469_v33 }
 0x1a0   : > { %v1458_v41 = vpack.c.bf16 %v1444_v20, %v1444_v20  ;;  %v1208_v4 = vmax.f32 %v1186_v2, 0.0 }
 0x1a1   : > { %v1416_v57 = vpop.f32.mrf.mxu3  ;;  %v1372_v31 = vpop.f32.mrf.mxu2  ;;  %v1209_v40 = vmax.f32 %v1188_v11, 0.0 }
 0x1a2   : > { %v1619_v9 = vunpack.c.l.b16 %v1458_v41  ;;  %v1373_v52 = vadd.f32 %v4425_v6, %v1372_v31 }
 0x1a3   : > { %v1223_v55 = vpack.c.bf16 %v1209_v40, %v1209_v40 }
 0x1a4   : > { %v1631_v35 = vpack.c.b16 %v1619_v9, %v1618_v63  ;;  %v1417_v18 = vadd.f32 %v1416_v57, %v1373_v52  ;;  %v1222_v9 = vpack.c.bf16 %v1208_v4, %v1208_v4  ;;  %v1146_v33 = vpop.f32.mrf.mxu0 }
 0x1a6   : > { %1594 = vrot.lane.b32.xlu1 %v1584_v3, %s3937_s18  ;;  %1639 = vrot.lane.b32.xlu2 %v1631_v35, %s3939_s25  ;;  %v1445_v15 = vmax.f32 %v1417_v18, 0.0  ;;  %v1575_v53 = vunpack.c.l.b16 %v1222_v9 }
 0x1a8   : > { %v1459_v34 = vpack.c.bf16 %v1445_v15, %v1445_v15 }
 0x1a9   : > { %v1418_v48 = vpop.f32.mrf.mxu3  ;;  %v1374_v43 = vpop.f32.mrf.mxu2 }
 0x1aa   : > { %v1375_v51 = vadd.f32 %v4425_v6, %v1374_v43  ;;  %v1620_v46 = vunpack.c.l.b16 %v1459_v34 }
 0x1ac   : > { %v1419_v21 = vadd.f32 %v1418_v48, %v1375_v51  ;;  %v1576_v48 = vunpack.c.l.b16 %v1223_v55 }
 0x1ae   : > { %v1446_v37 = vmax.f32 %v1419_v21, 0.0  ;;  %1547 = vrot.lane.b32.xlu1 %v1536_v28, %s3938_s13  ;;  %v1585_v28 = vpack.c.b16 %v1576_v48, %v1575_v53 }
 0x1b0   : > { %v1460_v10 = vpack.c.bf16 %v1446_v37, %v1446_v37 }
 0x1b1   : > { %v1421_v23 = vpop.f32.mrf.mxu3  ;;  %v1377_v44 = vpop.f32.mrf.mxu2 }
 0x1b2   : > { %v1621_v14 = vunpack.c.l.b16 %v1460_v10  ;;  %v1378_v12 = vadd.f32 %v4425_v6, %v1377_v44 }
 0x1b4   : > { %v1632_v16 = vpack.c.b16 %v1621_v14, %v1620_v46  ;;  %v1422_v59 = vadd.f32 %v1421_v23, %v1378_v12  ;;  %v969_v23 = vmax.f32 %v951_v17, 0.0  ;;  %v968_v46 = vmax.f32 %v4534_v60, 0.0  ;;  %v1542_v60 = vpop.permute.xlu1 %1541 }
 0x1b5   : > { %v1657_v11 = vsel %vm1651_vm4, %v4462_v1, %v1542_v60  ;;  %v572_v1 = vadd.f32 %v4425_v6, %v4494_v19 }
 0x1b6   : > { %1641 = vrot.lane.b32.xlu2 %v1632_v16, %s3939_s25  ;;  %v1447_v0 = vmax.f32 %v1422_v59, 0.0  ;;  %v983_v39 = vpack.c.bf16 %v969_v23, %v969_v23  ;;  %v982_v16 = vpack.c.bf16 %v968_v46, %v968_v46 }
 0x1b8   : > { %v1461_v41 = vpack.c.bf16 %v1447_v0, %v1447_v0  ;;  %v1529_v54 = vunpack.c.l.b16 %v983_v39  ;;  %v1528_v59 = vunpack.c.l.b16 %v982_v16  ;;  %v637_v0 = vmax.f32 %v4464_v29, 0.0 }
 0x1b9   : > { %v1423_v5 = vpop.f32.mrf.mxu3  ;;  %v1379_v30 = vpop.f32.mrf.mxu2  ;;  %v1654_v29 = vsel %vm1651_vm4, %v4452_v36, %v1540_v38 }
 0x1ba   : > { %v1380_v27 = vadd.f32 %v4425_v6, %v1379_v30  ;;  %v1622_v3 = vunpack.c.l.b16 %v1461_v41  ;;  %v1537_v62 = vpack.c.b16 %v1529_v54, %v1528_v59  ;;  %v611_v30 = vadd.f32 %v4456_v26, %v567_v61 }
 0x1bb   : > { %v639_v54 = vmax.f32 %v4480_v49, 0.0 }
 0x1bc   : > { %v1424_v20 = vadd.f32 %v1423_v5, %v1380_v27  ;;  %v1589_v5 = vpop.permute.xlu2 %1588  ;;  %v638_v27 = vmax.f32 %v611_v30, 0.0 }
 0x1be   : > { %v1448_v57 = vmax.f32 %v1424_v20, 0.0  ;;  %v652_v40 = vpack.c.bf16 %v638_v27, %v638_v27 }
 0x1c0   : > { %v1462_v31 = vpack.c.bf16 %v1448_v57, %v1448_v57  ;;  %v651_v57 = vpack.c.bf16 %v637_v0, %v637_v0 }
 0x1c1   : > { %v1426_v63 = vpop.f32.mrf.mxu3  ;;  %v1382_v52 = vpop.f32.mrf.mxu2 }
 0x1c2   : > { %v1623_v25 = vunpack.c.l.b16 %v1462_v31  ;;  %v1383_v35 = vadd.f32 %v4425_v6, %v1382_v52  ;;  %v1190_v31 = vpop.f32.mrf.mxu1  ;;  %v1487_v9 = vunpack.c.l.b16 %v651_v57  ;;  %v1488_v52 = vunpack.c.l.b16 %v652_v40 }
 0x1c4   : > { %v1633_v18 = vpack.c.b16 %v1623_v25, %v1622_v3  ;;  %v1427_v43 = vadd.f32 %v1426_v63, %v1383_v35  ;;  %v1674_v3 = vsel %vm417_vm3, %v1654_v29, %v1589_v5 }
 0x1c6   : > { %1643 = vrot.lane.b32.xlu2 %v1633_v18, %s3939_s25  ;;  %v1449_v51 = vmax.f32 %v1427_v43, 0.0 }
 0x1c8   : > { %v1463_v37 = vpack.c.bf16 %v1449_v51, %v1449_v51 }
 0x1c9   : > { %v1384_v24 = vpop.f32.mrf.mxu2  ;;  %v1428_v15 = vpop.f32.mrf.mxu3 }
 0x1ca   : > { %v1385_v21 = vadd.f32 %v4425_v6, %v1384_v24  ;;  %v1624_v14 = vunpack.c.l.b16 %v1463_v37  ;;  %v1148_v24 = vpop.f32.mrf.mxu0  ;;  %v1499_v37 = vpack.c.b16 %v1488_v52, %v1487_v9 }
 0x1cb   : > { %v1149_v46 = vadd.f32 %v4425_v6, %v1148_v24 }
 0x1cc   : > { %v1429_v34 = vadd.f32 %v1428_v15, %v1385_v21 }
 0x1cd   : > { %v1591_v2 = vpop.permute.xlu0 %1590 }
 0x1ce   : > { %v1450_v10 = vmax.f32 %v1429_v34, 0.0  ;;  %1596 = vrot.lane.b32.xlu2 %v1585_v28, %s3937_s18  ;;  %v1676_v4 = vsel %vm417_vm3, %v1657_v11, %v1591_v2  ;;  %v616_v28 = vadd.f32 %v4466_v7, %v572_v1  ;;  %v653_v11 = vpack.c.bf16 %v639_v54, %v639_v54  ;;  %v3861_v54 = vld [vmem:[%s5435_s3 + $0xf8] sm:$0xff] }
 0x1cf   : > { %2376 = vmatpush.bf16.msra.mxu3 %v3861_v54  ;;  %v3847_v54 = vld [vmem:[%s5435_s3 + $0x88] sm:$0xff] }
 0x1d0   : > { %v1464_v44 = vpack.c.bf16 %v1450_v10, %v1450_v10  ;;  %v640_v59 = vmax.f32 %v616_v28, 0.0  ;;  %v1489_v52 = vunpack.c.l.b16 %v653_v11  ;;  %v3845_v11 = vld [vmem:[%s5435_s3 + $0x78] sm:$0xff] }
 0x1d1   : > { %v1387_v53 = vpop.f32.mrf.mxu2  ;;  %v1431_v34 = vpop.f32.mrf.mxu3  ;;  %2290 = vmatpush.bf16.msrb.mxu1 %v3845_v11  ;;  %v3830_v11 = vld [vmem:[%s5435_s3] sm:$0xff] }
 0x1d2   : > { %v1625_v12 = vunpack.c.l.b16 %v1464_v44  ;;  %v1147_v44 = vadd.f32 %v4425_v6, %v1146_v33 }
 0x1d4   : > { %v1634_v32 = vpack.c.b16 %v1625_v12, %v1624_v14  ;;  %v1192_v14 = vpop.f32.mrf.mxu1  ;;  %v1191_v5 = vadd.f32 %v1190_v31, %v1147_v44 }
 0x1d5   : > { %v1544_v17 = vpop.permute.xlu0 %1543  ;;  %v1193_v2 = vadd.f32 %v1192_v14, %v1149_v46 }
 0x1d6   : > { %1645 = vrot.lane.b32.xlu2 %v1634_v32, %s3939_s25  ;;  %v1660_v12 = vsel %vm1651_vm4, %v1499_v37, %v1544_v17  ;;  %v1210_v40 = vmax.f32 %v1191_v5, 0.0 }
 0x1d7   : > { %v1211_v31 = vmax.f32 %v1193_v2, 0.0 }
 0x1d9   : > { %v1389_v0 = vpop.f32.mrf.mxu2  ;;  %v1433_v29 = vpop.f32.mrf.mxu3 }
 0x1da   : > { %v1390_v57 = vadd.f32 %v4425_v6, %v1389_v0  ;;  %v3860_v0 = vld [vmem:[%s5435_s3 + $0xf0] sm:$0xff] }
 0x1db   : > { %2377 = vmatpush.bf16.msra.mxu3 %v3860_v0  ;;  %v3841_v0 = vld [vmem:[%s5435_s3 + $0x58] sm:$0xff] }
 0x1de   : > { %1549 = vrot.lane.b32.xlu2 %v1537_v62, %s3938_s13 }
 0x200   : > { %v1640_v20 = vpop.permute.xlu2 %1639 }
 0x201   : > { %v4590_v41 = vsel %vm1687_vm5, %v1676_v4, %v1640_v20  ;;  %v654_v20 = vpack.c.bf16 %v640_v59, %v640_v59  ;;  %v3837_v59 = vld [vmem:[%s5435_s3 + $0x38] sm:$0xff] }
 0x202   : > { %v1712_v26 = vshrl.u32 %v4590_v41, 16  ;;  %v1708_v63 = vshll.u32 %v4590_v41, 16  ;;  %v1814_v55 = vrot.slane %v4590_v41, 6  ;;  %2247 = vmatpush.bf16.msra.mxu0 %v3837_v59  ;;  %v3856_v59 = vld [vmem:[%s5435_s3 + $0xd0] sm:$0xff] }
 0x203   : > { %v1490_v1 = vunpack.c.l.b16 %v654_v20 }
 0x204   : > { %v1788_v18 = vrot.slane %v1712_v26, 5  ;;  %v1789_v19 = vrot.slane %v1708_v63, 6  ;;  %v1710_v61 = vrot.slane %v1708_v63, 1 }
 0x205   : > { %v1500_v24 = vpack.c.b16 %v1490_v1, %v1489_v52  ;;  %v3850_v1 = vld [vmem:[%s5435_s3 + $0xa0] sm:$0xff] }
 0x206   : > { %v1790_v23 = vor.u32 %v1789_v19, %v1788_v18  ;;  %v1434_v18 = vadd.f32 %v1433_v29, %v1390_v57  ;;  %v3835_v29 = vld [vmem:[%s5435_s3 + $0x28] sm:$0xff] }
 0x208   : > { %v1638_v25 = vpop.permute.xlu1 %1637 }
 0x209   : > { %v4600_v35 = vsel %vm1687_vm5, %v1674_v3, %v1638_v25  ;;  %v1388_v3 = vadd.f32 %v4425_v6, %v1387_v53  ;;  %v1714_v6 = vor.u32 %v1712_v26, %v1710_v61  ;;  %v1452_v53 = vmax.f32 %v1434_v18, 0.0 }
 0x20a   : > { %v1702_v36 = vshrl.u32 %v4600_v35, 16  ;;  %v1704_v48 = vshll.u32 %v4600_v35, 16  ;;  %v1813_v43 = vrot.slane %v4600_v35, 6 }
 0x20b   : > { %v1432_v19 = vadd.f32 %v1431_v34, %v1388_v3  ;;  %v1466_v44 = vpack.c.bf16 %v1452_v53, %v1452_v53 }
 0x20c   : > { %v4609_v22 = vsel %vm1812_vm6, %v1813_v43, %v1814_v55  ;;  %v1785_v15 = vrot.slane %v1702_v36, 5  ;;  %v1786_v51 = vrot.slane %v1704_v48, 6  ;;  %v1706_v21 = vrot.slane %v1704_v48, 1  ;;  %v1546_v43 = vpop.permute.xlu0 %1545 }
 0x20d   : > { %1826 = vrot.lane.b32.xlu0 %v4609_v22, %s3937_s18  ;;  %v1225_v48 = vpack.c.bf16 %v1211_v31, %v1211_v31  ;;  %v1451_v34 = vmax.f32 %v1432_v19, 0.0  ;;  %v3859_v31 = vld [vmem:[%s5435_s3 + $0xe8] sm:$0xff] }
 0x20e   : > { %v1787_v10 = vor.u32 %v1786_v51, %v1785_v15  ;;  %v1707_v16 = vor.u32 %v1706_v21, %v1702_v36  ;;  %v1224_v36 = vpack.c.bf16 %v1210_v40, %v1210_v40  ;;  %v1663_v51 = vsel %vm1651_vm4, %v1500_v24, %v1546_v43  ;;  %2378 = vmatpush.bf16.msra.mxu3 %v3859_v31  ;;  %v3858_v43 = vld [vmem:[%s5435_s3 + $0xe0] sm:$0xff] }
 0x20f   : > { %v1578_v28 = vunpack.c.l.b16 %v1225_v48 }
 0x210   : > { %v1593_v39 = vpop.permute.xlu1 %1592  ;;  %v1642_v32 = vpop.permute.xlu2 %1641  ;;  %v4618_v7 = vsel %vm1784_vm7, %v1787_v10, %v1790_v23  ;;  %v4630_v27 = vsel %vm675_vm0, %v1707_v16, %v1710_v61  ;;  %v1577_v21 = vunpack.c.l.b16 %v1224_v36  ;;  %v3853_v16 = vld [vmem:[%s5435_s3 + $0xb8] sm:$0xff]  ;;  %v3852_v61 = vld [vmem:[%s5435_s3 + $0xb0] sm:$0xff] }
 0x211   : > { %v1678_v62 = vsel %vm417_vm3, %v1660_v12, %v1593_v39  ;;  %1840 = vrot.lane.b32.xlu1 %v4618_v7, %s3937_s18  ;;  %2333 = vmatpush.bf16.msrb.mxu2 %v3853_v16  ;;  %v3843_v16 = vld [vmem:[%s5435_s3 + $0x68] sm:$0xff] }
 0x212   : > { %v4625_v38 = vsel %vm1687_vm5, %v1678_v62, %v1642_v32  ;;  %v1586_v46 = vpack.c.b16 %v1578_v28, %v1577_v21  ;;  %v1465_v32 = vpack.c.bf16 %v1451_v34, %v1451_v34  ;;  %v1627_v62 = vunpack.c.l.b16 %v1466_v44  ;;  %2379 = vmatpush.bf16.msra.mxu3 %v3858_v43 }
 0x213   : > { %v1715_v30 = vshll.u32 %v4625_v38, 16  ;;  %v1719_v60 = vshrl.u32 %v4625_v38, 16  ;;  %v1816_v49 = vrot.slane %v4625_v38, 6 }
 0x214   : > { %v1626_v20 = vunpack.c.l.b16 %v1465_v32  ;;  %v3833_v32 = vld [vmem:[%s5435_s3 + $0x18] sm:$0xff] }
 0x215   : > { %1749 = vrot.lane.b32.xlu0 %v4630_v27, %s3937_s18  ;;  %v1792_v4 = vrot.slane %v1719_v60, 5  ;;  %v1793_v33 = vrot.slane %v1715_v30, 6  ;;  %v4641_v9 = vsel %vm1812_vm6, %v1814_v55, %v1816_v49  ;;  %v4652_v55 = vrot.slane %v1715_v30, 1  ;;  %2334 = vmatpush.bf16.msrb.mxu2 %v3852_v61  ;;  %v3842_v61 = vld [vmem:[%s5435_s3 + $0x60] sm:$0xff] }
 0x217   : > { %v4638_v63 = vor.u32 %v1793_v33, %v1792_v4  ;;  %v4662_v10 = vsel %vm675_vm0, %v1714_v6, %v4652_v55  ;;  %v1635_v4 = vpack.c.b16 %v1627_v62, %v1626_v20  ;;  %v3851_v33 = vld [vmem:[%s5435_s3 + $0xa8] sm:$0xff]  ;;  %v3832_v62 = vld [vmem:[%s5435_s3 + $0x10] sm:$0xff] }
 0x218   : > { %v1595_v15 = vpop.permute.xlu1 %1594  ;;  %v3840_v20 = vld [vmem:[%s5435_s3 + $0x50] sm:$0xff] }
 0x219   : > { %1828 = vrot.lane.b32.xlu1 %v4641_v9, %s3937_s18  ;;  %v4648_v25 = vsel %vm1784_vm7, %v1790_v23, %v4638_v63  ;;  %v1680_v17 = vsel %vm417_vm3, %v1663_v51, %v1595_v15  ;;  %2335 = vmatpush.bf16.msrb.mxu2 %v3851_v33  ;;  %v3849_v15 = vld [vmem:[%s5435_s3 + $0x98] sm:$0xff]  ;;  %v3838_v33 = vld [vmem:[%s5435_s3 + $0x40] sm:$0xff] }
 0x21a   : > { %1842 = vrot.lane.b32.xlu2 %v4648_v25, %s3937_s18 }
 0x21d   : > { %1770 = vrot.lane.b32.xlu0 %v4600_v35, %s3937_s18  ;;  %2336 = vmatpush.bf16.msrb.mxu2 %v3850_v1 }
 0x220   : > { %v1644_v37 = vpop.permute.xlu2 %1643  ;;  %v1548_v57 = vpop.permute.xlu1 %1547 }
 0x221   : > { %v4665_v23 = vsel %vm1687_vm5, %v1680_v17, %v1644_v37  ;;  %1751 = vrot.lane.b32.xlu1 %v4662_v10, %s3937_s18  ;;  %v1666_v52 = vsel %vm1651_vm4, %v4486_v13, %v1548_v57  ;;  %2337 = vmatpush.bf16.msrb.mxu2 %v3849_v15 }
 0x222   : > { %v1818_v26 = vrot.slane %v4665_v23, 6  ;;  %v1722_v14 = vshll.u32 %v4665_v23, 16  ;;  %v1726_v12 = vshrl.u32 %v4665_v23, 16 }
 0x224   : > { %v4675_v39 = vsel %vm1812_vm6, %v1816_v49, %v1818_v26  ;;  %v1796_v30 = vrot.slane %v1726_v12, 5  ;;  %v1797_v2 = vrot.slane %v1722_v14, 6  ;;  %v3836_v49 = vld [vmem:[%s5435_s3 + $0x30] sm:$0xff]  ;;  %v1724_v48 = vrot.slane %v1722_v14, 1 }
 0x225   : > { %1830 = vrot.lane.b32.xlu2 %v4675_v39, %s3937_s18  ;;  %1598 = vrot.lane.b32.xlu0 %v1586_v46, %s3937_s18  ;;  %v3834_v46 = vld [vmem:[%s5435_s3 + $0x20] sm:$0xff]  ;;  %v3844_v14 = vld [vmem:[%s5435_s3 + $0x70] sm:$0xff] }
 0x226   : > { %v1798_v40 = vor.u32 %v1797_v2, %v1796_v30  ;;  %2248 = vmatpush.bf16.msra.mxu0 %v3836_v49  ;;  %v1728_v17 = vor.u32 %v1726_v12, %v1724_v48  ;;  %v3848_v12 = vld [vmem:[%s5435_s3 + $0x90] sm:$0xff]  ;;  %2291 = vmatpush.bf16.msrb.mxu1 %v3844_v14  ;;  %v3855_v30 = vld [vmem:[%s5435_s3 + $0xc8] sm:$0xff]  ;;  %v3854_v49 = vld [vmem:[%s5435_s3 + $0xc0] sm:$0xff]  ;;  %v1436_v14 = vpop.f32.mrf.mxu3 }
 0x227   : > { %2338 = vmatpush.bf16.msrb.mxu2 %v3848_v12  ;;  %v3831_v2 = vld [vmem:[%s5435_s3 + $0x8] sm:$0xff] }
 0x228   : > { %v1597_v5 = vpop.permute.xlu2 %1596  ;;  %v4723_v36 = vsel %vm1784_vm7, %v4638_v63, %v1798_v40  ;;  %v1721_v63 = vor.u32 %v1719_v60, %v4652_v55 }
 0x229   : > { %1772 = vrot.lane.b32.xlu1 %v4590_v41, %s3937_s18  ;;  %v1682_v3 = vsel %vm417_vm3, %v1666_v52, %v1597_v5  ;;  %v3846_v5 = vld [vmem:[%s5435_s3 + $0x80] sm:$0xff] }
 0x22a   : > { %2249 = vmatpush.bf16.msra.mxu0 %v3835_v29  ;;  %v4742_v6 = vsel %vm675_vm0, %v1721_v63, %v1724_v48  ;;  %2292 = vmatpush.bf16.msrb.mxu1 %v3843_v16 }
 0x22b   : > { %2339 = vmatpush.bf16.msrb.mxu2 %v3847_v54 }
 0x22d   : > { %1774 = vrot.lane.b32.xlu2 %v4625_v38, %s3937_s18  ;;  %1647 = vrot.lane.b32.xlu0 %v1635_v4, %s3939_s25  ;;  %v3839_v4 = vld [vmem:[%s5435_s3 + $0x48] sm:$0xff] }
 0x22e   : > { %2250 = vmatpush.bf16.msra.mxu0 %v3834_v46  ;;  %2293 = vmatpush.bf16.msrb.mxu1 %v3842_v61 }
 0x22f   : > { %2340 = vmatpush.bf16.msrb.mxu2 %v3846_v5 }
 0x230   : > { %v1646_v18 = vpop.permute.xlu2 %1645 }
 0x231   : > { %v4729_v13 = vsel %vm1687_vm5, %v1682_v3, %v1646_v18  ;;  %1844 = vrot.lane.b32.xlu1 %v4723_v36, %s3937_s18 }
 0x232   : > { %v1729_v19 = vshll.u32 %v4729_v13, 16  ;;  %v1733_v24 = vshrl.u32 %v4729_v13, 16  ;;  %v1820_v34 = vrot.slane %v4729_v13, 6  ;;  %2251 = vmatpush.bf16.msra.mxu0 %v3833_v32  ;;  %2294 = vmatpush.bf16.msrb.mxu1 %v3841_v0 }
 0x234   : > { %v1800_v53 = vrot.slane %v1733_v24, 5  ;;  %v1801_v51 = vrot.slane %v1729_v19, 6  ;;  %v1731_v21 = vrot.slane %v1729_v19, 1  ;;  %v4767_v44 = vsel %vm1812_vm6, %v1818_v26, %v1820_v34  ;;  %v3857_v26 = vld [vmem:[%s5435_s3 + $0xd8] sm:$0xff]  ;;  %v1151_v19 = vpop.f32.mrf.mxu0 }
 0x235   : > { %1753 = vrot.lane.b32.xlu0 %v4742_v6, %s3937_s18  ;;  %2380 = vmatpush.bf16.msra.mxu3 %v3857_v26 }
 0x236   : > { %v4746_v28 = vor.u32 %v1801_v51, %v1800_v53  ;;  %v4748_v37 = vor.u32 %v1733_v24, %v1731_v21  ;;  %v4755_v55 = vsel %vm675_vm0, %v1728_v17, %v1731_v21  ;;  %2252 = vmatpush.bf16.msra.mxu0 %v3832_v62  ;;  %2295 = vmatpush.bf16.msrb.mxu1 %v3840_v20  ;;  %v1392_v53 = vpop.f32.mrf.mxu2 }
 0x238   : > { %v4752_v60 = vsel %vm1784_vm7, %v1798_v40, %v4746_v28  ;;  %v1550_v3 = vpop.permute.xlu2 %1549 }
 0x239   : > { %1846 = vrot.lane.b32.xlu2 %v4752_v60, %s3937_s18  ;;  %1755 = vrot.lane.b32.xlu1 %v4755_v55, %s3937_s18 }
 0x23a   : > { %2381 = vmatpush.bf16.msra.mxu3 %v3856_v59  ;;  %2253 = vmatpush.bf16.msra.mxu0 %v3831_v2 }
 0x23b   : > { %2296 = vmatpush.bf16.msrb.mxu1 %v3839_v4  ;;  %v1438_v4 = vpop.f32.mrf.mxu3 }
 0x23c   : > { %v1153_v32 = vpop.f32.mrf.mxu0 }
 0x23d   : > { %1832 = vrot.lane.b32.xlu0 %v4767_v44, %s3937_s18 }
 0x23e   : > { %2382 = vmatpush.bf16.msra.mxu3 %v3855_v30  ;;  %2254 = vmatpush.bf16.msra.mxu0 %v3830_v11  ;;  %v1394_v59 = vpop.f32.mrf.mxu2 }
 0x23f   : > { %2297 = vmatpush.bf16.msrb.mxu1 %v3838_v33 }
 0x242   : > { %2383 = vmatpush.bf16.msra.mxu3 %v3854_v49 }
 0x245   : > { %1776 = vrot.lane.b32.xlu0 %v4665_v23, %s3937_s18 }
 0x274   : > { %v1843_v63 = vpop.permute.xlu2 %1842 }
 0x275   : > { %v1962_v17 = vsel %vm417_vm3, %v1843_v63, %v4641_v9 }
 0x27f   : > { %v1827_v57 = vpop.permute.xlu0 %1826  ;;  %v1831_v62 = vpop.permute.xlu2 %1830 }
 0x280   : > { %v1925_v40 = vsel %vm417_vm3, %v4618_v7, %v1827_v57  ;;  %v1929_v0 = vsel %vm417_vm3, %v4723_v36, %v1831_v62 }
 0x281   : > { %v1938_v31 = vsel %vm1687_vm5, %v1925_v40, %v1827_v57  ;;  %v1942_v36 = vsel %vm1687_vm5, %v1929_v0, %v1831_v62 }
 0x282   : > { %2341 = vmatmul.bf16.vlgmr.msrb.gmra.mxu2 %v1938_v31 }
 0x283   : > { %v1841_v29 = vpop.permute.xlu1 %1840 }
 0x284   : > { %v1960_v52 = vsel %vm417_vm3, %v1841_v29, %v4609_v22 }
 0x285   : > { %v1973_v1 = vsel %vm1687_vm5, %v1960_v52, %v4609_v22 }
 0x286   : > { %2384 = vmatmul.bf16.vlgmr.msra.gmra.mxu3 %v1973_v1 }
 0x287   : > { %v1750_v18 = vpop.permute.xlu0 %1749 }
 0x288   : > { %v1855_v48 = vsel %vm417_vm3, %v4600_v35, %v1750_v18  ;;  %v1195_v35 = vpop.f32.mrf.mxu1 }
 0x289   : > { %v1868_v43 = vsel %vm1687_vm5, %v1855_v48, %v1750_v18 }
 0x28a   : > { %2255 = vmatmul.bf16.vlgmr.msra.gmra.mxu0 %v1868_v43 }
 0x28b   : > { %v1829_v7 = vpop.permute.xlu1 %1828 }
 0x28c   : > { %v1927_v24 = vsel %vm417_vm3, %v4648_v25, %v1829_v7  ;;  %v1975_v25 = vsel %vm1687_vm5, %v1962_v17, %v4641_v9 }
 0x28d   : > { %v1940_v21 = vsel %vm1687_vm5, %v1927_v24, %v1829_v7 }
 0x28f   : > { %v1771_v15 = vpop.permute.xlu0 %1770 }
 0x290   : > { %v1890_v22 = vsel %vm417_vm3, %v1771_v15, %v4630_v27  ;;  %v1197_v5 = vpop.f32.mrf.mxu1 }
 0x291   : > { %v1903_v51 = vsel %vm1687_vm5, %v1890_v22, %v4630_v27  ;;  %v4856_v27 = vld [vmem:[%s5434_s2] ss:$0 sm:$0xff] }
 0x292   : > { %2298 = vmatmul.bf16.vlgmr.msrb.gmra.mxu1 %v1903_v51  ;;  %2346 = vmatmul.bf16.gmra.mxu2 %v1940_v21  ;;  %v912_v16 = vadd.f32 %v4856_v27, %v4546_v50  ;;  %v1152_v9 = vadd.f32 %v4856_v27, %v1151_v19  ;;  %v1395_v2 = vadd.f32 %v4856_v27, %v1394_v59 }
 0x293   : > { %v1752_v46 = vpop.permute.xlu1 %1751  ;;  %v1669_v50 = vsel %vm1651_vm4, %v4498_v58, %v1550_v3  ;;  %v970_v3 = vmax.f32 %v4542_v47, 0.0 }
 0x294   : > { %v1857_v12 = vsel %vm417_vm3, %v4590_v41, %v1752_v46  ;;  %v1154_v41 = vadd.f32 %v4856_v27, %v1153_v32  ;;  %v956_v30 = vadd.f32 %v4544_v8, %v912_v16  ;;  %v1196_v49 = vadd.f32 %v1195_v35, %v1152_v9 }
 0x295   : > { %v1870_v54 = vsel %vm1687_vm5, %v1857_v12, %v1752_v46  ;;  %v1393_v8 = vadd.f32 %v4856_v27, %v1392_v53  ;;  %v1439_v18 = vadd.f32 %v1438_v4, %v1395_v2  ;;  %v984_v35 = vpack.c.bf16 %v970_v3, %v970_v3 }
 0x296   : > { %2389 = vmatmul.bf16.gmra.mxu3 %v1975_v25  ;;  %v1198_v20 = vadd.f32 %v1197_v5, %v1154_v41  ;;  %v971_v40 = vmax.f32 %v956_v30, 0.0  ;;  %v1212_v48 = vmax.f32 %v1196_v49, 0.0  ;;  %v1775_v25 = vpop.permute.xlu2 %1774 }
 0x297   : > { %v1599_v26 = vpop.permute.xlu0 %1598  ;;  %v1437_v53 = vadd.f32 %v1436_v14, %v1393_v8  ;;  %v1454_v17 = vmax.f32 %v1439_v18, 0.0  ;;  %v1894_v5 = vsel %vm417_vm3, %v1775_v25, %v4742_v6 }
 0x298   : > { %v1684_v33 = vsel %vm417_vm3, %v1669_v50, %v1599_v26  ;;  %v1213_v43 = vmax.f32 %v1198_v20, 0.0  ;;  %v985_v15 = vpack.c.bf16 %v971_v40, %v971_v40  ;;  %v1226_v46 = vpack.c.bf16 %v1212_v48, %v1212_v48 }
 0x299   : > { %v1453_v26 = vmax.f32 %v1437_v53, 0.0  ;;  %v1468_v59 = vpack.c.bf16 %v1454_v17, %v1454_v17  ;;  %v1907_v49 = vsel %vm1687_vm5, %v1894_v5, %v4742_v6 }
 0x29a   : > { %2260 = vmatmul.bf16.gmra.mxu0 %v1870_v54  ;;  %v1227_v14 = vpack.c.bf16 %v1213_v43, %v1213_v43  ;;  %v1530_v54 = vunpack.c.l.b16 %v984_v35  ;;  %v1579_v62 = vunpack.c.l.b16 %v1226_v46 }
 0x29b   : > { %v1773_v61 = vpop.permute.xlu1 %1772  ;;  %v1467_v41 = vpack.c.bf16 %v1453_v26, %v1453_v26 }
 0x29c   : > { %v1892_v11 = vsel %vm417_vm3, %v1773_v61, %v4662_v10  ;;  %v1580_v9 = vunpack.c.l.b16 %v1227_v14  ;;  %v645_v14 = vmax.f32 %v4501_v45, 0.0 }
 0x29d   : > { %v1905_v52 = vsel %vm1687_vm5, %v1892_v11, %v4662_v10  ;;  %v1628_v0 = vunpack.c.l.b16 %v1467_v41 }
 0x29e   : > { %v1847_v30 = vpop.permute.xlu2 %1846 }
 0x29f   : > { %v1648_v57 = vpop.permute.xlu0 %1647  ;;  %v1966_v20 = vsel %vm417_vm3, %v1847_v30, %v4767_v44 }
 0x2a0   : > { %v4874_v31 = vsel %vm1687_vm5, %v1684_v33, %v1648_v57  ;;  %v1979_v57 = vsel %vm1687_vm5, %v1966_v20, %v4767_v44 }
 0x2a1   : > { %v1736_v29 = vshll.u32 %v4874_v31, 16  ;;  %v1740_v58 = vshrl.u32 %v4874_v31, 16  ;;  %v1822_v1 = vrot.slane %v4874_v31, 6 }
 0x2a2   : > { %2303 = vmatmul.bf16.gmra.mxu1 %v1905_v52  ;;  %2351 = vmatmul.bf16.gmra.mxu2 %v1942_v36 }
 0x2a3   : > { %v1845_v7 = vpop.permute.xlu1 %1844  ;;  %v4888_v19 = vsel %vm1812_vm6, %v1820_v34, %v1822_v1  ;;  %v1738_v24 = vrot.slane %v1736_v29, 1  ;;  %v1804_v63 = vrot.slane %v1740_v58, 5  ;;  %v1805_v10 = vrot.slane %v1736_v29, 6 }
 0x2a4   : > { %v1964_v47 = vsel %vm417_vm3, %v1845_v7, %v4675_v39  ;;  %1834 = vrot.lane.b32.xlu1 %v4888_v19, %s3937_s18  ;;  %v587_v7 = vadd.f32 %v4856_v27, %v4474_v42 }
 0x2a5   : > { %v1977_v22 = vsel %vm1687_vm5, %v1964_v47, %v4675_v39  ;;  %v4898_v51 = vsel %vm675_vm0, %v4748_v37, %v1738_v24  ;;  %v4900_v34 = vor.u32 %v1805_v10, %v1804_v63  ;;  %v4902_v21 = vor.u32 %v1740_v58, %v1738_v24 }
 0x2a6   : > { %2394 = vmatmul.bf16.gmra.mxu3 %v1977_v22  ;;  %1757 = vrot.lane.b32.xlu2 %v4898_v51, %s3937_s18  ;;  %v1531_v37 = vunpack.c.l.b16 %v985_v15 }
 0x2a7   : > { %v1754_v12 = vpop.permute.xlu0 %1753  ;;  %v1807_v39 = vsel %vm1784_vm7, %v4746_v28, %v4900_v34  ;;  %v1629_v28 = vunpack.c.l.b16 %v1468_v59 }
 0x2a8   : > { %v1859_v32 = vsel %vm417_vm3, %v4625_v38, %v1754_v12  ;;  %1848 = vrot.lane.b32.xlu0 %v1807_v39, %s3937_s18  ;;  %v1538_v61 = vpack.c.b16 %v1531_v37, %v1530_v54  ;;  %v1587_v38 = vpack.c.b16 %v1580_v9, %v1579_v62 }
 0x2a9   : > { %v1872_v16 = vsel %vm1687_vm5, %v1859_v32, %v1754_v12  ;;  %v1636_v4 = vpack.c.b16 %v1629_v28, %v1628_v0 }
 0x2aa   : > { %2265 = vmatmul.bf16.gmra.mxu0 %v1872_v16 }
 0x2ab   : > { %v1756_v33 = vpop.permute.xlu1 %1755 }
 0x2ac   : > { %1778 = vrot.lane.b32.xlu1 %v4729_v13, %s3937_s18 }
 0x2ae   : > { %1551 = vrot.lane.b32.xlu2 %v1538_v61, %s3938_s13 }
 0x2af   : > { %v1833_v2 = vpop.permute.xlu0 %1832 }
 0x2b0   : > { %v1931_v50 = vsel %vm417_vm3, %v4752_v60, %v1833_v2  ;;  %1600 = vrot.lane.b32.xlu0 %v1587_v38, %s3937_s18  ;;  %v1861_v60 = vsel %vm417_vm3, %v4665_v23, %v1756_v33 }
 0x2b1   : > { %v1944_v11 = vsel %vm1687_vm5, %v1931_v50, %v1833_v2  ;;  %v1874_v6 = vsel %vm1687_vm5, %v1861_v60, %v1756_v33 }
 0x2b2   : > { %2308 = vmatmul.bf16.gmra.mxu1 %v1907_v49  ;;  %2356 = vmatmul.bf16.gmra.mxu2 %v1944_v11 }
 0x2b4   : > { %1649 = vrot.lane.b32.xlu1 %v1636_v4, %s3939_s25 }
 0x2b6   : > { %2399 = vmatmul.bf16.gmra.mxu3 %v1979_v57 }
 0x2b7   : > { %v1777_v40 = vpop.permute.xlu0 %1776 }
 0x2b8   : > { %v1896_v8 = vsel %vm417_vm3, %v1777_v40, %v4755_v55 }
 0x2b9   : > { %v1909_v36 = vsel %vm1687_vm5, %v1896_v8, %v4755_v55  ;;  %v4944_v55 = vld [vmem:[%s5436_s4] ss:$0 sm:$0xff] }
 0x2ba   : > { %2270 = vmatmul.bf16.gmra.mxu0 %v1874_v6 }
 0x2c2   : > { %2313 = vmatmul.bf16.gmra.mxu1 %v1909_v36 }
 0x300   : > { %v1758_v29 = vpop.permute.xlu2 %1757 }
 0x301   : > { %v1863_v58 = vsel %vm417_vm3, %v4729_v13, %v1758_v29  ;;  %v631_v13 = vadd.f32 %v4505_v56, %v587_v7 }
 0x302   : > { %v1876_v44 = vsel %vm1687_vm5, %v1863_v58, %v1758_v29 }
 0x303   : > { %2275 = vmatmul.bf16.gmra.mxu0 %v1876_v44  ;;  %v646_v47 = vmax.f32 %v631_v13, 0.0 }
 0x305   : > { %v2342_v23 = vpop.f32.mrf.mxu2  ;;  %v660_v37 = vpack.c.bf16 %v646_v47, %v646_v47 }
 0x307   : > { %v2256_v52 = vpop.f32.mrf.mxu0  ;;  %v1496_v9 = vunpack.c.l.b16 %v660_v37 }
 0x308   : > { %v2257_v63 = vadd.f32 %v4944_v55, %v2256_v52  ;;  %v1552_v0 = vpop.permute.xlu2 %1551 }
 0x309   : > { %v2385_v3 = vpop.f32.mrf.mxu3 }
 0x30d   : > { %v2344_v18 = vpop.f32.mrf.mxu2 }
 0x30f   : > { %v2258_v48 = vpop.f32.mrf.mxu0  ;;  %v2299_v43 = vpop.f32.mrf.mxu1 }
 0x310   : > { %v2259_v10 = vadd.f32 %v4944_v55, %v2258_v48  ;;  %v2300_v22 = vadd.f32 %v2299_v43, %v2257_v63 }
 0x311   : > { %v2387_v24 = vpop.f32.mrf.mxu3 }
 0x312   : > { %v2343_v26 = vadd.f32 %v2342_v23, %v2300_v22 }
 0x314   : > { %v2386_v45 = vadd.f32 %v2385_v3, %v2343_v26 }
 0x315   : > { %v2347_v15 = vpop.f32.mrf.mxu2 }
 0x316   : > { %v1835_v53 = vpop.permute.xlu1 %1834  ;;  %v2419_v11 = vmax.f32 %v2386_v45, 0.0 }
 0x317   : > { %v1933_v35 = vsel %vm417_vm3, %v1807_v39, %v1835_v53  ;;  %v2261_v17 = vpop.f32.mrf.mxu0  ;;  %v2301_v42 = vpop.f32.mrf.mxu1  ;;  %v659_v39 = vpack.c.bf16 %v645_v14, %v645_v14 }
 0x318   : > { %v2302_v27 = vadd.f32 %v2301_v42, %v2259_v10  ;;  %v1946_v46 = vsel %vm1687_vm5, %v1933_v35, %v1835_v53  ;;  %v2262_v59 = vadd.f32 %v4944_v55, %v2261_v17  ;;  %v2432_v36 = vpack.c.bf16 %v2419_v11, %v2419_v11 }
 0x319   : > { %2361 = vmatmul.bf16.gmra.mxu2 %v1946_v46  ;;  %v2390_v25 = vpop.f32.mrf.mxu3  ;;  %v1495_v30 = vunpack.c.l.b16 %v659_v39 }
 0x31a   : > { %v2345_v56 = vadd.f32 %v2344_v18, %v2302_v27  ;;  %v1849_v12 = vpop.permute.xlu0 %1848  ;;  %v2455_v10 = vunpack.c.l.b16 %v2432_v36 }
 0x31b   : > { %v1968_v32 = vsel %vm417_vm3, %v1849_v12, %v4888_v19  ;;  %v1503_v49 = vpack.c.b16 %v1496_v9, %v1495_v30 }
 0x31c   : > { %v1981_v16 = vsel %vm1687_vm5, %v1968_v32, %v4888_v19  ;;  %v2388_v54 = vadd.f32 %v2387_v24, %v2345_v56 }
 0x31d   : > { %2404 = vmatmul.bf16.gmra.mxu3 %v1981_v16  ;;  %v2349_v19 = vpop.f32.mrf.mxu2  ;;  %v1672_v57 = vsel %vm1651_vm4, %v1503_v49, %v1552_v0 }
 0x31e   : > { %v1779_v62 = vpop.permute.xlu1 %1778  ;;  %v2420_v2 = vmax.f32 %v2388_v54, 0.0 }
 0x31f   : > { %v1898_v41 = vsel %vm417_vm3, %v1779_v62, %v4898_v51  ;;  %v2263_v61 = vpop.f32.mrf.mxu0  ;;  %v2304_v28 = vpop.f32.mrf.mxu1 }
 0x320   : > { %v2305_v5 = vadd.f32 %v2304_v28, %v2262_v59  ;;  %v1911_v38 = vsel %vm1687_vm5, %v1898_v41, %v4898_v51  ;;  %v2433_v60 = vpack.c.bf16 %v2420_v2, %v2420_v2  ;;  %v2264_v51 = vadd.f32 %v4944_v55, %v2263_v61 }
 0x321   : > { %2318 = vmatmul.bf16.gmra.mxu1 %v1911_v38  ;;  %v2392_v20 = vpop.f32.mrf.mxu3 }
 0x322   : > { %v2348_v50 = vadd.f32 %v2347_v15, %v2305_v5  ;;  %v1601_v4 = vpop.permute.xlu0 %1600  ;;  %v2456_v48 = vunpack.c.l.b16 %v2433_v60 }
 0x323   : > { %v1686_v40 = vsel %vm417_vm3, %v1672_v57, %v1601_v4 }
 0x324   : > { %v2391_v33 = vadd.f32 %v2390_v25, %v2348_v50  ;;  %v4991_v17 = vpack.c.b16 %v2456_v48, %v2455_v10 }
 0x325   : > { %v2352_v15 = vpop.f32.mrf.mxu2 }
 0x326   : > { %v2421_v6 = vmax.f32 %v2391_v33, 0.0  ;;  %v1650_v8 = vpop.permute.xlu1 %1649  ;;  %v2473_v16 = vshll.u32 %v4991_v17, 16  ;;  %v2471_v2 = vshrl.u32 %v4991_v17, 16 }
 0x327   : > { %v4965_v29 = vsel %vm1687_vm5, %v1686_v40, %v1650_v8  ;;  %v2266_v58 = vpop.f32.mrf.mxu0  ;;  %v2306_v44 = vpop.f32.mrf.mxu1 }
 0x328   : > { %v2434_v23 = vpack.c.bf16 %v2421_v6, %v2421_v6  ;;  %v1743_v52 = vshll.u32 %v4965_v29, 16  ;;  %v4969_v3 = vshrl.u32 %v4965_v29, 16  ;;  %v4972_v18 = vrot.slane %v4965_v29, 6 }
 0x329   : > { %v2307_v43 = vadd.f32 %v2306_v44, %v2264_v51  ;;  %v2395_v42 = vpop.f32.mrf.mxu3  ;;  %v2267_v46 = vadd.f32 %v4944_v55, %v2266_v58  ;;  %v2475_v61 = vrot.slane %v2473_v16, 1 }
 0x32a   : > { %v2457_v7 = vunpack.c.l.b16 %v2434_v23  ;;  %v4978_v24 = vsel %vm1812_vm6, %v1822_v1, %v4972_v18  ;;  %v1745_v13 = vrot.slane %v1743_v52, 1  ;;  %v4981_v63 = vrot.slane %v4969_v3, 5 }
 0x32b   : > { %v2350_v53 = vadd.f32 %v2349_v19, %v2307_v43  ;;  %1836 = vrot.lane.b32.xlu2 %v4978_v24, %s3937_s18  ;;  %v1809_v47 = vrot.slane %v1743_v52, 6 }
 0x32c   : > { %v4985_v22 = vpack.c.b16 %v2457_v7, %v2456_v48  ;;  %v4989_v35 = vsel %vm675_vm0, %v4902_v21, %v1745_v13 }
 0x32d   : > { %v2393_v1 = vadd.f32 %v2392_v20, %v2350_v53  ;;  %1759 = vrot.lane.b32.xlu0 %v4989_v35, %s3937_s18  ;;  %v1810_v27 = vor.u32 %v1809_v47, %v4981_v63  ;;  %v2354_v41 = vpop.f32.mrf.mxu2  ;;  %v2476_v20 = vor.u32 %v2475_v61, %v2471_v2 }
 0x32e   : > { %v2537_v14 = vshrl.u32 %v4985_v22, 16  ;;  %v2540_v25 = vshll.u32 %v4985_v22, 16 }
 0x32f   : > { %v2422_v56 = vmax.f32 %v2393_v1, 0.0  ;;  %v2268_v12 = vpop.f32.mrf.mxu0  ;;  %v2309_v37 = vpop.f32.mrf.mxu1  ;;  %v5001_v21 = vsel %vm1784_vm7, %v4900_v34, %v1810_v27 }
 0x330   : > { %v2310_v26 = vadd.f32 %v2309_v37, %v2267_v46  ;;  %1850 = vrot.lane.b32.xlu1 %v5001_v21, %s3937_s18  ;;  %v2539_v39 = vrot.slane %v2537_v14, 1  ;;  %v2542_v54 = vrot.slane %v2540_v25, 2  ;;  %v2269_v28 = vadd.f32 %v4944_v55, %v2268_v12 }
 0x331   : > { %v2435_v32 = vpack.c.bf16 %v2422_v56, %v2422_v56  ;;  %v2397_v38 = vpop.f32.mrf.mxu3 }
 0x332   : > { %v2353_v59 = vadd.f32 %v2352_v15, %v2310_v26  ;;  %v2543_v34 = vor.u32 %v2542_v54, %v2539_v39 }
 0x333   : > { %v2458_v62 = vunpack.c.l.b16 %v2435_v32  ;;  %1780 = vrot.lane.b32.xlu2 %v4874_v31, %s3937_s18 }
 0x334   : > { %v2396_v9 = vadd.f32 %v2395_v42, %v2353_v59 }
 0x335   : > { %v5012_v45 = vpack.c.b16 %v2458_v62, %v2457_v7  ;;  %1761 = vrot.lane.b32.xlu0 %v4969_v3, %s3937_s18  ;;  %v2357_v48 = vpop.f32.mrf.mxu2 }
 0x336   : > { %v2423_v5 = vmax.f32 %v2396_v9, 0.0 }
 0x337   : > { %v2311_v30 = vpop.f32.mrf.mxu1  ;;  %v2478_v19 = vshll.u32 %v5012_v45, 16  ;;  %v2482_v0 = vshrl.u32 %v5012_v45, 16  ;;  %v2271_v11 = vpop.f32.mrf.mxu0 }
 0x338   : > { %v2436_v50 = vpack.c.bf16 %v2423_v5, %v2423_v5  ;;  %v2312_v49 = vadd.f32 %v2311_v30, %v2269_v28  ;;  %1838 = vrot.lane.b32.xlu1 %v4972_v18, %s3937_s18  ;;  %v2272_v58 = vadd.f32 %v4944_v55, %v2271_v11 }
 0x339   : > { %v2480_v4 = vrot.slane %v2478_v19, 1  ;;  %v2643_v33 = vrot.slane %v2482_v0, 3  ;;  %v2644_v57 = vrot.slane %v2478_v19, 4  ;;  %v2400_v10 = vpop.f32.mrf.mxu3 }
 0x33a   : > { %v2459_v60 = vunpack.c.l.b16 %v2436_v50  ;;  %v2355_v6 = vadd.f32 %v2354_v41, %v2312_v49 }
 0x33b   : > { %v2481_v40 = vsel %vm675_vm0, %v2476_v20, %v2480_v4  ;;  %v2645_v8 = vor.u32 %v2644_v57, %v2643_v33  ;;  %v2484_v54 = vor.u32 %v2482_v0, %v2480_v4 }
 0x33c   : > { %v5023_v36 = vpack.c.b16 %v2459_v60, %v2458_v62  ;;  %v2398_v51 = vadd.f32 %v2397_v38, %v2355_v6  ;;  %2509 = vrot.lane.b32.xlu2 %v2481_v40, %s3937_s18 }
 0x33d   : > { %1852 = vrot.lane.b32.xlu0 %v4981_v63, %s3937_s18  ;;  %v2359_v61 = vpop.f32.mrf.mxu2 }
 0x33e   : > { %v2424_v44 = vmax.f32 %v2398_v51, 0.0  ;;  %v2545_v23 = vshrl.u32 %v5023_v36, 16  ;;  %v2548_v52 = vshll.u32 %v5023_v36, 16 }
 0x33f   : > { %v2314_v43 = vpop.f32.mrf.mxu1  ;;  %v2273_v42 = vpop.f32.mrf.mxu0 }
 0x340   : > { %v2437_v7 = vpack.c.bf16 %v2424_v44, %v2424_v44  ;;  %v2315_v13 = vadd.f32 %v2314_v43, %v2272_v58  ;;  %1782 = vrot.lane.b32.xlu1 %v4965_v29, %s3937_s18  ;;  %v2547_v15 = vrot.slane %v2545_v23, 1  ;;  %v2550_v53 = vrot.slane %v2548_v52, 2 }
 0x341   : > { %v2274_v37 = vadd.f32 %v4944_v55, %v2273_v42  ;;  %v2402_v30 = vpop.f32.mrf.mxu3 }
 0x342   : > { %v2460_v47 = vunpack.c.l.b16 %v2437_v7  ;;  %v2358_v1 = vadd.f32 %v2357_v48, %v2315_v13  ;;  %v2551_v27 = vor.u32 %v2550_v53, %v2547_v15  ;;  %v2604_v15 = vrot.slane %v2548_v52, 3 }
 0x344   : > { %v5033_v46 = vpack.c.b16 %v2460_v47, %v2459_v60  ;;  %v2401_v56 = vadd.f32 %v2400_v10, %v2358_v1  ;;  %v5036_v12 = vsel %vm1035_vm1, %v2543_v34, %v2551_v27  ;;  %v2603_v10 = vrot.slane %v2545_v23, 2 }
 0x345   : > { %v2601_v1 = vrot.slane %v2540_v25, 3  ;;  %v3869_v25 = vld [vmem:[%s5437_s5 + $0x38] sm:$0xff] }
 0x346   : > { %v2425_v26 = vmax.f32 %v2401_v56, 0.0  ;;  %v2486_v32 = vshll.u32 %v5033_v46, 16  ;;  %v2490_v16 = vshrl.u32 %v5033_v46, 16  ;;  %3058 = vmatpush.bf16.msrb.mxu0 %v3869_v25 }
 0x347   : > { %v2316_v39 = vpop.f32.mrf.mxu1 }
 0x348   : > { %v2438_v59 = vpack.c.bf16 %v2425_v26, %v2425_v26  ;;  %v2317_v62 = vadd.f32 %v2316_v39, %v2274_v37  ;;  %v2488_v9 = vrot.slane %v2486_v32, 1  ;;  %v2646_v41 = vrot.slane %v2490_v16, 3  ;;  %v3868_v39 = vld [vmem:[%s5437_s5 + $0x30] sm:$0xff] }
 0x349   : > { %v2647_v28 = vrot.slane %v2486_v32, 4 }
 0x34a   : > { %v2461_v5 = vunpack.c.l.b16 %v2438_v59  ;;  %v2360_v38 = vadd.f32 %v2359_v61, %v2317_v62  ;;  %v2489_v34 = vsel %vm675_vm0, %v2484_v54, %v2488_v9  ;;  %v2492_v44 = vor.u32 %v2490_v16, %v2488_v9  ;;  %3059 = vmatpush.bf16.msrb.mxu0 %v3868_v39  ;;  %v3867_v59 = vld [vmem:[%s5437_s5 + $0x28] sm:$0xff]  ;;  %v3865_v61 = vld [vmem:[%s5437_s5 + $0x18] sm:$0xff] }
 0x34b   : > { %2511 = vrot.lane.b32.xlu2 %v2489_v34, %s3937_s18  ;;  %v2648_v2 = vor.u32 %v2647_v28, %v2646_v41  ;;  %v3864_v28 = vld [vmem:[%s5437_s5 + $0x10] sm:$0xff] }
 0x34c   : > { %v5043_v19 = vpack.c.b16 %v2461_v5, %v2460_v47  ;;  %v2403_v50 = vadd.f32 %v2402_v30, %v2360_v38  ;;  %v2600_v47 = vrot.slane %v2537_v14, 2  ;;  %v3884_v34 = vld [vmem:[%s5437_s5 + $0xb0] sm:$0xff]  ;;  %v3862_v30 = vld [vmem:[%s5437_s5] sm:$0xff] }
 0x34d   : > { %v5046_v0 = vsel %vm2642_vm8, %v2645_v8, %v2648_v2 }
 0x34e   : > { %v2426_v49 = vmax.f32 %v2403_v50, 0.0  ;;  %v2554_v11 = vshrl.u32 %v5043_v19, 16  ;;  %v2557_v20 = vshll.u32 %v5043_v19, 16  ;;  %v2602_v56 = vor.u32 %v2601_v1, %v2600_v47  ;;  %3060 = vmatpush.bf16.msrb.mxu0 %v3867_v59  ;;  %v3883_v50 = vld [vmem:[%s5437_s5 + $0xa8] sm:$0xff]  ;;  %v3882_v47 = vld [vmem:[%s5437_s5 + $0xa0] sm:$0xff] }
 0x350   : > { %v5050_v4 = vpack.c.bf16 %v2426_v49, %v2426_v49  ;;  %v2556_v33 = vrot.slane %v2554_v11, 1  ;;  %v2559_v57 = vrot.slane %v2557_v20, 2  ;;  %v2607_v52 = vrot.slane %v2554_v11, 2 }
 0x351   : > { %v2608_v37 = vrot.slane %v2557_v20, 3 }
 0x352   : > { %v2462_v60 = vunpack.c.l.b16 %v5050_v4  ;;  %v5053_v6 = vor.u32 %v2559_v57, %v2556_v33 }
 0x353   : > { %v5084_v26 = vor.u32 %v2608_v37, %v2607_v52 }
 0x354   : > { %v5057_v40 = vpack.c.b16 %v2462_v60, %v2461_v5  ;;  %v5061_v8 = vsel %vm1035_vm1, %v2551_v27, %v5053_v6  ;;  %v2605_v27 = vor.u32 %v2604_v15, %v2603_v10  ;;  %v3885_v5 = vld [vmem:[%s5437_s5 + $0xb8] sm:$0xff] }
 0x355   : > { %3126 = vmatpush.bf16.msra.mxu2 %v3885_v5 }
 0x356   : > { %v2494_v51 = vshll.u32 %v5057_v40, 16  ;;  %v2498_v58 = vshrl.u32 %v5057_v40, 16  ;;  %v2606_v23 = vsel %vm2599_vm9, %v2602_v56, %v2605_v27  ;;  %v2610_v14 = vsel %vm2599_vm9, %v2605_v27, %v5084_v26  ;;  %v3881_v56 = vld [vmem:[%s5437_s5 + $0x98] sm:$0xff] }
 0x358   : > { %v5065_v48 = vrot.slane %v2494_v51, 1  ;;  %v2650_v43 = vrot.slane %v2498_v58, 3  ;;  %v2651_v7 = vrot.slane %v2494_v51, 4 }
 0x359   : > { %3127 = vmatpush.bf16.msra.mxu2 %v3884_v34 }
 0x35a   : > { %v2497_v13 = vsel %vm675_vm0, %v2492_v44, %v5065_v48  ;;  %v5071_v53 = vor.u32 %v2651_v7, %v2650_v43 }
 0x35b   : > { %2513 = vrot.lane.b32.xlu0 %v2497_v13, %s3937_s18 }
 0x35c   : > { %v5080_v42 = vsel %vm2642_vm8, %v2648_v2, %v5071_v53 }
 0x35d   : > { %3128 = vmatpush.bf16.msra.mxu2 %v3883_v50 }
 0x361   : > { %3129 = vmatpush.bf16.msra.mxu2 %v3882_v47  ;;  %v3876_v47 = vld [vmem:[%s5437_s5 + $0x70] sm:$0xff] }
 0x363   : > { %2619 = vrot.lane.b32.xlu0 %v2606_v23, %s3937_s18 }
 0x365   : > { %3130 = vmatpush.bf16.msra.mxu2 %v3881_v56 }
 0x36b   : > { %2621 = vrot.lane.b32.xlu0 %v2610_v14, %s3937_s18 }
 0x380   : > { %v2276_v38 = vpop.f32.mrf.mxu0 }
 0x381   : > { %v2277_v2 = vadd.f32 %v4944_v55, %v2276_v38 }
 0x385   : > { %v1837_v32 = vpop.permute.xlu2 %1836 }
 0x386   : > { %v1935_v16 = vsel %vm417_vm3, %v5001_v21, %v1837_v32  ;;  %v3866_v21 = vld [vmem:[%s5437_s5 + $0x20] sm:$0xff] }
 0x387   : > { %v1948_v54 = vsel %vm1687_vm5, %v1935_v16, %v1837_v32  ;;  %3061 = vmatpush.bf16.msrb.mxu0 %v3866_v21 }
 0x388   : > { %2366 = vmatmul.bf16.gmra.mxu2 %v1948_v54  ;;  %v2278_v7 = vpop.f32.mrf.mxu0 }
 0x389   : > { %v2279_v1 = vadd.f32 %v4944_v55, %v2278_v7 }
 0x38b   : > { %3062 = vmatpush.bf16.msrb.mxu0 %v3865_v61 }
 0x38d   : > { %v1781_v62 = vpop.permute.xlu2 %1780 }
 0x38e   : > { %v1900_v9 = vsel %vm417_vm3, %v1781_v62, %v4989_v35 }
 0x38f   : > { %v1913_v41 = vsel %vm1687_vm5, %v1900_v9, %v4989_v35  ;;  %3063 = vmatpush.bf16.msrb.mxu0 %v3864_v28  ;;  %v3863_v35 = vld [vmem:[%s5437_s5 + $0x8] sm:$0xff]  ;;  %v3880_v9 = vld [vmem:[%s5437_s5 + $0x90] sm:$0xff] }
 0x390   : > { %2323 = vmatmul.bf16.gmra.mxu1 %v1913_v41  ;;  %3131 = vmatpush.bf16.msra.mxu2 %v3880_v9  ;;  %v3872_v9 = vld [vmem:[%s5437_s5 + $0x50] sm:$0xff] }
 0x393   : > { %3064 = vmatpush.bf16.msrb.mxu0 %v3863_v35 }
 0x397   : > { %3065 = vmatpush.bf16.msrb.mxu0 %v3862_v30 }
 0x39c   : > { %v2362_v49 = vpop.f32.mrf.mxu2 }
 0x39e   : > { %v2319_v11 = vpop.f32.mrf.mxu1 }
 0x39f   : > { %v2320_v20 = vadd.f32 %v2319_v11, %v2277_v2  ;;  %v1760_v33 = vpop.permute.xlu0 %1759 }
 0x3a0   : > { %v1865_v57 = vsel %vm417_vm3, %v4874_v31, %v1760_v33  ;;  %v2405_v51 = vpop.f32.mrf.mxu3 }
 0x3a1   : > { %v2363_v44 = vadd.f32 %v2362_v49, %v2320_v20  ;;  %v1878_v43 = vsel %vm1687_vm5, %v1865_v57, %v1760_v33  ;;  %v3878_v33 = vld [vmem:[%s5437_s5 + $0x80] sm:$0xff] }
 0x3a2   : > { %v1851_v13 = vpop.permute.xlu1 %1850  ;;  %2280 = vmatmul.bf16.gmra.mxu0 %v1878_v43 }
 0x3a3   : > { %v2406_v10 = vadd.f32 %v2405_v51, %v2363_v44  ;;  %v1970_v15 = vsel %vm417_vm3, %v1851_v13, %v4978_v24 }
 0x3a4   : > { %v1983_v31 = vsel %vm1687_vm5, %v1970_v15, %v4978_v24  ;;  %v2364_v25 = vpop.f32.mrf.mxu2 }
 0x3a5   : > { %v2427_v27 = vmax.f32 %v2406_v10, 0.0  ;;  %2409 = vmatmul.bf16.gmra.mxu3 %v1983_v31 }
 0x3a6   : > { %v2321_v23 = vpop.f32.mrf.mxu1 }
 0x3a7   : > { %v2440_v52 = vpack.c.bf16 %v2427_v27, %v2427_v27  ;;  %v2322_v37 = vadd.f32 %v2321_v23, %v2279_v1  ;;  %v1762_v14 = vpop.permute.xlu0 %1761  ;;  %v3875_v27 = vld [vmem:[%s5437_s5 + $0x68] sm:$0xff] }
 0x3a8   : > { %v2407_v39 = vpop.f32.mrf.mxu3  ;;  %v1867_v4 = vsel %vm417_vm3, %v4965_v29, %v1762_v14 }
 0x3a9   : > { %v2463_v32 = vunpack.c.l.b16 %v2440_v52  ;;  %v2365_v16 = vadd.f32 %v2364_v25, %v2322_v37  ;;  %v1880_v2 = vsel %vm1687_vm5, %v1867_v4, %v1762_v14  ;;  %v2590_v14 = vrot.slane %v4985_v22, 2  ;;  %v3874_v22 = vld [vmem:[%s5437_s5 + $0x60] sm:$0xff]  ;;  %v3891_v4 = vld [vmem:[%s5437_s5 + $0xe8] sm:$0xff] }
 0x3aa   : > { %v1839_v54 = vpop.permute.xlu1 %1838 }
 0x3ab   : > { %v5146_v24 = vpack.c.b16 %v2463_v32, %v2462_v60  ;;  %v2408_v59 = vadd.f32 %v2407_v39, %v2365_v16  ;;  %v1937_v62 = vsel %vm417_vm3, %v4981_v63, %v1839_v54  ;;  %v3879_v63 = vld [vmem:[%s5437_s5 + $0x88] sm:$0xff]  ;;  %v2593_v39 = vrot.slane %v5043_v19, 2 }
 0x3ac   : > { %v1950_v21 = vsel %vm1687_vm5, %v1937_v62, %v1839_v54  ;;  %3132 = vmatpush.bf16.msra.mxu2 %v3879_v63  ;;  %v3873_v62 = vld [vmem:[%s5437_s5 + $0x58] sm:$0xff]  ;;  %v3890_v63 = vld [vmem:[%s5437_s5 + $0xe0] sm:$0xff] }
 0x3ad   : > { %v2428_v41 = vmax.f32 %v2408_v59, 0.0  ;;  %2371 = vmatmul.bf16.gmra.mxu2 %v1950_v21  ;;  %v2563_v61 = vshrl.u32 %v5146_v24, 16  ;;  %v2566_v28 = vshll.u32 %v5146_v24, 16  ;;  %v3893_v21 = vld [vmem:[%s5437_s5 + $0xf8] sm:$0xff] }
 0x3ae   : > { %3160 = vmatpush.bf16.msrb.mxu3 %v3893_v21  ;;  %v2634_v21 = vrot.slane %v5033_v46, 3 }
 0x3af   : > { %v5161_v60 = vpack.c.bf16 %v2428_v41, %v2428_v41  ;;  %v1853_v5 = vpop.permute.xlu0 %1852  ;;  %v2611_v38 = vrot.slane %v2563_v61, 2  ;;  %v2612_v35 = vrot.slane %v2566_v28, 3  ;;  %v2565_v31 = vrot.slane %v2563_v61, 1  ;;  %v3871_v41 = vld [vmem:[%s5437_s5 + $0x48] sm:$0xff]  ;;  %v3892_v61 = vld [vmem:[%s5437_s5 + $0xf0] sm:$0xff] }
 0x3b0   : > { %v1972_v30 = vsel %vm417_vm3, %v1853_v5, %v4972_v18  ;;  %3133 = vmatpush.bf16.msra.mxu2 %v3878_v33  ;;  %v3889_v5 = vld [vmem:[%s5437_s5 + $0xd8] sm:$0xff] }
 0x3b1   : > { %v2464_v34 = vunpack.c.l.b16 %v5161_v60  ;;  %v5167_v50 = vor.u32 %v2612_v35, %v2611_v38  ;;  %v1985_v51 = vsel %vm1687_vm5, %v1972_v30, %v4972_v18  ;;  %v3888_v38 = vld [vmem:[%s5437_s5 + $0xd0] sm:$0xff]  ;;  %v3887_v35 = vld [vmem:[%s5437_s5 + $0xc8] sm:$0xff]  ;;  %v3886_v30 = vld [vmem:[%s5437_s5 + $0xc0] sm:$0xff] }
 0x3b2   : > { %v1783_v29 = vpop.permute.xlu1 %1782  ;;  %2285 = vmatmul.bf16.gmra.mxu0 %v1880_v2  ;;  %3161 = vmatpush.bf16.msrb.mxu3 %v3892_v61 }
 0x3b3   : > { %v5171_v49 = vpack.c.b16 %v2464_v34, %v2463_v32  ;;  %v1902_v11 = vsel %vm417_vm3, %v1783_v29, %v4969_v3  ;;  %v2614_v20 = vsel %vm2599_vm9, %v5084_v26, %v5167_v50  ;;  %v2500_v26 = vor.u32 %v2498_v58, %v5065_v48  ;;  %v3877_v58 = vld [vmem:[%s5437_s5 + $0x78] sm:$0xff] }
 0x3b4   : > { %2623 = vrot.lane.b32.xlu0 %v2614_v20, %s3937_s18  ;;  %v1915_v57 = vsel %vm1687_vm5, %v1902_v11, %v4969_v3  ;;  %v2510_v3 = vpop.permute.xlu2 %2509  ;;  %3092 = vmatpush.bf16.msra.mxu1 %v3877_v58  ;;  %v2521_v29 = vrot.slane %v5012_v45, 1  ;;  %v2520_v11 = vrot.slane %v4991_v17, 1 }
 0x3b5   : > { %2328 = vmatmul.bf16.gmra.mxu1 %v1915_v57  ;;  %2414 = vmatmul.bf16.gmra.mxu3 %v1985_v51  ;;  %v2502_v44 = vshll.u32 %v5171_v49, 16  ;;  %v2506_v7 = vshrl.u32 %v5171_v49, 16  ;;  %v2681_v18 = vsel %vm417_vm3, %v4991_v17, %v2510_v3  ;;  %v3896_v17 = vld [vmem:[%s5437_s5 + $0x110] sm:$0xff] }
 0x3b6   : > { %3162 = vmatpush.bf16.msrb.mxu3 %v3891_v4  ;;  %v2522_v20 = vsel %vm2519_vm10, %v2520_v11, %v2521_v29  ;;  %v2633_v4 = vrot.slane %v5012_v45, 3 }
 0x3b7   : > { %v2504_v43 = vrot.slane %v2502_v44, 1  ;;  %v2654_v48 = vrot.slane %v2506_v7, 3  ;;  %v2655_v15 = vrot.slane %v2502_v44, 4 }
 0x3b8   : > { %3093 = vmatpush.bf16.msra.mxu1 %v3876_v47  ;;  %v3895_v47 = vld [vmem:[%s5437_s5 + $0x108] sm:$0xff] }
 0x3b9   : > { %v2505_v13 = vsel %vm675_vm0, %v2500_v26, %v2504_v43  ;;  %v2508_v10 = vor.u32 %v2506_v7, %v2504_v43  ;;  %v5210_v1 = vor.u32 %v2655_v15, %v2654_v48  ;;  %v3897_v26 = vld [vmem:[%s5437_s5 + $0x118] sm:$0xff] }
 0x3ba   : > { %2515 = vrot.lane.b32.xlu1 %v2505_v13, %s3937_s18  ;;  %3163 = vmatpush.bf16.msrb.mxu3 %v3890_v63  ;;  %v2595_v13 = vrot.slane %v5146_v24, 2 }
 0x3bb   : > { %2517 = vrot.lane.b32.xlu2 %v2508_v10, %s3937_s18  ;;  %3198 = vmatpush.bf16.msra.mxu0 %v3897_v26 }
 0x3bc   : > { %v2512_v56 = vpop.permute.xlu2 %2511  ;;  %3094 = vmatpush.bf16.msra.mxu1 %v3875_v27 }
 0x3bd   : > { %v2684_v52 = vsel %vm417_vm3, %v5012_v45, %v2512_v56  ;;  %v2523_v56 = vrot.slane %v5033_v46, 1 }
 0x3be   : > { %3164 = vmatpush.bf16.msrb.mxu3 %v3889_v5 }
 0x3bf   : > { %3199 = vmatpush.bf16.msra.mxu0 %v3896_v17 }
 0x3c0   : > { %3095 = vmatpush.bf16.msra.mxu1 %v3874_v22 }
 0x3c2   : > { %2667 = vrot.lane.b32.xlu1 %v5046_v0, %s3937_s18  ;;  %3066 = vmatmul.bf16.vlgmr.msrb.gmra.mxu0 %v2681_v18  ;;  %v2568_v0 = vrot.slane %v2566_v28, 2  ;;  %v3870_v28 = vld [vmem:[%s5437_s5 + $0x40] sm:$0xff]  ;;  %v2596_v18 = vsel %vm1295_vm2, %v2593_v39, %v2595_v13 }
 0x3c3   : > { %2580 = vrot.lane.b32.xlu2 %v5036_v12, %s3937_s18  ;;  %3165 = vmatpush.bf16.msrb.mxu3 %v3888_v38 }
 0x3c4   : > { %v5215_v23 = vor.u32 %v2568_v0, %v2565_v31  ;;  %3096 = vmatpush.bf16.msra.mxu1 %v3873_v62  ;;  %3200 = vmatpush.bf16.msra.mxu0 %v3895_v47 }
 0x3c6   : > { %v2570_v37 = vsel %vm1035_vm1, %v5053_v6, %v5215_v23 }
 0x3c7   : > { %3166 = vmatpush.bf16.msrb.mxu3 %v3887_v35 }
 0x3c8   : > { %3097 = vmatpush.bf16.msra.mxu1 %v3872_v9 }
 0x3ca   : > { %2669 = vrot.lane.b32.xlu1 %v5080_v42, %s3937_s18  ;;  %v2657_v42 = vsel %vm2642_vm8, %v5071_v53, %v5210_v1 }
 0x3cb   : > { %2582 = vrot.lane.b32.xlu2 %v5061_v8, %s3937_s18  ;;  %v2591_v8 = vrot.slane %v5023_v36, 2  ;;  %3167 = vmatpush.bf16.msrb.mxu3 %v3886_v30 }
 0x3cc   : > { %3098 = vmatpush.bf16.msra.mxu1 %v3871_v41 }
 0x3cd   : > { %v2514_v12 = vpop.permute.xlu0 %2513  ;;  %v2592_v25 = vsel %vm1295_vm2, %v2590_v14, %v2591_v8  ;;  %v2594_v59 = vsel %vm1295_vm2, %v2591_v8, %v2593_v39 }
 0x3ce   : > { %v2687_v16 = vsel %vm417_vm3, %v5033_v46, %v2514_v12 }
 0x3d0   : > { %3099 = vmatpush.bf16.msra.mxu1 %v3870_v28 }
 0x3d2   : > { %2671 = vrot.lane.b32.xlu1 %v2657_v42, %s3937_s18  ;;  %3071 = vmatmul.bf16.gmra.mxu0 %v2684_v52  ;;  %v3894_v52 = vld [vmem:[%s5437_s5 + $0x100] sm:$0xff] }
 0x3d3   : > { %2584 = vrot.lane.b32.xlu2 %v2570_v37, %s3937_s18  ;;  %3201 = vmatpush.bf16.msra.mxu0 %v3894_v52 }
 0x3d5   : > { %v2620_v53 = vpop.permute.xlu0 %2619 }
 0x3d6   : > { %v2717_v32 = vsel %vm417_vm3, %v2592_v25, %v2620_v53 }
 0x3d7   : > { %3134 = vmatmul.bf16.vlgmr.msra.gmra.mxu2 %v2717_v32 }
 0x3dd   : > { %v2622_v54 = vpop.permute.xlu0 %2621 }
 0x3de   : > { %v2721_v6 = vsel %vm417_vm3, %v2594_v59, %v2622_v54 }
 0x3e2   : > { %3076 = vmatmul.bf16.gmra.mxu0 %v2687_v16  ;;  %v2524_v16 = vsel %vm2519_vm10, %v2521_v29, %v2523_v56 }
 0x3e7   : > { %3139 = vmatmul.bf16.gmra.mxu2 %v2721_v6 }
 0x40b   : > { %v2367_v57 = vpop.f32.mrf.mxu2 }
 0x40d   : > { %v2324_v43 = vpop.f32.mrf.mxu1 }
 0x413   : > { %v2369_v31 = vpop.f32.mrf.mxu2 }
 0x415   : > { %v5275_v2 = vpop.permute.xlu2 %2517  ;;  %v2326_v42 = vpop.f32.mrf.mxu1 }
 0x41d   : > { %v2581_v33 = vpop.permute.xlu2 %2580 }
 0x41e   : > { %v2697_v51 = vsel %vm417_vm3, %v2522_v20, %v2581_v33 }
 0x41f   : > { %v2281_v44 = vpop.f32.mrf.mxu0  ;;  %3100 = vmatmul.bf16.vlgmr.msra.gmra.mxu1 %v2697_v51 }
 0x420   : > { %v2282_v7 = vadd.f32 %v4944_v55, %v2281_v44 }
 0x422   : > { %v2325_v10 = vadd.f32 %v2324_v43, %v2282_v7  ;;  %v2525_v7 = vrot.slane %v5057_v40, 1 }
 0x424   : > { %v2368_v48 = vadd.f32 %v2367_v57, %v2325_v10 }
 0x425   : > { %v2583_v8 = vpop.permute.xlu2 %2582 }
 0x426   : > { %v2624_v3 = vpop.permute.xlu0 %2623  ;;  %v2701_v39 = vsel %vm417_vm3, %v2524_v16, %v2583_v8 }
 0x427   : > { %v2283_v58 = vpop.f32.mrf.mxu0  ;;  %v2725_v15 = vsel %vm417_vm3, %v2596_v18, %v2624_v3 }
 0x428   : > { %v2284_v0 = vadd.f32 %v4944_v55, %v2283_v58  ;;  %v2410_v12 = vpop.f32.mrf.mxu3  ;;  %3144 = vmatmul.bf16.gmra.mxu2 %v2725_v15 }
 0x429   : > { %v2411_v27 = vadd.f32 %v2410_v12, %v2368_v48 }
 0x42a   : > { %v2327_v37 = vadd.f32 %v2326_v42, %v2284_v0  ;;  %v2526_v0 = vsel %vm2519_vm10, %v2523_v56, %v2525_v7 }
 0x42b   : > { %v2429_v14 = vmax.f32 %v2411_v27, 0.0 }
 0x42c   : > { %v2516_v25 = vpop.permute.xlu1 %2515  ;;  %v2370_v6 = vadd.f32 %v2369_v31, %v2327_v37 }
 0x42d   : > { %v2442_v53 = vpack.c.bf16 %v2429_v14, %v2429_v14  ;;  %v2690_v32 = vsel %vm417_vm3, %v5057_v40, %v2516_v25  ;;  %v2585_v48 = vpop.permute.xlu2 %2584  ;;  %v2636_v14 = vrot.slane %v5057_v40, 3  ;;  %v2638_v40 = vrot.slane %v5171_v49, 3 }
 0x42e   : > { %3081 = vmatmul.bf16.gmra.mxu0 %v2690_v32 }
 0x42f   : > { %v2530_v54 = vunpack.c.l.b16 %v2442_v53  ;;  %v2286_v59 = vpop.f32.mrf.mxu0  ;;  %3105 = vmatmul.bf16.gmra.mxu1 %v2701_v39  ;;  %v2639_v16 = vsel %vm2632_vm11, %v2636_v14, %v2638_v40 }
 0x430   : > { %v2287_v22 = vadd.f32 %v4944_v55, %v2286_v59  ;;  %v2372_v62 = vpop.f32.mrf.mxu2  ;;  %v2412_v9 = vpop.f32.mrf.mxu3  ;;  %v2635_v55 = vsel %vm2632_vm11, %v2633_v4, %v2634_v21 }
 0x431   : > { %v5309_v41 = vpack.c.b16 %v2530_v54, %v2464_v34  ;;  %v2413_v61 = vadd.f32 %v2412_v9, %v2370_v6 }
 0x432   : > { %v2329_v28 = vpop.f32.mrf.mxu1 }
 0x433   : > { %v2430_v63 = vmax.f32 %v2413_v61, 0.0  ;;  %v2330_v5 = vadd.f32 %v2329_v28, %v2287_v22  ;;  %v2572_v38 = vshrl.u32 %v5309_v41, 16  ;;  %v2575_v35 = vshll.u32 %v5309_v41, 16 }
 0x434   : > { %v2668_v30 = vpop.permute.xlu1 %2667  ;;  %v2527_v22 = vrot.slane %v5171_v49, 1 }
 0x435   : > { %v2443_v29 = vpack.c.bf16 %v2430_v63, %v2430_v63  ;;  %v2737_v46 = vsel %vm417_vm3, %v2635_v55, %v2668_v30  ;;  %v2373_v60 = vadd.f32 %v2372_v62, %v2330_v5  ;;  %v2615_v34 = vrot.slane %v2572_v38, 2 }
 0x436   : > { %3168 = vmatmul.bf16.vlgmr.msrb.gmra.mxu3 %v2737_v46  ;;  %v2616_v11 = vrot.slane %v2575_v35, 3  ;;  %v2574_v20 = vrot.slane %v2572_v38, 1  ;;  %v2577_v33 = vrot.slane %v2575_v35, 2  ;;  %v2528_v9 = vsel %vm2519_vm10, %v2525_v7, %v2527_v22 }
 0x437   : > { %v2630_v57 = vunpack.c.l.b16 %v2443_v29  ;;  %v2288_v45 = vpop.f32.mrf.mxu0  ;;  %v2597_v63 = vrot.slane %v5309_v41, 2 }
 0x438   : > { %v2374_v51 = vpop.f32.mrf.mxu2  ;;  %v2415_v44 = vpop.f32.mrf.mxu3  ;;  %v2617_v26 = vor.u32 %v2616_v11, %v2615_v34  ;;  %v2578_v43 = vor.u32 %v2577_v33, %v2574_v20 }
 0x439   : > { %v5317_v10 = vpack.c.b16 %v2630_v57, %v2530_v54  ;;  %v2416_v17 = vadd.f32 %v2415_v44, %v2373_v60 }
 0x43a   : > { %v2331_v3 = vpop.f32.mrf.mxu1  ;;  %v2618_v18 = vsel %vm2599_vm9, %v5167_v50, %v2617_v26  ;;  %v2579_v58 = vsel %vm1035_vm1, %v5215_v23, %v2578_v43  ;;  %v2693_v50 = vsel %vm417_vm3, %v5171_v49, %v5275_v2  ;;  %v2705_v23 = vsel %vm417_vm3, %v2526_v0, %v2585_v48 }
 0x43b   : > { %v2659_v15 = vshrl.u32 %v5317_v10, 16  ;;  %v2662_v47 = vshll.u32 %v5317_v10, 16  ;;  %v2431_v31 = vmax.f32 %v2416_v17, 0.0  ;;  %2625 = vrot.lane.b32.xlu0 %v2618_v18, %s3937_s18  ;;  %2586 = vrot.lane.b32.xlu2 %v2579_v58, %s3937_s18  ;;  %v2637_v2 = vsel %vm2632_vm11, %v2634_v21, %v2636_v14 }
 0x43c   : > { %v2670_v53 = vpop.permute.xlu1 %2669  ;;  %v2598_v49 = vsel %vm1295_vm2, %v2595_v13, %v2597_v63  ;;  %v2640_v55 = vrot.slane %v5317_v10, 3  ;;  %v5380_v13 = vld [vmem:[%s5438_s6] ss:$0 sm:$0xff] }
 0x43d   : > { %v2444_v12 = vpack.c.bf16 %v2431_v31, %v2431_v31  ;;  %v2661_v27 = vrot.slane %v2659_v15, 3  ;;  %v2664_v42 = vrot.slane %v2662_v47, 4  ;;  %v2741_v32 = vsel %vm417_vm3, %v2637_v2, %v2670_v53 }
 0x43e   : > { %3086 = vmatmul.bf16.gmra.mxu0 %v2693_v50  ;;  %v2641_v46 = vsel %vm2632_vm11, %v2638_v40, %v2640_v55 }
 0x43f   : > { %v2678_v52 = vunpack.c.l.b16 %v2444_v12  ;;  %3110 = vmatmul.bf16.gmra.mxu1 %v2705_v23  ;;  %v2665_v8 = vor.u32 %v2664_v42, %v2661_v27  ;;  %v3067_v54 = vpop.f32.mrf.mxu0 }
 0x440   : > { %v2417_v37 = vpop.f32.mrf.mxu3  ;;  %v3068_v45 = vadd.f32 %v5380_v13, %v3067_v54 }
 0x441   : > { %v2679_v25 = vpack.c.b16 %v2678_v52, %v2630_v57  ;;  %v2666_v56 = vsel %vm2642_vm8, %v5210_v1, %v2665_v8 }
 0x442   : > { %2673 = vrot.lane.b32.xlu1 %v2666_v56, %s3937_s18 }
 0x443   : > { %2627 = vrot.lane.b32.xlu0 %v2617_v26, %s3937_s18  ;;  %2588 = vrot.lane.b32.xlu2 %v2578_v43, %s3937_s18 }
 0x444   : > { %v2672_v1 = vpop.permute.xlu1 %2671 }
 0x445   : > { %v2745_v39 = vsel %vm417_vm3, %v2639_v16, %v2672_v1 }
 0x446   : > { %3173 = vmatmul.bf16.gmra.mxu3 %v2741_v32 }
 0x447   : > { %v3069_v59 = vpop.f32.mrf.mxu0 }
 0x448   : > { %v3070_v3 = vadd.f32 %v5380_v13, %v3069_v59 }
 0x44a   : > { %2675 = vrot.lane.b32.xlu1 %v2665_v8, %s3937_s18 }
 0x44e   : > { %3778 = vmatmul.msk.bf16.vlgmr.msra.gmra.mxu0 %vm417_vm3, %v5023_v36 }
 0x44f   : > { %v3072_v36 = vpop.f32.mrf.mxu0 }
 0x450   : > { %v3073_v27 = vadd.f32 %v5380_v13, %v3072_v36 }
 0x456   : > { %3178 = vmatmul.bf16.gmra.mxu3 %v2745_v39 }
 0x457   : > { %v5353_v6 = vpop.f32.mrf.mxu0 }
 0x458   : > { %v3075_v2 = vadd.f32 %v5380_v13, %v5353_v6 }
 0x45a   : > { %v3135_v33 = vpop.f32.mrf.mxu2 }
 0x45e   : > { %3779 = vmatmul.msk.bf16.gmra.mxu0 %vm417_vm3, %v5043_v19 }
 0x45f   : > { %v5358_v21 = vpop.f32.mrf.mxu0 }
 0x462   : > { %v3137_v17 = vpop.f32.mrf.mxu2 }
 0x467   : > { %v5360_v61 = vpop.f32.mrf.mxu0 }
 0x46a   : > { %v3140_v23 = vpop.f32.mrf.mxu2 }
 0x46e   : > { %3780 = vmatmul.msk.bf16.gmra.mxu0 %vm417_vm3, %v5146_v24 }
 0x472   : > { %v3142_v54 = vpop.f32.mrf.mxu2 }
 0x47e   : > { %3781 = vmatmul.msk.bf16.gmra.mxu0 %vm417_vm3, %v5309_v41 }
 0x48e   : > { %3782 = vmatmul.msk.bf16.gmra.mxu0 %vm417_vm3, %v2679_v25 }
 0x495   : > { %v2587_v62 = vpop.permute.xlu2 %2586 }
 0x496   : > { %v2709_v19 = vsel %vm417_vm3, %v2528_v9, %v2587_v62  ;;  %v3078_v9 = vadd.f32 %v5380_v13, %v5358_v21 }
 0x497   : > { %3115 = vmatmul.bf16.gmra.mxu1 %v2709_v19 }
 0x49c   : > { %v3101_v41 = vpop.f32.mrf.mxu1 }
 0x49d   : > { %v2589_v28 = vpop.permute.xlu2 %2588  ;;  %v3102_v26 = vadd.f32 %v3101_v41, %v3068_v45 }
 0x49e   : > { %v2713_v4 = vsel %vm417_vm3, %v2527_v22, %v2589_v28 }
 0x49f   : > { %v3136_v10 = vadd.f32 %v3135_v33, %v3102_v26 }
 0x4a4   : > { %v3103_v57 = vpop.f32.mrf.mxu1 }
 0x4a5   : > { %v3104_v15 = vadd.f32 %v3103_v57, %v3070_v3 }
 0x4a7   : > { %3120 = vmatmul.bf16.gmra.mxu1 %v2713_v4  ;;  %v3138_v0 = vadd.f32 %v3137_v17, %v3104_v15 }
 0x4ab   : > { %v5364_v5 = vpop.f32.mrf.mxu0 }
 0x4ac   : > { %v3106_v58 = vpop.f32.mrf.mxu1  ;;  %v3083_v3 = vadd.f32 %v5380_v13, %v5364_v5 }
 0x4ad   : > { %v2626_v38 = vpop.permute.xlu0 %2625  ;;  %v3107_v8 = vadd.f32 %v3106_v58, %v3073_v27 }
 0x4ae   : > { %v2729_v35 = vsel %vm417_vm3, %v2598_v49, %v2626_v38 }
 0x4af   : > { %3149 = vmatmul.bf16.gmra.mxu2 %v2729_v35  ;;  %v3141_v56 = vadd.f32 %v3140_v23, %v3107_v8 }
 0x4b3   : > { %v5371_v30 = vpop.f32.mrf.mxu0 }
 0x4b4   : > { %v2674_v29 = vpop.permute.xlu1 %2673  ;;  %v3108_v14 = vpop.f32.mrf.mxu1 }
 0x4b5   : > { %v2749_v60 = vsel %vm417_vm3, %v2641_v46, %v2674_v29  ;;  %v2628_v34 = vpop.permute.xlu0 %2627  ;;  %v3109_v16 = vadd.f32 %v3108_v14, %v3075_v2  ;;  %v3080_v46 = vadd.f32 %v5380_v13, %v5360_v61 }
 0x4b6   : > { %3183 = vmatmul.bf16.gmra.mxu3 %v2749_v60  ;;  %v2733_v20 = vsel %vm417_vm3, %v2597_v63, %v2628_v34  ;;  %v3145_v63 = vpop.f32.mrf.mxu2 }
 0x4b7   : > { %v3143_v22 = vadd.f32 %v3142_v54, %v3109_v16 }
 0x4b9   : > { %v3169_v24 = vpop.f32.mrf.mxu3 }
 0x4ba   : > { %v3170_v18 = vadd.f32 %v3169_v24, %v3136_v10 }
 0x4bb   : > { %v5375_v11 = vpop.f32.mrf.mxu0 }
 0x4bc   : > { %v2676_v51 = vpop.permute.xlu1 %2675  ;;  %v3111_v36 = vpop.f32.mrf.mxu1 }
 0x4bd   : > { %v2753_v43 = vsel %vm417_vm3, %v2640_v55, %v2676_v51  ;;  %v3112_v28 = vadd.f32 %v3111_v36, %v3078_v9 }
 0x4bf   : > { %3154 = vmatmul.bf16.gmra.mxu2 %v2733_v20  ;;  %v3146_v35 = vadd.f32 %v3145_v63, %v3112_v28  ;;  %v3147_v20 = vpop.f32.mrf.mxu2 }
 0x4c1   : > { %v3171_v7 = vpop.f32.mrf.mxu3 }
 0x4c2   : > { %v3172_v42 = vadd.f32 %v3171_v7, %v3138_v0 }
 0x4c3   : > { %v5384_v44 = vpop.f32.mrf.mxu0 }
 0x4c4   : > { %v3113_v29 = vpop.f32.mrf.mxu1 }
 0x4c5   : > { %v3114_v41 = vadd.f32 %v3113_v29, %v3080_v46 }
 0x4c6   : > { %3188 = vmatmul.bf16.gmra.mxu3 %v2753_v43 }
 0x4c7   : > { %v3148_v57 = vadd.f32 %v3147_v20, %v3114_v41 }
 0x4c9   : > { %v3174_v50 = vpop.f32.mrf.mxu3 }
 0x4ca   : > { %v3175_v32 = vadd.f32 %v3174_v50, %v3141_v56  ;;  %v3088_v56 = vadd.f32 %v5380_v13, %v5375_v11 }
 0x4cb   : > { %v3203_v48 = vpop.f32.mrf.mxu0 }
 0x4cc   : > { %v3204_v47 = vadd.f32 %v3203_v48, %v3170_v18 }
 0x4ce   : > { %v3228_v31 = vmax.f32 %v3204_v47, 0.0 }
 0x4d0   : > { %v3238_v12 = vpack.c.bf16 %v3228_v31, %v3228_v31 }
 0x4d1   : > { %v3176_v40 = vpop.f32.mrf.mxu3 }
 0x4d2   : > { %3249 = vst.msk [vmem:[%s5392_s15] sm:$0xf] %vm3248_vm12, %v3238_v12  ;;  %v3177_v19 = vadd.f32 %v3176_v40, %v3143_v22  ;;  %v3085_v12 = vadd.f32 %v5380_v13, %v5371_v30 }
 0x4d3   : > { %v3205_v52 = vpop.f32.mrf.mxu0 }
 0x4d4   : > { %v3206_v37 = vadd.f32 %v3205_v52, %v3172_v42 }
 0x4d6   : > { %v3229_v25 = vmax.f32 %v3206_v37, 0.0 }
 0x4d8   : > { %v3239_v53 = vpack.c.bf16 %v3229_v25, %v3229_v25 }
 0x4d9   : > { %v3179_v38 = vpop.f32.mrf.mxu3 }
 0x4da   : > { %3250 = vst.msk [vmem:[%s5392_s15 + $0x4] sm:$0xf] %vm3248_vm12, %v3239_v53  ;;  %v3180_v60 = vadd.f32 %v3179_v38, %v3146_v35 }
 0x4db   : > { %v3208_v1 = vpop.f32.mrf.mxu0 }
 0x4dc   : > { %v3209_v39 = vadd.f32 %v3208_v1, %v3175_v32 }
 0x4de   : > { %v3230_v59 = vmax.f32 %v3209_v39, 0.0 }
 0x4e0   : > { %v3240_v62 = vpack.c.bf16 %v3230_v59, %v3230_v59  ;;  %v3090_v59 = vadd.f32 %v5380_v13, %v5384_v44 }
 0x4e1   : > { %v3181_v33 = vpop.f32.mrf.mxu3 }
 0x4e2   : > { %3251 = vst.msk [vmem:[%s5392_s15 + $0x8] sm:$0xf] %vm3248_vm12, %v3240_v62  ;;  %v3182_v51 = vadd.f32 %v3181_v33, %v3148_v57 }
 0x4e3   : > { %v3210_v6 = vpop.f32.mrf.mxu0 }
 0x4e4   : > { %v3211_v4 = vadd.f32 %v3210_v6, %v3177_v19 }
 0x4e6   : > { %v3231_v49 = vmax.f32 %v3211_v4, 0.0 }
 0x4e8   : > { %v3241_v55 = vpack.c.bf16 %v3231_v49, %v3231_v49  ;;  %v3261_v49 = vld [vmem:[%s5392_s15 + $0x24] sm:$0x1] }
 0x4ea   : > { %3252 = vst.msk [vmem:[%s5392_s15 + $0xc] sm:$0xf] %vm3248_vm12, %v3241_v55 }
 0x4eb   : > { %v3213_v21 = vpop.f32.mrf.mxu0 }
 0x4ec   : > { %v3214_v34 = vadd.f32 %v3213_v21, %v3180_v60 }
 0x4ee   : > { %v3232_v24 = vmax.f32 %v3214_v34, 0.0 }
 0x4f0   : > { %v3242_v45 = vpack.c.bf16 %v3232_v24, %v3232_v24 }
 0x4f2   : > { %3253 = vst.msk [vmem:[%s5392_s15 + $0x10] sm:$0xf] %vm3248_vm12, %v3242_v45 }
 0x4f3   : > { %v3215_v26 = vpop.f32.mrf.mxu0 }
 0x4f4   : > { %v3216_v43 = vadd.f32 %v3215_v26, %v3182_v51 }
 0x4f6   : > { %v3233_v7 = vmax.f32 %v3216_v43, 0.0 }
 0x4f8   : > { %v3243_v10 = vpack.c.bf16 %v3233_v7, %v3233_v7 }
 0x4fa   : > { %3254 = vst.msk [vmem:[%s5392_s15 + $0x14] sm:$0xf] %vm3248_vm12, %v3243_v10 }
 0x4fb   : > { %v3218_v18 = vpop.f32.mrf.mxu0 }
 0x503   : > { %v3220_v23 = vpop.f32.mrf.mxu0 }
 0x50b   : > { %v3223_v1 = vpop.f32.mrf.mxu0 }
 0x513   : > { %v3225_v4 = vpop.f32.mrf.mxu0 }
 0x514   : > { %v3116_v61 = vpop.f32.mrf.mxu1 }
 0x515   : > { %v3117_v58 = vadd.f32 %v3116_v61, %v3083_v3 }
 0x51c   : > { %v3118_v48 = vpop.f32.mrf.mxu1 }
 0x51d   : > { %v3119_v27 = vadd.f32 %v3118_v48, %v3085_v12 }
 0x524   : > { %v3121_v37 = vpop.f32.mrf.mxu1 }
 0x525   : > { %v3122_v2 = vadd.f32 %v3121_v37, %v3088_v56 }
 0x52c   : > { %v3123_v54 = vpop.f32.mrf.mxu1 }
 0x52d   : > { %v3124_v62 = vadd.f32 %v3123_v54, %v3090_v59 }
 0x532   : > { %v3150_v17 = vpop.f32.mrf.mxu2 }
 0x533   : > { %v3151_v15 = vadd.f32 %v3150_v17, %v3117_v58 }
 0x539   : > { %v3184_v47 = vpop.f32.mrf.mxu3 }
 0x53a   : > { %v3152_v31 = vpop.f32.mrf.mxu2  ;;  %v3185_v0 = vadd.f32 %v3184_v47, %v3151_v15 }
 0x53b   : > { %v3153_v52 = vadd.f32 %v3152_v31, %v3119_v27 }
 0x53c   : > { %v3219_v50 = vadd.f32 %v3218_v18, %v3185_v0 }
 0x53e   : > { %v3234_v42 = vmax.f32 %v3219_v50, 0.0 }
 0x540   : > { %v3244_v8 = vpack.c.bf16 %v3234_v42, %v3234_v42 }
 0x541   : > { %v3186_v5 = vpop.f32.mrf.mxu3 }
 0x542   : > { %3255 = vst.msk [vmem:[%s5392_s15 + $0x18] sm:$0xf] %vm3248_vm12, %v3244_v8  ;;  %v3187_v14 = vadd.f32 %v3186_v5, %v3153_v52  ;;  %v3155_v25 = vpop.f32.mrf.mxu2 }
 0x543   : > { %v3156_v30 = vadd.f32 %v3155_v25, %v3122_v2 }
 0x544   : > { %v3221_v53 = vadd.f32 %v3220_v23, %v3187_v14 }
 0x546   : > { %v3235_v32 = vmax.f32 %v3221_v53, 0.0 }
 0x548   : > { %v3245_v40 = vpack.c.bf16 %v3235_v32, %v3235_v32 }
 0x549   : > { %v3189_v16 = vpop.f32.mrf.mxu3 }
 0x54a   : > { %3256 = vst.msk [vmem:[%s5392_s15 + $0x1c] sm:$0xf] %vm3248_vm12, %v3245_v40  ;;  %v3190_v39 = vadd.f32 %v3189_v16, %v3156_v30  ;;  %v3157_v22 = vpop.f32.mrf.mxu2 }
 0x54b   : > { %v3158_v9 = vadd.f32 %v3157_v22, %v3124_v62 }
 0x54c   : > { %v3224_v36 = vadd.f32 %v3223_v1, %v3190_v39 }
 0x54e   : > { %v3236_v11 = vmax.f32 %v3224_v36, 0.0 }
 0x550   : > { %v3246_v19 = vpack.c.bf16 %v3236_v11, %v3236_v11 }
 0x551   : > { %v3191_v6 = vpop.f32.mrf.mxu3 }
 0x552   : > { %3257 = vst.msk [vmem:[%s5392_s15 + $0x20] sm:$0xf] %vm3248_vm12, %v3246_v19  ;;  %v3192_v28 = vadd.f32 %v3191_v6, %v3158_v9 }
 0x554   : > { %v3226_v63 = vadd.f32 %v3225_v4, %v3192_v28 }
 0x556   : > { %v3237_v38 = vmax.f32 %v3226_v63, 0.0 }
 0x558   : > { %v3247_v13 = vpack.c.bf16 %v3237_v38, %v3237_v38 }
 0x55a   : > { %v3262_v44 = vsel %vm3260_vm15, %v3247_v13, %v3261_v49 }
 0x55b   : > { %3263 = vst [vmem:[%s5392_s15 + $0x24] sm:$0x1] %v3262_v44 }
 0x55c PF: > { %s17_s24 = sadd.s32 1, %s3935_s24  }
 0x55d   : > { %p14_p4 = scmp.ge.s32.totalorder %s17_s24, 4  }
 0x55f   :  { %16 = sbr.rel (!%p14_p4) target bundleno = 1 (0x1), region = 78 }

// kernel: net_forward.3
= control target key start
LH: loop header
LB: loop body
LE: loop exit
PB: predicated region body
PF: predicated region fallthrough
CT: control target
= control target key end

     0   :  { %10 = vsyncpa [#allocation4], 0  ;;  %s2957_s18 = smov 0   ;;  %s3452_s0 = inlined_call_operand.vmem [shape: bf16[2,3200], index: 0, kind: input, shape index: {}]   ;;  %s3453_s1 = inlined_call_operand.vmem [shape: bf16[3200,512], index: 1, kind: input, shape index: {}]   ;;  %s3454_s2 = inlined_call_operand.vmem [shape: f32[1,512], index: 2, kind: input, shape index: {}]   ;;  %s3455_s3 = inlined_call_operand.vmem [shape: bf16[512,4], index: 3, kind: input, shape index: {}]   ;;  %s3456_s4 = inlined_call_operand.vmem [shape: f32[1,4], index: 4, kind: input, shape index: {}]   ;;  %s3457_s5 = inlined_call_operand.hbm [shape: f32[2,4], index: 5, kind: output, shape index: {}]  }
   0x1 LB: > { %s2963_s19 = sadd.s32 4294967295, %s2923_s18   ;;  %p1898_p0 = scmp.ge.s32.totalorder %s2923_s18, 1  ;;  %s2923_s18 = sphi %s2957_s18, %s16_s18  }
   0x2   : > { %p195_p1 = scmp.lt.s32.totalorder %s2923_s18, 6 }
   0x4   : > { %p196_p2 = pnand %p1898_p0, %p195_p1 }
   0x5   : > { %s223_s20 = smul.u32 (!%p196_p2), 5, %s2963_s19  ;;  %p1901_p5 = scmp.ne.s32.totalorder (!%p196_p2), %s2963_s19, 0 }
   0x6   : > { %199 = sbr.rel (%p196_p2) target bundleno = 507 (0x1fb), region = 40 }
   0x7   : > { %s228_s21 = smul.u32 (!%p196_p2), 80, %s2963_s19  ;;  %p224_p3 = scmp.lt.s32.totalorder (!%p196_p2), %s223_s20, 24 }
   0x9   : > { %p229_p4 = scmp.lt.s32.totalorder (!%p196_p2), %s228_s21, 399 }
   0xb   : > { %s3459_s20 = smov (!%p224_p3, %s223_s20), 24  ;;  %s3461_s21 = smov (!%p229_p4, %s228_s21), 399 }
   0xc   : > { %s226_s24 = scalar_lea.vmem %s3452_s0, %s3459_s20  ;;  %s2675_s25 = sshll.u32 %s3461_s21, 4 }
   0xd   : > { %s2978_s28 = scalar_lea.vmem %s3453_s1, %s2675_s25  ;;  %238 = sbr.rel (%p1901_p5) target bundleno = 20 (0x14), region = 44 }
  0x12   : > { %v2925_v0 = vmov 0.0  }
  0x13   : > { %239 = vst [vmem:[#allocation2] sm:$0xff] %v2925_v0 }
  0x14 PF: > { %v2016_v1 = vld [vmem:[%s2978_s28 + $0xe0] sm:$0xf]  ;;  %v2706_v2 = vld [vmem:[%s2978_s28 + $0xec] sm:$0xf0]  ;;  %vm1481_vm0 = vcmask 1041408   ;;  %vm1483_vm1 = vcmask 1045508  }
  0x15   : > { %v2144_v3 = vld [vmem:[%s2978_s28 + $0x1e0] sm:$0xf]  ;;  %v2017_v4 = vor.u32 %v2706_v2, %v2016_v1  ;;  %v2738_v5 = vld [vmem:[%s2978_s28 + $0x1ec] sm:$0xf0]  ;;  %vm1485_vm2 = vcmask 1043456   ;;  %p2542_p6 = scmp.ne.s32.totalorder %s2963_s19, 4 }
  0x16   : > { %v2272_v6 = vld [vmem:[%s2978_s28 + $0x2e0] sm:$0xf]  ;;  %v2770_v7 = vld [vmem:[%s2978_s28 + $0x2ec] sm:$0xf0]  ;;  %v2145_v8 = vor.u32 %v2738_v5, %v2144_v3 }
  0x17   : > { %v2273_v9 = vor.u32 %v2770_v7, %v2272_v6  ;;  %v2400_v10 = vld [vmem:[%s2978_s28 + $0x3e0] sm:$0xf]  ;;  %v2802_v11 = vld [vmem:[%s2978_s28 + $0x3ec] sm:$0xf0]  ;;  %1214 = vmatpush.bf16.msra.mxu0 %v2017_v4 }
  0x18   : > { %v2000_v12 = vld [vmem:[%s2978_s28 + $0xc0] sm:$0xf]  ;;  %v2401_v13 = vor.u32 %v2802_v11, %v2400_v10  ;;  %v2702_v14 = vld [vmem:[%s2978_s28 + $0xcc] sm:$0xf0]  ;;  %1227 = vmatpush.bf16.msra.mxu1 %v2145_v8 }
  0x19   : > { %v2128_v15 = vld [vmem:[%s2978_s28 + $0x1c0] sm:$0xf]  ;;  %v2734_v16 = vld [vmem:[%s2978_s28 + $0x1cc] sm:$0xf0]  ;;  %1240 = vmatpush.bf16.msra.mxu2 %v2273_v9  ;;  %v2001_v17 = vor.u32 %v2702_v14, %v2000_v12 }
  0x1a   : > { %v2129_v18 = vor.u32 %v2734_v16, %v2128_v15  ;;  %v2256_v19 = vld [vmem:[%s2978_s28 + $0x2c0] sm:$0xf]  ;;  %v2766_v20 = vld [vmem:[%s2978_s28 + $0x2cc] sm:$0xf0]  ;;  %1253 = vmatpush.bf16.msra.mxu3 %v2401_v13 }
  0x1b   : > { %v2384_v21 = vld [vmem:[%s2978_s28 + $0x3c0] sm:$0xf]  ;;  %v2257_v22 = vor.u32 %v2766_v20, %v2256_v19  ;;  %v2798_v23 = vld [vmem:[%s2978_s28 + $0x3cc] sm:$0xf0]  ;;  %1215 = vmatpush.bf16.msra.mxu0 %v2001_v17 }
  0x1c   : > { %v1984_v24 = vld [vmem:[%s2978_s28 + $0xa0] sm:$0xf]  ;;  %v2698_v25 = vld [vmem:[%s2978_s28 + $0xac] sm:$0xf0]  ;;  %v2385_v26 = vor.u32 %v2798_v23, %v2384_v21  ;;  %1228 = vmatpush.bf16.msra.mxu1 %v2129_v18 }
  0x1d   : > { %v2112_v27 = vld [vmem:[%s2978_s28 + $0x1a0] sm:$0xf]  ;;  %v2730_v28 = vld [vmem:[%s2978_s28 + $0x1ac] sm:$0xf0]  ;;  %v1985_v30 = vor.u32 %v2698_v25, %v1984_v24  ;;  %1241 = vmatpush.bf16.msra.mxu2 %v2257_v22 }
  0x1e   : > { %v2240_v29 = vld [vmem:[%s2978_s28 + $0x2a0] sm:$0xf]  ;;  %v2762_v31 = vld [vmem:[%s2978_s28 + $0x2ac] sm:$0xf0]  ;;  %v2113_v34 = vor.u32 %v2730_v28, %v2112_v27  ;;  %1254 = vmatpush.bf16.msra.mxu3 %v2385_v26 }
  0x1f   : > { %v2368_v32 = vld [vmem:[%s2978_s28 + $0x3a0] sm:$0xf]  ;;  %v2794_v33 = vld [vmem:[%s2978_s28 + $0x3ac] sm:$0xf0]  ;;  %v2241_v35 = vor.u32 %v2762_v31, %v2240_v29  ;;  %1216 = vmatpush.bf16.msra.mxu0 %v1985_v30  ;;  %v2704_v31 = vld [vmem:[%s2978_s28 + $0xe4] sm:$0xf] }
  0x20   : > { %v1968_v36 = vld [vmem:[%s2978_s28 + $0x80] sm:$0xf]  ;;  %v2694_v37 = vld [vmem:[%s2978_s28 + $0x8c] sm:$0xf0]  ;;  %v2369_v39 = vor.u32 %v2794_v33, %v2368_v32  ;;  %1229 = vmatpush.bf16.msra.mxu1 %v2113_v34  ;;  %v2018_v33 = vld [vmem:[%s2978_s28 + $0xf0] sm:$0xf0] }
  0x21   : > { %v2096_v38 = vld [vmem:[%s2978_s28 + $0x180] sm:$0xf]  ;;  %v2726_v40 = vld [vmem:[%s2978_s28 + $0x18c] sm:$0xf0]  ;;  %v1969_v45 = vor.u32 %v2694_v37, %v1968_v36  ;;  %1242 = vmatpush.bf16.msra.mxu2 %v2241_v35  ;;  %v2736_v34 = vld [vmem:[%s2978_s28 + $0x1e4] sm:$0xf] }
  0x22   : > { %v2224_v41 = vld [vmem:[%s2978_s28 + $0x280] sm:$0xf]  ;;  %v2758_v42 = vld [vmem:[%s2978_s28 + $0x28c] sm:$0xf0]  ;;  %v2097_v46 = vor.u32 %v2726_v40, %v2096_v38  ;;  %1255 = vmatpush.bf16.msra.mxu3 %v2369_v39  ;;  %v2146_v35 = vld [vmem:[%s2978_s28 + $0x1f0] sm:$0xf0] }
  0x23   : > { %v2352_v43 = vld [vmem:[%s2978_s28 + $0x380] sm:$0xf]  ;;  %v2790_v44 = vld [vmem:[%s2978_s28 + $0x38c] sm:$0xf0]  ;;  %v2225_v47 = vor.u32 %v2758_v42, %v2224_v41  ;;  %1217 = vmatpush.bf16.msra.mxu0 %v1969_v45  ;;  %v2768_v38 = vld [vmem:[%s2978_s28 + $0x2e4] sm:$0xf]  ;;  %v2021_v42 = vor.u32 %v2704_v31, %v2018_v33 }
  0x24   : > { %v1952_v48 = vld [vmem:[%s2978_s28 + $0x60] sm:$0xf]  ;;  %v2690_v49 = vld [vmem:[%s2978_s28 + $0x6c] sm:$0xf0]  ;;  %v2353_v51 = vor.u32 %v2790_v44, %v2352_v43  ;;  %1230 = vmatpush.bf16.msra.mxu1 %v2097_v46  ;;  %v2274_v39 = vld [vmem:[%s2978_s28 + $0x2f0] sm:$0xf0]  ;;  %v2149_v43 = vor.u32 %v2736_v34, %v2146_v35 }
  0x25   : > { %v2080_v50 = vld [vmem:[%s2978_s28 + $0x160] sm:$0xf]  ;;  %v2722_v52 = vld [vmem:[%s2978_s28 + $0x16c] sm:$0xf0]  ;;  %v1953_v57 = vor.u32 %v2690_v49, %v1952_v48  ;;  %1243 = vmatpush.bf16.msra.mxu2 %v2225_v47  ;;  %v2700_v46 = vld [vmem:[%s2978_s28 + $0xc4] sm:$0xf]  ;;  %v2277_v47 = vor.u32 %v2768_v38, %v2274_v39 }
  0x26   : > { %v2208_v53 = vld [vmem:[%s2978_s28 + $0x260] sm:$0xf]  ;;  %v2754_v54 = vld [vmem:[%s2978_s28 + $0x26c] sm:$0xf0]  ;;  %v2081_v58 = vor.u32 %v2722_v52, %v2080_v50  ;;  %1256 = vmatpush.bf16.msra.mxu3 %v2353_v51  ;;  %v2002_v48 = vld [vmem:[%s2978_s28 + $0xd0] sm:$0xf0] }
  0x27   : > { %v2336_v55 = vld [vmem:[%s2978_s28 + $0x360] sm:$0xf]  ;;  %v2786_v56 = vld [vmem:[%s2978_s28 + $0x36c] sm:$0xf0]  ;;  %v2209_v59 = vor.u32 %v2754_v54, %v2208_v53  ;;  %1218 = vmatpush.bf16.msra.mxu0 %v1953_v57  ;;  %v2732_v49 = vld [vmem:[%s2978_s28 + $0x1c4] sm:$0xf]  ;;  %v2005_v54 = vor.u32 %v2700_v46, %v2002_v48 }
  0x28   : > { %v1936_v60 = vld [vmem:[%s2978_s28 + $0x40] sm:$0xf]  ;;  %v2686_v61 = vld [vmem:[%s2978_s28 + $0x4c] sm:$0xf0]  ;;  %v2337_v63 = vor.u32 %v2786_v56, %v2336_v55  ;;  %1231 = vmatpush.bf16.msra.mxu1 %v2081_v58  ;;  %v2130_v50 = vld [vmem:[%s2978_s28 + $0x1d0] sm:$0xf0] }
  0x29   : > { %v2064_v62 = vld [vmem:[%s2978_s28 + $0x140] sm:$0xf]  ;;  %v2718_v0 = vld [vmem:[%s2978_s28 + $0x14c] sm:$0xf0]  ;;  %v1937_v5 = vor.u32 %v2686_v61, %v1936_v60  ;;  %1244 = vmatpush.bf16.msra.mxu2 %v2209_v59  ;;  %v2764_v51 = vld [vmem:[%s2978_s28 + $0x2c4] sm:$0xf]  ;;  %v2133_v55 = vor.u32 %v2732_v49, %v2130_v50 }
  0x2a   : > { %v2192_v1 = vld [vmem:[%s2978_s28 + $0x240] sm:$0xf]  ;;  %v2750_v2 = vld [vmem:[%s2978_s28 + $0x24c] sm:$0xf0]  ;;  %v2065_v6 = vor.u32 %v2718_v0, %v2064_v62  ;;  %1257 = vmatpush.bf16.msra.mxu3 %v2337_v63  ;;  %v2258_v52 = vld [vmem:[%s2978_s28 + $0x2d0] sm:$0xf0] }
  0x2b   : > { %v2320_v3 = vld [vmem:[%s2978_s28 + $0x340] sm:$0xf]  ;;  %v2782_v4 = vld [vmem:[%s2978_s28 + $0x34c] sm:$0xf0]  ;;  %v2193_v7 = vor.u32 %v2750_v2, %v2192_v1  ;;  %1219 = vmatpush.bf16.msra.mxu0 %v1937_v5  ;;  %v2696_v58 = vld [vmem:[%s2978_s28 + $0xa4] sm:$0xf]  ;;  %v2261_v59 = vor.u32 %v2764_v51, %v2258_v52 }
  0x2c   : > { %v1920_v8 = vld [vmem:[%s2978_s28 + $0x20] sm:$0xf]  ;;  %v2682_v9 = vld [vmem:[%s2978_s28 + $0x2c] sm:$0xf0]  ;;  %v2321_v11 = vor.u32 %v2782_v4, %v2320_v3  ;;  %1232 = vmatpush.bf16.msra.mxu1 %v2065_v6  ;;  %v1986_v60 = vld [vmem:[%s2978_s28 + $0xb0] sm:$0xf0] }
  0x2d   : > { %v2048_v10 = vld [vmem:[%s2978_s28 + $0x120] sm:$0xf]  ;;  %v2714_v12 = vld [vmem:[%s2978_s28 + $0x12c] sm:$0xf0]  ;;  %v1921_v17 = vor.u32 %v2682_v9, %v1920_v8  ;;  %1245 = vmatpush.bf16.msra.mxu2 %v2193_v7  ;;  %v2728_v61 = vld [vmem:[%s2978_s28 + $0x1a4] sm:$0xf]  ;;  %v1989_v4 = vor.u32 %v2696_v58, %v1986_v60 }
  0x2e   : > { %v2176_v13 = vld [vmem:[%s2978_s28 + $0x220] sm:$0xf]  ;;  %v2746_v14 = vld [vmem:[%s2978_s28 + $0x22c] sm:$0xf0]  ;;  %v2049_v20 = vor.u32 %v2714_v12, %v2048_v10  ;;  %1258 = vmatpush.bf16.msra.mxu3 %v2321_v11  ;;  %v2114_v62 = vld [vmem:[%s2978_s28 + $0x1b0] sm:$0xf0] }
  0x2f   : > { %v2304_v15 = vld [vmem:[%s2978_s28 + $0x320] sm:$0xf]  ;;  %v2778_v16 = vld [vmem:[%s2978_s28 + $0x32c] sm:$0xf0]  ;;  %v2177_v21 = vor.u32 %v2746_v14, %v2176_v13  ;;  %1220 = vmatpush.bf16.msra.mxu0 %v1921_v17  ;;  %v2760_v63 = vld [vmem:[%s2978_s28 + $0x2a4] sm:$0xf]  ;;  %v2117_v5 = vor.u32 %v2728_v61, %v2114_v62 }
  0x30   : > { %v1904_v18 = vld [vmem:[%s2978_s28] sm:$0xf]  ;;  %v2678_v19 = vld [vmem:[%s2978_s28 + $0xc] sm:$0xf0]  ;;  %v2305_v25 = vor.u32 %v2778_v16, %v2304_v15  ;;  %1233 = vmatpush.bf16.msra.mxu1 %v2049_v20  ;;  %v2242_v0 = vld [vmem:[%s2978_s28 + $0x2b0] sm:$0xf0] }
  0x31   : > { %v2032_v22 = vld [vmem:[%s2978_s28 + $0x100] sm:$0xf]  ;;  %v2710_v23 = vld [vmem:[%s2978_s28 + $0x10c] sm:$0xf0]  ;;  %v1905_v32 = vor.u32 %v2678_v19, %v1904_v18  ;;  %1246 = vmatpush.bf16.msra.mxu2 %v2177_v21  ;;  %v2692_v7 = vld [vmem:[%s2978_s28 + $0x84] sm:$0xf]  ;;  %v2245_v8 = vor.u32 %v2760_v63, %v2242_v0 }
  0x32   : > { %v2160_v24 = vld [vmem:[%s2978_s28 + $0x200] sm:$0xf]  ;;  %v2742_v26 = vld [vmem:[%s2978_s28 + $0x20c] sm:$0xf0]  ;;  %v2033_v36 = vor.u32 %v2710_v23, %v2032_v22  ;;  %1259 = vmatpush.bf16.msra.mxu3 %v2305_v25  ;;  %v1970_v9 = vld [vmem:[%s2978_s28 + $0x90] sm:$0xf0] }
  0x33   : > { %v2288_v27 = vld [vmem:[%s2978_s28 + $0x300] sm:$0xf]  ;;  %v2774_v28 = vld [vmem:[%s2978_s28 + $0x30c] sm:$0xf0]  ;;  %v2161_v37 = vor.u32 %v2742_v26, %v2160_v24  ;;  %1221 = vmatpush.bf16.msra.mxu0 %v1905_v32  ;;  %v2724_v10 = vld [vmem:[%s2978_s28 + $0x184] sm:$0xf]  ;;  %v1973_v15 = vor.u32 %v2692_v7, %v1970_v9 }
  0x34   : > { %v2528_v29 = vld [vmem:[%s2978_s28 + $0x4e0] sm:$0xf]  ;;  %v2834_v30 = vld [vmem:[%s2978_s28 + $0x4ec] sm:$0xf0]  ;;  %v2289_v40 = vor.u32 %v2774_v28, %v2288_v27  ;;  %1234 = vmatpush.bf16.msra.mxu1 %v2033_v36  ;;  %v2098_v11 = vld [vmem:[%s2978_s28 + $0x190] sm:$0xf0] }
  0x35   : > { %v2529_v41 = vor.u32 %v2834_v30, %v2528_v29  ;;  %v2512_v44 = vld [vmem:[%s2978_s28 + $0x4c0] sm:$0xf]  ;;  %v2830_v45 = vld [vmem:[%s2978_s28 + $0x4cc] sm:$0xf0]  ;;  %1247 = vmatpush.bf16.msra.mxu2 %v2161_v37  ;;  %v2756_v12 = vld [vmem:[%s2978_s28 + $0x284] sm:$0xf]  ;;  %v2101_v16 = vor.u32 %v2724_v10, %v2098_v11 }
  0x36   : > { %1260 = vmatpush.bf16.msra.mxu3 %v2289_v40  ;;  %v2513_v53 = vor.u32 %v2830_v45, %v2512_v44  ;;  %v2496_v56 = vld [vmem:[%s2978_s28 + $0x4a0] sm:$0xf]  ;;  %v2826_v57 = vld [vmem:[%s2978_s28 + $0x4ac] sm:$0xf0]  ;;  %v2226_v13 = vld [vmem:[%s2978_s28 + $0x290] sm:$0xf0] }
  0x37   : > { %1266 = vmatpush.bf16.msrb.mxu0 %v2529_v41  ;;  %v2497_v1 = vor.u32 %v2826_v57, %v2496_v56  ;;  %v2480_v2 = vld [vmem:[%s2978_s28 + $0x480] sm:$0xf]  ;;  %v2822_v6 = vld [vmem:[%s2978_s28 + $0x48c] sm:$0xf0]  ;;  %v2688_v19 = vld [vmem:[%s2978_s28 + $0x64] sm:$0xf]  ;;  %v2229_v20 = vor.u32 %v2756_v12, %v2226_v13 }
  0x38   : > { %1279 = vmatpush.bf16.msrb.mxu1 %v2021_v42  ;;  %v241_v3 = vld [vmem:[%s226_s24] sm:$0x1f]  ;;  %v2481_v14 = vor.u32 %v2822_v6, %v2480_v2  ;;  %v2818_v18 = vld [vmem:[%s2978_s28 + $0x46c] sm:$0xf0]  ;;  %v1954_v21 = vld [vmem:[%s2978_s28 + $0x70] sm:$0xf0] }
  0x39   : > { %1292 = vmatpush.bf16.msrb.mxu2 %v2149_v43  ;;  %403 = vst [vmem:[#allocation1] ss:$9 sm:$0xff] %v241_v3  ;;  %v2464_v17 = vld [vmem:[%s2978_s28 + $0x460] sm:$0xf]  ;;  %v2720_v22 = vld [vmem:[%s2978_s28 + $0x164] sm:$0xf]  ;;  %v1957_v31 = vor.u32 %v2688_v19, %v1954_v21 }
  0x3a   : > { %1305 = vmatpush.bf16.msrb.mxu3 %v2277_v47  ;;  %v2082_v23 = vld [vmem:[%s2978_s28 + $0x170] sm:$0xf0]  ;;  %v2752_v24 = vld [vmem:[%s2978_s28 + $0x264] sm:$0xf]  ;;  %v2448_v26 = vld [vmem:[%s2978_s28 + $0x440] sm:$0xf]  ;;  %v2465_v27 = vor.u32 %v2818_v18, %v2464_v17 }
  0x3b   : > { %1267 = vmatpush.bf16.msrb.mxu0 %v2513_v53  ;;  %v2210_v25 = vld [vmem:[%s2978_s28 + $0x270] sm:$0xf0]  ;;  %v2085_v32 = vor.u32 %v2720_v22, %v2082_v23  ;;  %v2814_v33 = vld [vmem:[%s2978_s28 + $0x44c] sm:$0xf0]  ;;  %v2684_v34 = vld [vmem:[%s2978_s28 + $0x44] sm:$0xf] }
  0x3c   : > { %1280 = vmatpush.bf16.msrb.mxu1 %v2005_v54  ;;  %v2213_v36 = vor.u32 %v2752_v24, %v2210_v25  ;;  %v1938_v37 = vld [vmem:[%s2978_s28 + $0x50] sm:$0xf0]  ;;  %v2716_v38 = vld [vmem:[%s2978_s28 + $0x144] sm:$0xf]  ;;  %v2449_v42 = vor.u32 %v2814_v33, %v2448_v26  ;;  %v2432_v45 = vld [vmem:[%s2978_s28 + $0x420] sm:$0xf] }
  0x3d   : > { %1293 = vmatpush.bf16.msrb.mxu2 %v2133_v55  ;;  %v2066_v39 = vld [vmem:[%s2978_s28 + $0x150] sm:$0xf0]  ;;  %v2748_v40 = vld [vmem:[%s2978_s28 + $0x244] sm:$0xf]  ;;  %v1941_v43 = vor.u32 %v2684_v34, %v1938_v37  ;;  %v2810_v46 = vld [vmem:[%s2978_s28 + $0x42c] sm:$0xf0] }
  0x3e   : > { %1306 = vmatpush.bf16.msrb.mxu3 %v2261_v59  ;;  %v2194_v41 = vld [vmem:[%s2978_s28 + $0x250] sm:$0xf0]  ;;  %v2069_v44 = vor.u32 %v2716_v38, %v2066_v39  ;;  %v2680_v47 = vld [vmem:[%s2978_s28 + $0x24] sm:$0xf]  ;;  %v2433_v54 = vor.u32 %v2810_v46, %v2432_v45  ;;  %v2416_v55 = vld [vmem:[%s2978_s28 + $0x400] sm:$0xf] }
  0x3f   : > { %1268 = vmatpush.bf16.msrb.mxu0 %v2497_v1  ;;  %v2197_v48 = vor.u32 %v2748_v40, %v2194_v41  ;;  %v1922_v49 = vld [vmem:[%s2978_s28 + $0x30] sm:$0xf0]  ;;  %v2712_v50 = vld [vmem:[%s2978_s28 + $0x124] sm:$0xf]  ;;  %v2806_v56 = vld [vmem:[%s2978_s28 + $0x40c] sm:$0xf0] }
  0x40   : > { %1281 = vmatpush.bf16.msrb.mxu1 %v1989_v4  ;;  %v3091_v28 = vld [vmem:[#allocation1] sm:$0xff]  ;;  %v3093_v29 = vld [vmem:[#allocation1 + $0x12] sm:$0xff]  ;;  %v3099_v35 = vld [vmem:[#allocation1 + $0x9] sm:$0xff]  ;;  %v1925_v57 = vor.u32 %v2680_v47, %v1922_v49 }
  0x41   : > { %1294 = vmatpush.bf16.msrb.mxu2 %v2117_v5  ;;  %v3095_v30 = vld [vmem:[#allocation1 + $0x1b] sm:$0xff]  ;;  %1222 = vmatmul.bf16.vlgmr.msra.gmra.mxu0 %v3091_v28  ;;  %v2050_v51 = vld [vmem:[%s2978_s28 + $0x130] sm:$0xf0]  ;;  %v2744_v52 = vld [vmem:[%s2978_s28 + $0x224] sm:$0xf]  ;;  %v2417_v5 = vor.u32 %v2806_v56, %v2416_v55 }
  0x42   : > { %1307 = vmatpush.bf16.msrb.mxu3 %v2245_v8  ;;  %1248 = vmatmul.bf16.vlgmr.msra.gmra.mxu2 %v3093_v29  ;;  %v2178_v53 = vld [vmem:[%s2978_s28 + $0x230] sm:$0xf0]  ;;  %v2053_v58 = vor.u32 %v2712_v50, %v2050_v51  ;;  %v2676_v59 = vld [vmem:[%s2978_s28 + $0x4] sm:$0xf]  ;;  %v2024_v7 = vld [vmem:[%s2978_s28 + $0xe8] sm:$0xf] }
  0x43   : > { %1269 = vmatpush.bf16.msrb.mxu0 %v2481_v14  ;;  %1261 = vmatmul.bf16.vlgmr.msra.gmra.mxu3 %v3095_v30  ;;  %v1906_v60 = vld [vmem:[%s2978_s28 + $0x10] sm:$0xf0]  ;;  %v2708_v61 = vld [vmem:[%s2978_s28 + $0x104] sm:$0xf]  ;;  %v2181_v62 = vor.u32 %v2744_v52, %v2178_v53  ;;  %v2707_v8 = vld [vmem:[%s2978_s28 + $0xf4] sm:$0xf0] }
  0x44   : > { %1282 = vmatpush.bf16.msrb.mxu1 %v1973_v15  ;;  %v2034_v63 = vld [vmem:[%s2978_s28 + $0x110] sm:$0xf0]  ;;  %v2740_v0 = vld [vmem:[%s2978_s28 + $0x204] sm:$0xf]  ;;  %v1909_v9 = vor.u32 %v2676_v59, %v1906_v60  ;;  %v2152_v11 = vld [vmem:[%s2978_s28 + $0x1e8] sm:$0xf] }
  0x45   : > { %1295 = vmatpush.bf16.msrb.mxu2 %v2101_v16  ;;  %1235 = vmatmul.bf16.vlgmr.msra.gmra.mxu1 %v3099_v35  ;;  %v2162_v1 = vld [vmem:[%s2978_s28 + $0x210] sm:$0xf0]  ;;  %v2800_v2 = vld [vmem:[%s2978_s28 + $0x3e4] sm:$0xf]  ;;  %v2037_v10 = vor.u32 %v2708_v61, %v2034_v63  ;;  %v2739_v12 = vld [vmem:[%s2978_s28 + $0x1f4] sm:$0xf0]  ;;  %v2025_v16 = vor.u32 %v2707_v8, %v2024_v7 }
  0x46   : > { %1308 = vmatpush.bf16.msrb.mxu3 %v2229_v20  ;;  %v2402_v3 = vld [vmem:[%s2978_s28 + $0x3f0] sm:$0xf0]  ;;  %v2832_v4 = vld [vmem:[%s2978_s28 + $0x4e4] sm:$0xf]  ;;  %v2165_v13 = vor.u32 %v2740_v0, %v2162_v1  ;;  %v2153_v20 = vor.u32 %v2739_v12, %v2152_v11  ;;  %v2008_v22 = vld [vmem:[%s2978_s28 + $0xc8] sm:$0xf] }
  0x47   : > { %1270 = vmatpush.bf16.msrb.mxu0 %v2465_v27  ;;  %v2530_v6 = vld [vmem:[%s2978_s28 + $0x4f0] sm:$0xf0]  ;;  %v2405_v14 = vor.u32 %v2800_v2, %v2402_v3  ;;  %v2796_v17 = vld [vmem:[%s2978_s28 + $0x3c4] sm:$0xf]  ;;  %v2703_v23 = vld [vmem:[%s2978_s28 + $0xd4] sm:$0xf0] }
  0x48   : > { %1283 = vmatpush.bf16.msrb.mxu1 %v1957_v31  ;;  %v2533_v15 = vor.u32 %v2832_v4, %v2530_v6  ;;  %v2386_v18 = vld [vmem:[%s2978_s28 + $0x3d0] sm:$0xf0]  ;;  %v2828_v19 = vld [vmem:[%s2978_s28 + $0x4c4] sm:$0xf]  ;;  %v2136_v24 = vld [vmem:[%s2978_s28 + $0x1c8] sm:$0xf] }
  0x49   : > { %1296 = vmatpush.bf16.msrb.mxu2 %v2085_v32  ;;  %v2514_v21 = vld [vmem:[%s2978_s28 + $0x4d0] sm:$0xf0]  ;;  %v2735_v25 = vld [vmem:[%s2978_s28 + $0x1d4] sm:$0xf0]  ;;  %v3142_v26 = vld [vmem:[#allocation1 + $0x24] sm:$0xff]  ;;  %v2389_v27 = vor.u32 %v2796_v17, %v2386_v18  ;;  %v2009_v32 = vor.u32 %v2703_v23, %v2008_v22 }
  0x4a   : > { %1309 = vmatpush.bf16.msrb.mxu3 %v2213_v36  ;;  %v2517_v31 = vor.u32 %v2828_v19, %v2514_v21  ;;  %v2792_v33 = vld [vmem:[%s2978_s28 + $0x3a4] sm:$0xf]  ;;  %v2370_v34 = vld [vmem:[%s2978_s28 + $0x3b0] sm:$0xf0]  ;;  %v2137_v37 = vor.u32 %v2735_v25, %v2136_v24  ;;  %v1992_v39 = vld [vmem:[%s2978_s28 + $0xa8] sm:$0xf] }
  0x4b   : > { %1271 = vmatpush.bf16.msrb.mxu0 %v2449_v42  ;;  %v2824_v36 = vld [vmem:[%s2978_s28 + $0x4a4] sm:$0xf]  ;;  %v2498_v38 = vld [vmem:[%s2978_s28 + $0x4b0] sm:$0xf0]  ;;  %v2699_v40 = vld [vmem:[%s2978_s28 + $0xb4] sm:$0xf0] }
  0x4c   : > { %1284 = vmatpush.bf16.msrb.mxu1 %v1941_v43  ;;  %v2120_v41 = vld [vmem:[%s2978_s28 + $0x1a8] sm:$0xf]  ;;  %v2731_v42 = vld [vmem:[%s2978_s28 + $0x1b4] sm:$0xf0]  ;;  %v2373_v43 = vor.u32 %v2792_v33, %v2370_v34  ;;  %v1993_v45 = vor.u32 %v2699_v40, %v1992_v39  ;;  %v2788_v46 = vld [vmem:[%s2978_s28 + $0x384] sm:$0xf] }
  0x4d   : > { %1297 = vmatpush.bf16.msrb.mxu2 %v2069_v44  ;;  %v2501_v44 = vor.u32 %v2824_v36, %v2498_v38  ;;  %v2354_v47 = vld [vmem:[%s2978_s28 + $0x390] sm:$0xf0]  ;;  %v2121_v49 = vor.u32 %v2731_v42, %v2120_v41  ;;  %v1976_v51 = vld [vmem:[%s2978_s28 + $0x88] sm:$0xf]  ;;  %v2695_v52 = vld [vmem:[%s2978_s28 + $0x94] sm:$0xf0] }
  0x4e   : > { %1310 = vmatpush.bf16.msrb.mxu3 %v2197_v48  ;;  %v2820_v48 = vld [vmem:[%s2978_s28 + $0x484] sm:$0xf]  ;;  %v2482_v50 = vld [vmem:[%s2978_s28 + $0x490] sm:$0xf0]  ;;  %v2104_v53 = vld [vmem:[%s2978_s28 + $0x188] sm:$0xf]  ;;  %v2357_v55 = vor.u32 %v2788_v46, %v2354_v47 }
  0x4f   : > { %1272 = vmatpush.bf16.msrb.mxu0 %v2433_v54  ;;  %v2727_v54 = vld [vmem:[%s2978_s28 + $0x194] sm:$0xf0]  ;;  %v2485_v56 = vor.u32 %v2820_v48, %v2482_v50  ;;  %v2338_v59 = vld [vmem:[%s2978_s28 + $0x370] sm:$0xf0]  ;;  %v2816_v60 = vld [vmem:[%s2978_s28 + $0x464] sm:$0xf] }
  0x50   : > { %1285 = vmatpush.bf16.msrb.mxu1 %v1925_v57  ;;  %v1977_v57 = vor.u32 %v2695_v52, %v1976_v51  ;;  %v2105_v61 = vor.u32 %v2727_v54, %v2104_v53  ;;  %v1960_v63 = vld [vmem:[%s2978_s28 + $0x68] sm:$0xf]  ;;  %v2691_v0 = vld [vmem:[%s2978_s28 + $0x74] sm:$0xf0]  ;;  %v2780_v6 = vld [vmem:[%s2978_s28 + $0x344] sm:$0xf] }
  0x51   : > { %1298 = vmatpush.bf16.msrb.mxu2 %v2053_v58  ;;  %v2784_v58 = vld [vmem:[%s2978_s28 + $0x364] sm:$0xf]  ;;  %v2088_v1 = vld [vmem:[%s2978_s28 + $0x168] sm:$0xf]  ;;  %v2723_v2 = vld [vmem:[%s2978_s28 + $0x174] sm:$0xf0] }
  0x52   : > { %1311 = vmatpush.bf16.msrb.mxu3 %v2181_v62  ;;  %v2466_v62 = vld [vmem:[%s2978_s28 + $0x470] sm:$0xf0]  ;;  %v2341_v3 = vor.u32 %v2784_v58, %v2338_v59  ;;  %v2812_v8 = vld [vmem:[%s2978_s28 + $0x444] sm:$0xf]  ;;  %v1944_v11 = vld [vmem:[%s2978_s28 + $0x48] sm:$0xf] }
  0x53   : > { %1273 = vmatpush.bf16.msrb.mxu0 %v2417_v5  ;;  %v2469_v4 = vor.u32 %v2816_v60, %v2466_v62  ;;  %v1961_v5 = vor.u32 %v2691_v0, %v1960_v63  ;;  %v2322_v7 = vld [vmem:[%s2978_s28 + $0x350] sm:$0xf0]  ;;  %v2687_v12 = vld [vmem:[%s2978_s28 + $0x54] sm:$0xf0]  ;;  %v2776_v18 = vld [vmem:[%s2978_s28 + $0x324] sm:$0xf] }
  0x54   : > { %1286 = vmatpush.bf16.msrb.mxu1 %v1909_v9  ;;  %v2089_v9 = vor.u32 %v2723_v2, %v2088_v1  ;;  %v1945_v17 = vor.u32 %v2687_v12, %v1944_v11  ;;  %v2306_v19 = vld [vmem:[%s2978_s28 + $0x330] sm:$0xf0]  ;;  %v1928_v23 = vld [vmem:[%s2978_s28 + $0x28] sm:$0xf]  ;;  %v2683_v24 = vld [vmem:[%s2978_s28 + $0x34] sm:$0xf0] }
  0x55   : > { %1299 = vmatpush.bf16.msrb.mxu2 %v2037_v10  ;;  %v2450_v10 = vld [vmem:[%s2978_s28 + $0x450] sm:$0xf0]  ;;  %v2056_v25 = vld [vmem:[%s2978_s28 + $0x128] sm:$0xf]  ;;  %v1929_v36 = vor.u32 %v2683_v24, %v1928_v23  ;;  %v2679_v41 = vld [vmem:[%s2978_s28 + $0x14] sm:$0xf0] }
  0x56   : > { %1312 = vmatpush.bf16.msrb.mxu3 %v2165_v13  ;;  %1274 = vmatmul.bf16.vlgmr.msrb.gmra.mxu0 %v3142_v26  ;;  %v2072_v13 = vld [vmem:[%s2978_s28 + $0x148] sm:$0xf]  ;;  %v2434_v22 = vld [vmem:[%s2978_s28 + $0x430] sm:$0xf0]  ;;  %v2803_v48 = vld [vmem:[%s2978_s28 + $0x3f4] sm:$0xf0] }
  0x57   : > { %1318 = vmatpush.bf16.msra.mxu0 %v2405_v14  ;;  %1287 = vmatmul.bf16.vlgmr.msrb.gmra.mxu1 %v3091_v28  ;;  %v2719_v14 = vld [vmem:[%s2978_s28 + $0x154] sm:$0xf0]  ;;  %v2290_v33 = vld [vmem:[%s2978_s28 + $0x310] sm:$0xf0]  ;;  %v1912_v39 = vld [vmem:[%s2978_s28 + $0x8] sm:$0xf] }
  0x58   : > { %1331 = vmatpush.bf16.msra.mxu1 %v2533_v15  ;;  %1300 = vmatmul.bf16.vlgmr.msrb.gmra.mxu2 %v3099_v35  ;;  %v2325_v15 = vor.u32 %v2780_v6, %v2322_v7  ;;  %v2073_v21 = vor.u32 %v2719_v14, %v2072_v13  ;;  %v2418_v38 = vld [vmem:[%s2978_s28 + $0x410] sm:$0xf0]  ;;  %v2040_v42 = vld [vmem:[%s2978_s28 + $0x108] sm:$0xf]  ;;  %v2835_v50 = vld [vmem:[%s2978_s28 + $0x4f4] sm:$0xf0]  ;;  %v1913_v52 = vor.u32 %v2679_v41, %v1912_v39 }
  0x59   : > { %1344 = vmatpush.bf16.msra.mxu2 %v2025_v16  ;;  %1313 = vmatmul.bf16.vlgmr.msrb.gmra.mxu3 %v3093_v29  ;;  %v2453_v16 = vor.u32 %v2812_v8, %v2450_v10  ;;  %v2408_v46 = vld [vmem:[%s2978_s28 + $0x3e8] sm:$0xf]  ;;  %v2705_v53 = vld [vmem:[%s2978_s28 + $0xec] sm:$0xf]  ;;  %v2026_v54 = vld [vmem:[%s2978_s28 + $0xf8] sm:$0xf0] }
  0x5a   : > { %1357 = vmatpush.bf16.msra.mxu3 %v2153_v20  ;;  %v2808_v20 = vld [vmem:[%s2978_s28 + $0x424] sm:$0xf]  ;;  %v2264_v59 = vld [vmem:[%s2978_s28 + $0x2c8] sm:$0xf]  ;;  %v2767_v60 = vld [vmem:[%s2978_s28 + $0x2d4] sm:$0xf0]  ;;  %v2029_v62 = vor.u32 %v2705_v53, %v2026_v54 }
  0x5b   : > { %1319 = vmatpush.bf16.msra.mxu0 %v2389_v27  ;;  %v2715_v27 = vld [vmem:[%s2978_s28 + $0x134] sm:$0xf0]  ;;  %v2437_v34 = vor.u32 %v2808_v20, %v2434_v22  ;;  %v2520_v0 = vld [vmem:[%s2978_s28 + $0x4c8] sm:$0xf]  ;;  %v2701_v2 = vld [vmem:[%s2978_s28 + $0xcc] sm:$0xf] }
  0x5c   : > { %1332 = vmatpush.bf16.msra.mxu1 %v2517_v31  ;;  %v2309_v31 = vor.u32 %v2776_v18, %v2306_v19  ;;  %v2057_v40 = vor.u32 %v2715_v27, %v2056_v25  ;;  %v2799_v63 = vld [vmem:[%s2978_s28 + $0x3d4] sm:$0xf0]  ;;  %v2248_v7 = vld [vmem:[%s2978_s28 + $0x2a8] sm:$0xf]  ;;  %v2697_v14 = vld [vmem:[%s2978_s28 + $0xac] sm:$0xf] }
  0x5d   : > { %1345 = vmatpush.bf16.msra.mxu2 %v2009_v32  ;;  %v2772_v32 = vld [vmem:[%s2978_s28 + $0x304] sm:$0xf]  ;;  %v2831_v1 = vld [vmem:[%s2978_s28 + $0x4d4] sm:$0xf0]  ;;  %v2504_v12 = vld [vmem:[%s2978_s28 + $0x4a8] sm:$0xf] }
  0x5e   : > { %1358 = vmatpush.bf16.msra.mxu3 %v2137_v37  ;;  %v2804_v37 = vld [vmem:[%s2978_s28 + $0x404] sm:$0xf]  ;;  %v2293_v47 = vor.u32 %v2772_v32, %v2290_v33  ;;  %v2521_v6 = vor.u32 %v2831_v1, %v2520_v0  ;;  %v2763_v8 = vld [vmem:[%s2978_s28 + $0x2b4] sm:$0xf0]  ;;  %v2232_v19 = vld [vmem:[%s2978_s28 + $0x288] sm:$0xf] }
  0x5f   : > { %1320 = vmatpush.bf16.msra.mxu0 %v2373_v43  ;;  %v2711_v43 = vld [vmem:[%s2978_s28 + $0x114] sm:$0xf0]  ;;  %v2421_v51 = vor.u32 %v2804_v37, %v2418_v38  ;;  %v2488_v24 = vld [vmem:[%s2978_s28 + $0x488] sm:$0xf]  ;;  %v2693_v27 = vld [vmem:[%s2978_s28 + $0x8c] sm:$0xf] }
  0x60   : > { %1333 = vmatpush.bf16.msra.mxu1 %v2501_v44  ;;  %v2280_v44 = vld [vmem:[%s2978_s28 + $0x2e8] sm:$0xf]  ;;  %v2795_v11 = vld [vmem:[%s2978_s28 + $0x3b4] sm:$0xf0] }
  0x61   : > { %1346 = vmatpush.bf16.msra.mxu2 %v1993_v45  ;;  %v2771_v45 = vld [vmem:[%s2978_s28 + $0x2f4] sm:$0xf0]  ;;  %v2344_v38 = vld [vmem:[%s2978_s28 + $0x368] sm:$0xf] }
  0x62   : > { %1359 = vmatpush.bf16.msra.mxu3 %v2121_v49  ;;  %v2536_v49 = vld [vmem:[%s2978_s28 + $0x4e8] sm:$0xf]  ;;  %v2827_v13 = vld [vmem:[%s2978_s28 + $0x4b4] sm:$0xf0] }
  0x63   : > { %1321 = vmatpush.bf16.msra.mxu0 %v2357_v55  ;;  %v2041_v55 = vor.u32 %v2711_v43, %v2040_v42  ;;  %v2537_v58 = vor.u32 %v2835_v50, %v2536_v49  ;;  %v2505_v18 = vor.u32 %v2827_v13, %v2504_v12  ;;  %v2759_v20 = vld [vmem:[%s2978_s28 + $0x294] sm:$0xf0]  ;;  %v2472_v41 = vld [vmem:[%s2978_s28 + $0x468] sm:$0xf]  ;;  %v2689_v43 = vld [vmem:[%s2978_s28 + $0x6c] sm:$0xf] }
  0x64   : > { %1334 = vmatpush.bf16.msra.mxu1 %v2485_v56  ;;  %v2281_v56 = vor.u32 %v2771_v45, %v2280_v44  ;;  %v2791_v23 = vld [vmem:[%s2978_s28 + $0x394] sm:$0xf0]  ;;  %v2233_v32 = vor.u32 %v2759_v20, %v2232_v19  ;;  %v1962_v44 = vld [vmem:[%s2978_s28 + $0x78] sm:$0xf0]  ;;  %v2328_v50 = vld [vmem:[%s2978_s28 + $0x348] sm:$0xf] }
  0x65   : > { %1347 = vmatpush.bf16.msra.mxu2 %v1977_v57  ;;  %v2409_v57 = vor.u32 %v2803_v48, %v2408_v46  ;;  %v2823_v25 = vld [vmem:[%s2978_s28 + $0x494] sm:$0xf0]  ;;  %v2200_v48 = vld [vmem:[%s2978_s28 + $0x248] sm:$0xf]  ;;  %v2769_v19 = vld [vmem:[%s2978_s28 + $0x2ec] sm:$0xf] }
  0x66   : > { %1360 = vmatpush.bf16.msra.mxu3 %v2105_v61  ;;  %v2392_v61 = vld [vmem:[%s2978_s28 + $0x3c8] sm:$0xf]  ;;  %v2755_v37 = vld [vmem:[%s2978_s28 + $0x274] sm:$0xf0] }
  0x67   : > { %1322 = vmatpush.bf16.msra.mxu0 %v2341_v3  ;;  %v2010_v3 = vld [vmem:[%s2978_s28 + $0xd8] sm:$0xf0]  ;;  %v2819_v42 = vld [vmem:[%s2978_s28 + $0x474] sm:$0xf0]  ;;  %v2456_v53 = vld [vmem:[%s2978_s28 + $0x448] sm:$0xf] }
  0x68   : > { %1335 = vmatpush.bf16.msra.mxu1 %v2469_v4  ;;  %v2265_v4 = vor.u32 %v2767_v60, %v2264_v59  ;;  %v2013_v10 = vor.u32 %v2701_v2, %v2010_v3  ;;  %v2751_v49 = vld [vmem:[%s2978_s28 + $0x254] sm:$0xf0]  ;;  %v2184_v60 = vld [vmem:[%s2978_s28 + $0x228] sm:$0xf]  ;;  %v2681_v3 = vld [vmem:[%s2978_s28 + $0x2c] sm:$0xf] }
  0x69   : > { %1348 = vmatpush.bf16.msra.mxu2 %v1961_v5  ;;  %v2393_v5 = vor.u32 %v2799_v63, %v2392_v61  ;;  %v2815_v54 = vld [vmem:[%s2978_s28 + $0x454] sm:$0xf0]  ;;  %v2440_v1 = vld [vmem:[%s2978_s28 + $0x428] sm:$0xf] }
  0x6a   : > { %1361 = vmatpush.bf16.msra.mxu3 %v2089_v9  ;;  %v2376_v9 = vld [vmem:[%s2978_s28 + $0x3a8] sm:$0xf]  ;;  %v2457_v59 = vor.u32 %v2815_v54, %v2456_v53  ;;  %v2747_v61 = vld [vmem:[%s2978_s28 + $0x234] sm:$0xf0]  ;;  %v2250_v53 = vld [vmem:[%s2978_s28 + $0x2b8] sm:$0xf0] }
  0x6b   : > { %1323 = vmatpush.bf16.msra.mxu0 %v2325_v15  ;;  %v1994_v15 = vld [vmem:[%s2978_s28 + $0xb8] sm:$0xf0]  ;;  %v2779_v0 = vld [vmem:[%s2978_s28 + $0x334] sm:$0xf0]  ;;  %v2424_v12 = vld [vmem:[%s2978_s28 + $0x408] sm:$0xf] }
  0x6c   : > { %1336 = vmatpush.bf16.msra.mxu1 %v2453_v16  ;;  %v2249_v16 = vor.u32 %v2763_v8, %v2248_v7  ;;  %v1997_v22 = vor.u32 %v2697_v14, %v1994_v15  ;;  %v2811_v2 = vld [vmem:[%s2978_s28 + $0x434] sm:$0xf0]  ;;  %v2677_v15 = vld [vmem:[%s2978_s28 + $0xc] sm:$0xf] }
  0x6d   : > { %1349 = vmatpush.bf16.msra.mxu2 %v1945_v17  ;;  %v2377_v17 = vor.u32 %v2795_v11, %v2376_v9  ;;  %v2743_v7 = vld [vmem:[%s2978_s28 + $0x214] sm:$0xf0]  ;;  %v2441_v9 = vor.u32 %v2811_v2, %v2440_v1  ;;  %v2793_v54 = vld [vmem:[%s2978_s28 + $0x3ac] sm:$0xf]  ;;  %v2234_v1 = vld [vmem:[%s2978_s28 + $0x298] sm:$0xf0] }
  0x6e   : > { %1362 = vmatpush.bf16.msra.mxu3 %v2073_v21  ;;  %v2360_v21 = vld [vmem:[%s2978_s28 + $0x388] sm:$0xf]  ;;  %v2775_v11 = vld [vmem:[%s2978_s28 + $0x314] sm:$0xf0]  ;;  %v2789_v2 = vld [vmem:[%s2978_s28 + $0x38c] sm:$0xf] }
  0x6f   : > { %1324 = vmatpush.bf16.msra.mxu0 %v2309_v31  ;;  %v1978_v31 = vld [vmem:[%s2978_s28 + $0x98] sm:$0xf0]  ;;  %v2361_v33 = vor.u32 %v2791_v23, %v2360_v21  ;;  %v2807_v14 = vld [vmem:[%s2978_s28 + $0x414] sm:$0xf0] }
  0x70   : > { %1337 = vmatpush.bf16.msra.mxu1 %v2437_v34  ;;  %v2489_v34 = vor.u32 %v2823_v25, %v2488_v24  ;;  %v1981_v39 = vor.u32 %v2693_v27, %v1978_v31  ;;  %v2282_v21 = vld [vmem:[%s2978_s28 + $0x2f8] sm:$0xf0]  ;;  %v2425_v25 = vor.u32 %v2807_v14, %v2424_v12  ;;  %v2833_v27 = vld [vmem:[%s2978_s28 + $0x4ec] sm:$0xf] }
  0x71   : > { %1350 = vmatpush.bf16.msra.mxu2 %v1929_v36  ;;  %v2216_v36 = vld [vmem:[%s2978_s28 + $0x268] sm:$0xf]  ;;  %v2410_v23 = vld [vmem:[%s2978_s28 + $0x3f8] sm:$0xf0] }
  0x72   : > { %1363 = vmatpush.bf16.msra.mxu3 %v2057_v40  ;;  %v2787_v40 = vld [vmem:[%s2978_s28 + $0x374] sm:$0xf0]  ;;  %v2217_v45 = vor.u32 %v2755_v37, %v2216_v36  ;;  %v2538_v31 = vld [vmem:[%s2978_s28 + $0x4f8] sm:$0xf0]  ;;  %v2733_v37 = vld [vmem:[%s2978_s28 + $0x1cc] sm:$0xf] }
  0x73   : > { %1325 = vmatpush.bf16.msra.mxu0 %v2293_v47  ;;  %v2345_v46 = vor.u32 %v2787_v40, %v2344_v38  ;;  %v2473_v47 = vor.u32 %v2819_v42, %v2472_v41  ;;  %v2138_v38 = vld [vmem:[%s2978_s28 + $0x1d8] sm:$0xf0]  ;;  %v2541_v40 = vor.u32 %v2833_v27, %v2538_v31  ;;  %v2797_v42 = vld [vmem:[%s2978_s28 + $0x3cc] sm:$0xf] }
  0x74   : > { %1338 = vmatpush.bf16.msra.mxu1 %v2421_v51  ;;  %v1965_v51 = vor.u32 %v2689_v43, %v1962_v44  ;;  %v2266_v41 = vld [vmem:[%s2978_s28 + $0x2d8] sm:$0xf0]  ;;  %v2829_v44 = vld [vmem:[%s2978_s28 + $0x4cc] sm:$0xf] }
  0x75   : > { %1351 = vmatpush.bf16.msra.mxu2 %v1913_v52  ;;  %v2783_v52 = vld [vmem:[%s2978_s28 + $0x354] sm:$0xf0]  ;;  %v2394_v43 = vld [vmem:[%s2978_s28 + $0x3d8] sm:$0xf0]  ;;  %v2813_v31 = vld [vmem:[%s2978_s28 + $0x44c] sm:$0xf] }
  0x76   : > { %1364 = vmatpush.bf16.msra.mxu3 %v2041_v55  ;;  %1326 = vmatmul.bf16.vlgmr.msra.gmra.mxu0 %v3095_v30  ;;  %v2685_v55 = vld [vmem:[%s2978_s28 + $0x4c] sm:$0xf]  ;;  %v2218_v12 = vld [vmem:[%s2978_s28 + $0x278] sm:$0xf0] }
  0x77   : > { %1370 = vmatpush.bf16.msrb.mxu0 %v2281_v56  ;;  %1339 = vmatmul.bf16.vlgmr.msra.gmra.mxu1 %v3142_v26  ;;  %v1946_v56 = vld [vmem:[%s2978_s28 + $0x58] sm:$0xf0] }
  0x78   : > { %1383 = vmatpush.bf16.msrb.mxu1 %v2409_v57  ;;  %1352 = vmatmul.bf16.vlgmr.msra.gmra.mxu2 %v3091_v28  ;;  %v2201_v57 = vor.u32 %v2751_v49, %v2200_v48  ;;  %v1949_v63 = vor.u32 %v2685_v55, %v1946_v56  ;;  %v2397_v48 = vor.u32 %v2797_v42, %v2394_v43  ;;  %v2729_v49 = vld [vmem:[%s2978_s28 + $0x1ac] sm:$0xf]  ;;  %v2378_v55 = vld [vmem:[%s2978_s28 + $0x3b8] sm:$0xf0] }
  0x79   : > { %1396 = vmatpush.bf16.msrb.mxu2 %v2537_v58  ;;  %1365 = vmatmul.bf16.vlgmr.msra.gmra.mxu3 %v3099_v35  ;;  %v2329_v58 = vor.u32 %v2783_v52, %v2328_v50  ;;  %v2122_v50 = vld [vmem:[%s2978_s28 + $0x1b8] sm:$0xf0]  ;;  %v2825_v56 = vld [vmem:[%s2978_s28 + $0x4ac] sm:$0xf] }
  0x7a   : > { %1409 = vmatpush.bf16.msrb.mxu3 %v2029_v62  ;;  %v2312_v62 = vld [vmem:[%s2978_s28 + $0x328] sm:$0xf]  ;;  %v2346_v14 = vld [vmem:[%s2978_s28 + $0x378] sm:$0xf0]  ;;  %v2777_v42 = vld [vmem:[%s2978_s28 + $0x32c] sm:$0xf] }
  0x7b   : > { %1371 = vmatpush.bf16.msrb.mxu0 %v2265_v4  ;;  %v1930_v4 = vld [vmem:[%s2978_s28 + $0x38] sm:$0xf0]  ;;  %v2313_v8 = vor.u32 %v2779_v0, %v2312_v62 }
  0x7c   : > { %1384 = vmatpush.bf16.msrb.mxu1 %v2393_v5  ;;  %v2185_v5 = vor.u32 %v2747_v61, %v2184_v60  ;;  %v1933_v13 = vor.u32 %v2681_v3, %v1930_v4  ;;  %v2381_v60 = vor.u32 %v2793_v54, %v2378_v55  ;;  %v2725_v61 = vld [vmem:[%s2978_s28 + $0x18c] sm:$0xf]  ;;  %v2106_v62 = vld [vmem:[%s2978_s28 + $0x198] sm:$0xf0] }
  0x7d   : > { %1397 = vmatpush.bf16.msrb.mxu2 %v2521_v6  ;;  %v2168_v6 = vld [vmem:[%s2978_s28 + $0x208] sm:$0xf]  ;;  %v2362_v3 = vld [vmem:[%s2978_s28 + $0x398] sm:$0xf0]  ;;  %v2821_v4 = vld [vmem:[%s2978_s28 + $0x48c] sm:$0xf] }
  0x7e   : > { %1410 = vmatpush.bf16.msrb.mxu3 %v2013_v10  ;;  %v2296_v10 = vld [vmem:[%s2978_s28 + $0x308] sm:$0xf]  ;;  %v2169_v20 = vor.u32 %v2743_v7, %v2168_v6  ;;  %v2365_v7 = vor.u32 %v2789_v2, %v2362_v3  ;;  %v2330_v27 = vld [vmem:[%s2978_s28 + $0x358] sm:$0xf0]  ;;  %v2773_v54 = vld [vmem:[%s2978_s28 + $0x30c] sm:$0xf] }
  0x7f   : > { %1372 = vmatpush.bf16.msrb.mxu0 %v2249_v16  ;;  %v1914_v16 = vld [vmem:[%s2978_s28 + $0x18] sm:$0xf0]  ;;  %v2297_v24 = vor.u32 %v2775_v11, %v2296_v10  ;;  %v2753_v10 = vld [vmem:[%s2978_s28 + $0x26c] sm:$0xf] }
  0x80   : > { %1385 = vmatpush.bf16.msrb.mxu1 %v2377_v17  ;;  %v2737_v17 = vld [vmem:[%s2978_s28 + $0x1ec] sm:$0xf]  ;;  %v2314_v43 = vld [vmem:[%s2978_s28 + $0x338] sm:$0xf0] }
  0x81   : > { %1398 = vmatpush.bf16.msrb.mxu2 %v2505_v18  ;;  %v2154_v18 = vld [vmem:[%s2978_s28 + $0x1f8] sm:$0xf0] }
  0x82   : > { %1411 = vmatpush.bf16.msrb.mxu3 %v1997_v22  ;;  %v2801_v22 = vld [vmem:[%s2978_s28 + $0x3ec] sm:$0xf]  ;;  %v2298_v55 = vld [vmem:[%s2978_s28 + $0x318] sm:$0xf0] }
  0x83   : > { %1373 = vmatpush.bf16.msrb.mxu0 %v2233_v32  ;;  %v1917_v32 = vor.u32 %v2677_v15, %v1914_v16  ;;  %v2413_v36 = vor.u32 %v2801_v22, %v2410_v23  ;;  %v2817_v15 = vld [vmem:[%s2978_s28 + $0x46c] sm:$0xf]  ;;  %v2474_v16 = vld [vmem:[%s2978_s28 + $0x478] sm:$0xf0] }
  0x84   : > { %1386 = vmatpush.bf16.msrb.mxu1 %v2361_v33  ;;  %v2157_v33 = vor.u32 %v2737_v17, %v2154_v18  ;;  %v2221_v18 = vor.u32 %v2753_v10, %v2218_v12  ;;  %v2749_v22 = vld [vmem:[%s2978_s28 + $0x24c] sm:$0xf]  ;;  %v2477_v23 = vor.u32 %v2817_v15, %v2474_v16 }
  0x85   : > { %1399 = vmatpush.bf16.msrb.mxu2 %v2489_v34  ;;  %v2285_v34 = vor.u32 %v2769_v19, %v2282_v21  ;;  %v2074_v21 = vld [vmem:[%s2978_s28 + $0x158] sm:$0xf0] }
  0x86   : > { %1412 = vmatpush.bf16.msrb.mxu3 %v1981_v39  ;;  %v2765_v39 = vld [vmem:[%s2978_s28 + $0x2cc] sm:$0xf] }
  0x87   : > { %1374 = vmatpush.bf16.msrb.mxu0 %v2217_v45  ;;  %v2522_v45 = vld [vmem:[%s2978_s28 + $0x4d8] sm:$0xf0] }
  0x88   : > { %1387 = vmatpush.bf16.msrb.mxu1 %v2345_v46  ;;  %v2141_v46 = vor.u32 %v2733_v37, %v2138_v38  ;;  %v2525_v52 = vor.u32 %v2829_v44, %v2522_v45  ;;  %v2713_v37 = vld [vmem:[%s2978_s28 + $0x12c] sm:$0xf]  ;;  %v2058_v38 = vld [vmem:[%s2978_s28 + $0x138] sm:$0xf0] }
  0x89   : > { %1400 = vmatpush.bf16.msrb.mxu2 %v2473_v47  ;;  %v2269_v47 = vor.u32 %v2765_v39, %v2266_v41  ;;  %v2745_v39 = vld [vmem:[%s2978_s28 + $0x22c] sm:$0xf]  ;;  %v2186_v41 = vld [vmem:[%s2978_s28 + $0x238] sm:$0xf0] }
  0x8a   : > { %1413 = vmatpush.bf16.msrb.mxu3 %v1965_v51  ;;  %v2761_v51 = vld [vmem:[%s2978_s28 + $0x2ac] sm:$0xf]  ;;  %v2442_v45 = vld [vmem:[%s2978_s28 + $0x438] sm:$0xf0] }
  0x8b   : > { %1375 = vmatpush.bf16.msrb.mxu0 %v2201_v57  ;;  %v2506_v57 = vld [vmem:[%s2978_s28 + $0x4b8] sm:$0xf0]  ;;  %v2809_v44 = vld [vmem:[%s2978_s28 + $0x42c] sm:$0xf] }
  0x8c   : > { %1388 = vmatpush.bf16.msrb.mxu1 %v2329_v58  ;;  %v2125_v58 = vor.u32 %v2729_v49, %v2122_v50  ;;  %v2509_v0 = vor.u32 %v2825_v56, %v2506_v57  ;;  %v2709_v49 = vld [vmem:[%s2978_s28 + $0x10c] sm:$0xf]  ;;  %v2042_v50 = vld [vmem:[%s2978_s28 + $0x118] sm:$0xf0] }
  0x8d   : > { %1401 = vmatpush.bf16.msrb.mxu2 %v2457_v59  ;;  %v2253_v59 = vor.u32 %v2761_v51, %v2250_v53  ;;  %v2741_v51 = vld [vmem:[%s2978_s28 + $0x20c] sm:$0xf]  ;;  %v2170_v53 = vld [vmem:[%s2978_s28 + $0x218] sm:$0xf0] }
  0x8e   : > { %1414 = vmatpush.bf16.msrb.mxu3 %v1949_v63  ;;  %v2757_v63 = vld [vmem:[%s2978_s28 + $0x28c] sm:$0xf]  ;;  %v2426_v57 = vld [vmem:[%s2978_s28 + $0x418] sm:$0xf0] }
  0x8f   : > { %1376 = vmatpush.bf16.msrb.mxu0 %v2185_v5  ;;  %v2109_v5 = vor.u32 %v2725_v61, %v2106_v62  ;;  %v2237_v6 = vor.u32 %v2757_v63, %v2234_v1  ;;  %v2805_v56 = vld [vmem:[%s2978_s28 + $0x40c] sm:$0xf] }
  0x90   : > { %1389 = vmatpush.bf16.msrb.mxu1 %v2313_v8  ;;  %v2721_v8 = vld [vmem:[%s2978_s28 + $0x16c] sm:$0xf]  ;;  %v2429_v61 = vor.u32 %v2805_v56, %v2426_v57 }
  0x91   : > { %1402 = vmatpush.bf16.msrb.mxu2 %v2441_v9  ;;  %v2090_v9 = vld [vmem:[%s2978_s28 + $0x178] sm:$0xf0]  ;;  %v240_v56 = vld [vmem:[#allocation2] sm:$0xff] }
  0x92   : > { %1415 = vmatpush.bf16.msrb.mxu3 %v1933_v13  ;;  %v2785_v13 = vld [vmem:[%s2978_s28 + $0x36c] sm:$0xf]  ;;  %v2093_v17 = vor.u32 %v2721_v8, %v2090_v9 }
  0x93   : > { %1377 = vmatpush.bf16.msrb.mxu0 %v2169_v20  ;;  %v2349_v19 = vor.u32 %v2785_v13, %v2346_v14  ;;  %v2717_v20 = vld [vmem:[%s2978_s28 + $0x14c] sm:$0xf] }
  0x94   : > { %1390 = vmatpush.bf16.msrb.mxu1 %v2297_v24  ;;  %v2202_v24 = vld [vmem:[%s2978_s28 + $0x258] sm:$0xf0] }
  0x95   : > { %1403 = vmatpush.bf16.msrb.mxu2 %v2425_v25  ;;  %v2781_v25 = vld [vmem:[%s2978_s28 + $0x34c] sm:$0xf] }
  0x96   : > { %1416 = vmatpush.bf16.msrb.mxu3 %v1917_v32  ;;  %1378 = vmatmul.bf16.vlgmr.msrb.gmra.mxu0 %v3093_v29  ;;  %v2458_v32 = vld [vmem:[%s2978_s28 + $0x458] sm:$0xf0] }
  0x97   : > { %1422 = vmatpush.bf16.msra.mxu0 %v2157_v33  ;;  %1391 = vmatmul.bf16.vlgmr.msrb.gmra.mxu1 %v3095_v30  ;;  %v2077_v33 = vor.u32 %v2717_v20, %v2074_v21 }
  0x98   : > { %1435 = vmatpush.bf16.msra.mxu1 %v2285_v34  ;;  %1404 = vmatmul.bf16.vlgmr.msrb.gmra.mxu2 %v3142_v26  ;;  %v2205_v34 = vor.u32 %v2749_v22, %v2202_v24 }
  0x99   : > { %1448 = vmatpush.bf16.msra.mxu2 %v2413_v36  ;;  %1417 = vmatmul.bf16.vlgmr.msrb.gmra.mxu3 %v3091_v28  ;;  %v2490_v28 = vld [vmem:[%s2978_s28 + $0x498] sm:$0xf0]  ;;  %v2333_v36 = vor.u32 %v2781_v25, %v2330_v27 }
  0x9a   : > { %1461 = vmatpush.bf16.msra.mxu3 %v2541_v40  ;;  %v2493_v11 = vor.u32 %v2821_v4, %v2490_v28  ;;  %v2461_v40 = vor.u32 %v2813_v31, %v2458_v32 }
  0x9b   : > { %1423 = vmatpush.bf16.msra.mxu0 %v2141_v46  ;;  %v2061_v46 = vor.u32 %v2713_v37, %v2058_v38 }
  0x9c   : > { %1436 = vmatpush.bf16.msra.mxu1 %v2269_v47  ;;  %v2189_v47 = vor.u32 %v2745_v39, %v2186_v41 }
  0x9d   : > { %1449 = vmatpush.bf16.msra.mxu2 %v2397_v48  ;;  %v2317_v48 = vor.u32 %v2777_v42, %v2314_v43 }
  0x9e   : > { %1462 = vmatpush.bf16.msra.mxu3 %v2525_v52  ;;  %v2445_v52 = vor.u32 %v2809_v44, %v2442_v45 }
  0x9f   : > { %1424 = vmatpush.bf16.msra.mxu0 %v2125_v58  ;;  %v2045_v58 = vor.u32 %v2709_v49, %v2042_v50 }
  0xa0   : > { %1437 = vmatpush.bf16.msra.mxu1 %v2253_v59  ;;  %v2173_v59 = vor.u32 %v2741_v51, %v2170_v53 }
  0xa1   : > { %1450 = vmatpush.bf16.msra.mxu2 %v2381_v60  ;;  %v2301_v60 = vor.u32 %v2773_v54, %v2298_v55 }
  0xa2   : > { %1463 = vmatpush.bf16.msra.mxu3 %v2509_v0 }
  0xa3   : > { %1425 = vmatpush.bf16.msra.mxu0 %v2109_v5 }
  0xa4   : > { %1438 = vmatpush.bf16.msra.mxu1 %v2237_v6 }
  0xa5   : > { %1451 = vmatpush.bf16.msra.mxu2 %v2365_v7 }
  0xa6   : > { %1464 = vmatpush.bf16.msra.mxu3 %v2493_v11 }
  0xa7   : > { %1426 = vmatpush.bf16.msra.mxu0 %v2093_v17 }
  0xa8   : > { %1439 = vmatpush.bf16.msra.mxu1 %v2221_v18 }
  0xa9   : > { %1452 = vmatpush.bf16.msra.mxu2 %v2349_v19 }
  0xaa   : > { %1465 = vmatpush.bf16.msra.mxu3 %v2477_v23 }
  0xab   : > { %1427 = vmatpush.bf16.msra.mxu0 %v2077_v33 }
  0xac   : > { %1440 = vmatpush.bf16.msra.mxu1 %v2205_v34 }
  0xad   : > { %1453 = vmatpush.bf16.msra.mxu2 %v2333_v36 }
  0xae   : > { %1466 = vmatpush.bf16.msra.mxu3 %v2461_v40 }
  0xaf   : > { %1428 = vmatpush.bf16.msra.mxu0 %v2061_v46 }
  0xb0   : > { %1441 = vmatpush.bf16.msra.mxu1 %v2189_v47 }
  0xb1   : > { %1454 = vmatpush.bf16.msra.mxu2 %v2317_v48 }
  0xb2   : > { %1467 = vmatpush.bf16.msra.mxu3 %v2445_v52 }
  0xb3   : > { %1429 = vmatpush.bf16.msra.mxu0 %v2045_v58 }
  0xb4   : > { %1442 = vmatpush.bf16.msra.mxu1 %v2173_v59 }
  0xb5   : > { %1455 = vmatpush.bf16.msra.mxu2 %v2301_v60 }
  0xb6   : > { %1468 = vmatpush.bf16.msra.mxu3 %v2429_v61  ;;  %1430 = vmatmul.bf16.vlgmr.msra.gmra.mxu0 %v3099_v35 }
  0xb7   : > { %1443 = vmatmul.bf16.vlgmr.msra.gmra.mxu1 %v3093_v29 }
  0xb8   : > { %1456 = vmatmul.bf16.vlgmr.msra.gmra.mxu2 %v3095_v30 }
  0xb9   : > { %1469 = vmatmul.bf16.vlgmr.msra.gmra.mxu3 %v3142_v26 }
  0xbe   : > { %v1223_v62 = vpop.f32.mrf.mxu0 }
  0xc2   : > { %v1236_v63 = vpop.f32.mrf.mxu1 }
  0xc3   : > { %v1237_v0 = vadd.f32 %v1236_v63, %v1223_v62 }
  0xc5   : > { %v1249_v1 = vpop.f32.mrf.mxu2 }
  0xc6   : > { %v1262_v2 = vpop.f32.mrf.mxu3  ;;  %v1250_v3 = vadd.f32 %v1249_v1, %v1237_v0  ;;  %v1225_v4 = vpop.f32.mrf.mxu0 }
  0xc8   : > { %v1263_v28 = vadd.f32 %v1262_v2, %v1250_v3 }
  0xca   : > { %v1238_v5 = vpop.f32.mrf.mxu1 }
  0xcd   : > { %v1251_v6 = vpop.f32.mrf.mxu2 }
  0xce   : > { %v1264_v7 = vpop.f32.mrf.mxu3 }
  0xd3   : > { %v1275_v8 = vpop.f32.mrf.mxu0 }
  0xd4   : > { %v1276_v9 = vadd.f32 %v1275_v8, %v1263_v28  ;;  %v1288_v35 = vpop.f32.mrf.mxu1 }
  0xdb   : > { %v1301_v10 = vpop.f32.mrf.mxu2  ;;  %v1277_v29 = vpop.f32.mrf.mxu0 }
  0xdc   : > { %v1302_v11 = vadd.f32 %v1301_v10, %v1288_v35  ;;  %v1314_v30 = vpop.f32.mrf.mxu3  ;;  %v1290_v12 = vpop.f32.mrf.mxu1 }
  0xde   : > { %v1315_v26 = vadd.f32 %v1314_v30, %v1302_v11 }
  0xe3   : > { %v1303_v13 = vpop.f32.mrf.mxu2 }
  0xe4   : > { %v1316_v14 = vpop.f32.mrf.mxu3 }
  0xf3   : > { %v1327_v15 = vpop.f32.mrf.mxu0 }
  0xf4   : > { %v1328_v16 = vadd.f32 %v1327_v15, %v1315_v26  ;;  %v1340_v17 = vpop.f32.mrf.mxu1 }
  0xf6   : > { %v1341_v18 = vadd.f32 %v1340_v17, %v1328_v16 }
  0xf8   : > { %v1478_v19 = vrot.slane %v1341_v18, 6 }
  0xfa   : > { %v1482_v20 = vsel %vm1481_vm0, %v1276_v9, %v1478_v19 }
  0xfb   : > { %v1353_v21 = vpop.f32.mrf.mxu2  ;;  %v1329_v22 = vpop.f32.mrf.mxu0 }
  0xfc   : > { %v1366_v23 = vpop.f32.mrf.mxu3  ;;  %v1342_v24 = vpop.f32.mrf.mxu1 }
  0xfd   : > { %v1367_v40 = vadd.f32 %v1366_v23, %v1353_v21 }
 0x103   : > { %v1355_v25 = vpop.f32.mrf.mxu2 }
 0x104   : > { %v1368_v27 = vpop.f32.mrf.mxu3 }
 0x113   : > { %v1379_v31 = vpop.f32.mrf.mxu0 }
 0x114   : > { %v1392_v32 = vpop.f32.mrf.mxu1  ;;  %v1380_v41 = vadd.f32 %v1379_v31, %v1367_v40 }
 0x116   : > { %v1393_v45 = vadd.f32 %v1392_v32, %v1380_v41 }
 0x11b   : > { %v1405_v33 = vpop.f32.mrf.mxu2  ;;  %v1381_v36 = vpop.f32.mrf.mxu0 }
 0x11c   : > { %v1418_v34 = vpop.f32.mrf.mxu3  ;;  %v1394_v37 = vpop.f32.mrf.mxu1  ;;  %v1406_v48 = vadd.f32 %v1405_v33, %v1393_v45 }
 0x11e   : > { %v1479_v54 = vrot.slane %v1406_v48, 4 }
 0x123   : > { %v1407_v38 = vpop.f32.mrf.mxu2 }
 0x124   : > { %v1420_v39 = vpop.f32.mrf.mxu3 }
 0x133   : > { %v1431_v42 = vpop.f32.mrf.mxu0 }
 0x134   : > { %v1444_v43 = vpop.f32.mrf.mxu1  ;;  %v1432_v44 = vadd.f32 %v1431_v42, %v1418_v34 }
 0x136   : > { %v1445_v46 = vadd.f32 %v1444_v43, %v1432_v44 }
 0x13b   : > { %v1457_v47 = vpop.f32.mrf.mxu2  ;;  %v1433_v51 = vpop.f32.mrf.mxu0 }
 0x13c   : > { %v1458_v49 = vadd.f32 %v1457_v47, %v1445_v46  ;;  %v1470_v50 = vpop.f32.mrf.mxu3  ;;  %v1446_v52 = vpop.f32.mrf.mxu1 }
 0x13e   : > { %v1471_v53 = vadd.f32 %v1470_v50, %v1458_v49 }
 0x140   : > { %v1480_v55 = vrot.slane %v1471_v53, 2 }
 0x142   : > { %v1484_v57 = vsel %vm1483_vm1, %v1479_v54, %v1480_v55  ;;  %1493 = sbr.rel (%p2542_p6) target bundleno = 502 (0x1f6), region = 48 }
 0x143   : > { %v1486_v58 = vsel %vm1485_vm2, %v1482_v20, %v1484_v57  ;;  %v1459_v59 = vpop.f32.mrf.mxu2 }
 0x144   : > { %v1488_v60 = vadd.f32 %v1486_v58, %v240_v56  ;;  %v1472_v61 = vpop.f32.mrf.mxu3 }
 0x146   : > { %1489 = vst [vmem:[#allocation2] sm:$0xff] %v1488_v60 }
 0x147   : > { %v2843_v62 = vld [vmem:[%s3455_s3 + $0x38] sm:$0xff]  ;;  %v2842_v2 = vld [vmem:[%s3455_s3 + $0x30] sm:$0xff]  ;;  %v2841_v5 = vld [vmem:[%s3455_s3 + $0x28] sm:$0xff]  ;;  %vm1836_vm3 = vcmask 25600  }
 0x148   : > { %v2851_v63 = vld [vmem:[%s3455_s3 + $0x78] sm:$0xff]  ;;  %1784 = vmatpush.bf16.msra.mxu0 %v2843_v62  ;;  %v2850_v3 = vld [vmem:[%s3455_s3 + $0x70] sm:$0xff]  ;;  %v2849_v6 = vld [vmem:[%s3455_s3 + $0x68] sm:$0xff] }
 0x149   : > { %v2859_v0 = vld [vmem:[%s3455_s3 + $0xb8] sm:$0xff]  ;;  %1797 = vmatpush.bf16.msra.mxu1 %v2851_v63  ;;  %v2858_v4 = vld [vmem:[%s3455_s3 + $0xb0] sm:$0xff]  ;;  %v2857_v7 = vld [vmem:[%s3455_s3 + $0xa8] sm:$0xff] }
 0x14a   : > { %v2867_v1 = vld [vmem:[%s3455_s3 + $0xf8] sm:$0xff]  ;;  %1810 = vmatpush.bf16.msra.mxu2 %v2859_v0  ;;  %v2866_v28 = vld [vmem:[%s3455_s3 + $0xf0] sm:$0xff]  ;;  %v2865_v8 = vld [vmem:[%s3455_s3 + $0xe8] sm:$0xff] }
 0x14b   : > { %1823 = vmatpush.bf16.msra.mxu3 %v2867_v1  ;;  %v2840_v9 = vld [vmem:[%s3455_s3 + $0x20] sm:$0xff]  ;;  %v2839_v14 = vld [vmem:[%s3455_s3 + $0x18] sm:$0xff]  ;;  %v2838_v25 = vld [vmem:[%s3455_s3 + $0x10] sm:$0xff] }
 0x14c   : > { %1785 = vmatpush.bf16.msra.mxu0 %v2842_v2  ;;  %v2848_v35 = vld [vmem:[%s3455_s3 + $0x60] sm:$0xff]  ;;  %v2847_v15 = vld [vmem:[%s3455_s3 + $0x58] sm:$0xff]  ;;  %v2846_v27 = vld [vmem:[%s3455_s3 + $0x50] sm:$0xff] }
 0x14d   : > { %1798 = vmatpush.bf16.msra.mxu1 %v2850_v3  ;;  %v2856_v10 = vld [vmem:[%s3455_s3 + $0xa0] sm:$0xff]  ;;  %v2855_v19 = vld [vmem:[%s3455_s3 + $0x98] sm:$0xff]  ;;  %v1494_v21 = vld [vmem:[#allocation2] sm:$0xff] }
 0x14e   : > { %1811 = vmatpush.bf16.msra.mxu2 %v2858_v4  ;;  %v2864_v29 = vld [vmem:[%s3455_s3 + $0xe0] sm:$0xff]  ;;  %v2863_v20 = vld [vmem:[%s3455_s3 + $0xd8] sm:$0xff]  ;;  %v2854_v32 = vld [vmem:[%s3455_s3 + $0x90] sm:$0xff] }
 0x14f   : > { %1824 = vmatpush.bf16.msra.mxu3 %v2866_v28  ;;  %v1495_v11 = vld [vmem:[%s3454_s2] sm:$0xf]  ;;  %v2862_v33 = vld [vmem:[%s3455_s3 + $0xd0] sm:$0xff]  ;;  %v2837_v36 = vld [vmem:[%s3455_s3 + $0x8] sm:$0xff] }
 0x150   : > { %1786 = vmatpush.bf16.msra.mxu0 %v2841_v5  ;;  %v1497_v30 = vperm.slane %v1495_v11, 0  ;;  %v1498_v12 = vperm.slane %v1495_v11, 1  ;;  %v1499_v26 = vperm.slane %v1495_v11, 2  ;;  %v1500_v13 = vperm.slane %v1495_v11, 3  ;;  %v2845_v37 = vld [vmem:[%s3455_s3 + $0x48] sm:$0xff]  ;;  %v2836_v40 = vld [vmem:[%s3455_s3] sm:$0xff] }
 0x151   : > { %1799 = vmatpush.bf16.msra.mxu1 %v2849_v6  ;;  %v2853_v38 = vld [vmem:[%s3455_s3 + $0x88] sm:$0xff]  ;;  %v2844_v41 = vld [vmem:[%s3455_s3 + $0x40] sm:$0xff] }
 0x152   : > { %1812 = vmatpush.bf16.msra.mxu2 %v2857_v7  ;;  %v1501_v16 = vrot.slane %v1498_v12, 6  ;;  %v1502_v17 = vrot.slane %v1499_v26, 4  ;;  %v1503_v18 = vrot.slane %v1500_v13, 2  ;;  %v2861_v39 = vld [vmem:[%s3455_s3 + $0xc8] sm:$0xff]  ;;  %v2852_v42 = vld [vmem:[%s3455_s3 + $0x80] sm:$0xff] }
 0x153   : > { %1825 = vmatpush.bf16.msra.mxu3 %v2865_v8  ;;  %v2860_v43 = vld [vmem:[%s3455_s3 + $0xc0] sm:$0xff] }
 0x154   : > { %1787 = vmatpush.bf16.msra.mxu0 %v2840_v9  ;;  %v1504_v22 = vsel %vm1481_vm0, %v1497_v30, %v1501_v16  ;;  %v1505_v23 = vsel %vm1483_vm1, %v1502_v17, %v1503_v18  ;;  %v2884_v52 = vld [vmem:[%s3456_s4] ss:$0 sm:$0xff] }
 0x155   : > { %1800 = vmatpush.bf16.msra.mxu1 %v2848_v35  ;;  %v1506_v24 = vsel %vm1485_vm2, %v1504_v22, %v1505_v23 }
 0x156   : > { %1813 = vmatpush.bf16.msra.mxu2 %v2856_v10  ;;  %v1508_v31 = vadd.f32 %v1506_v24, %v1494_v21 }
 0x157   : > { %1826 = vmatpush.bf16.msra.mxu3 %v2864_v29 }
 0x158   : > { %1788 = vmatpush.bf16.msra.mxu0 %v2839_v14  ;;  %v1509_v34 = vmax.f32 %v1508_v31, 0.0 }
 0x159   : > { %1801 = vmatpush.bf16.msra.mxu1 %v2847_v15 }
 0x15a   : > { %1814 = vmatpush.bf16.msra.mxu2 %v2855_v19  ;;  %1511 = vst [vmem:[#allocation1] ss:$4 sm:$0xff] %v1509_v34 }
 0x15b   : > { %1827 = vmatpush.bf16.msra.mxu3 %v2863_v20 }
 0x15c   : > { %1789 = vmatpush.bf16.msra.mxu0 %v2838_v25 }
 0x15d   : > { %1802 = vmatpush.bf16.msra.mxu1 %v2846_v27 }
 0x15e   : > { %1815 = vmatpush.bf16.msra.mxu2 %v2854_v32 }
 0x15f   : > { %1828 = vmatpush.bf16.msra.mxu3 %v2862_v33 }
 0x160   : > { %1790 = vmatpush.bf16.msra.mxu0 %v2837_v36 }
 0x161   : > { %1803 = vmatpush.bf16.msra.mxu1 %v2845_v37  ;;  %v1512_v44 = vld.sshfl [vmem:[#allocation1] sm:$0xff pattern:$0x73625140]  ;;  %v1513_v45 = vld.sshfl [vmem:[#allocation1 + $0x8] sm:$0xff pattern:$0x73625140] }
 0x162   : > { %1816 = vmatpush.bf16.msra.mxu2 %v2853_v38  ;;  %v1520_v46 = vpack.c.bf16 %v1512_v44, %v1512_v44  ;;  %v1521_v47 = vpack.c.bf16 %v1513_v45, %v1513_v45  ;;  %v1514_v48 = vld.sshfl [vmem:[#allocation1 + $0x10] sm:$0xff pattern:$0x73625140]  ;;  %v1515_v49 = vld.sshfl [vmem:[#allocation1 + $0x18] sm:$0xff pattern:$0x73625140] }
 0x163   : > { %1829 = vmatpush.bf16.msra.mxu3 %v2861_v39  ;;  %v1522_v50 = vpack.c.bf16 %v1514_v48, %v1514_v48  ;;  %v1523_v51 = vpack.c.bf16 %v1515_v49, %v1515_v49 }
 0x164   : > { %1791 = vmatpush.bf16.msra.mxu0 %v2836_v40 }
 0x165   : > { %1804 = vmatpush.bf16.msra.mxu1 %v2844_v41 }
 0x166   : > { %1817 = vmatpush.bf16.msra.mxu2 %v2852_v42 }
 0x167   : > { %1830 = vmatpush.bf16.msra.mxu3 %v2860_v43  ;;  %1792 = vmatmul.bf16.vlgmr.msra.gmra.mxu0 %v1520_v46 }
 0x168   : > { %1805 = vmatmul.bf16.vlgmr.msra.gmra.mxu1 %v1521_v47 }
 0x169   : > { %1818 = vmatmul.bf16.vlgmr.msra.gmra.mxu2 %v1522_v50 }
 0x16a   : > { %1831 = vmatmul.bf16.vlgmr.msra.gmra.mxu3 %v1523_v51 }
 0x1e4   : > { %v1793_v53 = vpop.f32.mrf.mxu0 }
 0x1e5   : > { %v1806_v54 = vpop.f32.mrf.mxu1  ;;  %v1794_v55 = vadd.f32 %v2884_v52, %v1793_v53 }
 0x1e7   : > { %v1807_v56 = vadd.f32 %v1806_v54, %v1794_v55 }
 0x1ec   : > { %v1819_v57 = vpop.f32.mrf.mxu2  ;;  %v1795_v60 = vpop.f32.mrf.mxu0 }
 0x1ed   : > { %v1832_v58 = vpop.f32.mrf.mxu3  ;;  %v1820_v59 = vadd.f32 %v1819_v57, %v1807_v56  ;;  %v1808_v61 = vpop.f32.mrf.mxu1 }
 0x1ef   : > { %v1833_v62 = vadd.f32 %v1832_v58, %v1820_v59 }
 0x1f1   : > { %1837 = vst.msk [vmem:[#allocation3] sm:$0x3] %vm1836_vm3, %v1833_v62 }
 0x1f4   : > { %v1821_v63 = vpop.f32.mrf.mxu2 }
 0x1f5   : > { %v1834_v0 = vpop.f32.mrf.mxu3 }
 0x1f6 PF: > { %p2872_p7 = scmp.eq.s32.totalorder %s2963_s19, 4  ;;  %s2926_s30 = smov [#allocation3]  }
 0x1f7   : > { %s1844_s6 = sshll.u32 %s2926_s30, 4  ;;  %s1846_s9 = sshll.u32 %s3457_s5, 4  ;;  %s1845_s6 = int_to_ptr.vmem [resolvable:$true] %s1844_s6  ;;  %s1847_s9 = int_to_ptr.hbm [resolvable:$true] %s1846_s9 }
 0x1f8   : > { %2869 = dma.vmem_to_hbm [thread:$0]  (%p2872_p7), %s1845_s6, 32, %s1847_s9, [#allocation4]  }
 0x1f9   : > { %2918 = dma.done.wait (%p2872_p7), [#allocation4], 32  }
 0x1fa   : > { %2920 = vsyncadd (%p2872_p7), [#allocation4], 4294967264 }
 0x1fb PF: > { %s16_s18 = sadd.s32 1, %s2923_s18  }
 0x1fc   : > { %p13_p8 = scmp.ge.s32.totalorder %s16_s18, 7  }
 0x1fe   :  { %15 = sbr.rel (!%p13_p8) target bundleno = 1 (0x1), region = 78 }
 0x203   :  { %1860 = vsyncpa [#allocation4], 1 }
 0x204   :  { %1862 = vsyncpa [#allocation4 + $0x1], 1 }

</bundles_post_ra>
